<compile_context>
chip_gen: v6e
topology: v6e:2x2x1
jax: 0.10.0
libtpu: 0.0.40
codegen_flags: <defaults>
</compile_context>

<pallas_src>
import functools
import math

import jax
import jax.numpy as jnp
from jax import lax
from jax.experimental import pallas as pl
from jax.experimental.pallas import tpu as pltpu


# ----------------------------------------------------------------------------
# small helpers
# ----------------------------------------------------------------------------
def _round_up(x, m):
    return ((x + m - 1) // m) * m


def _pad2(x, rows, cols):
    return jnp.pad(x, ((0, rows - x.shape[0]), (0, cols - x.shape[1])))


def _vmem_budget_bytes():
    """Per-generation scoped-VMEM budget with headroom (v5e/v6e 128 MiB,
    v7x 64 MiB physical). Falls back to a value safe on every generation."""
    cap = None
    try:
        info = pltpu.get_tpu_info()
        cap = getattr(info, "vmem_capacity_bytes", None)
    except Exception:
        cap = None
    if not cap:
        cap = 64 << 20  # conservative: v7x physical VMEM per TensorCore
    budget = int(min(cap - (8 << 20), 0.85 * cap))
    return max(budget, 32 << 20)


# ----------------------------------------------------------------------------
# Kernel 1: resident path — whole propagation in one kernel, A stays in VMEM.
# ----------------------------------------------------------------------------
def _propagate_resident(a, norm, y0, o_ref, num_layers, alpha):
    last = (1.0 - alpha) * y0          # hoisted out of the layer loop
    norm_dst = alpha * norm            # fold alpha into the dst-side norm once

    def body(_, out):
        h = (norm * out).astype(a.dtype)                    # bf16 MXU operands
        agg = jnp.dot(a, h, preferred_element_type=jnp.float32)   # f32 accum
        return jnp.clip(last + norm_dst * agg, 0.0, 1.0)    # post_step clamp

    # num_layers is static & small: unroll so the scheduler overlaps layers.
    o_ref[...] = lax.fori_loop(0, num_layers, body, y0, unroll=True)


def _resident_kernel_unweighted(a_ref, y_ref, o_ref, *, num_layers, alpha):
    a = a_ref[...]
    # Unweighted in-degrees from the VMEM-resident adjacency (no extra HBM
    # pass in the wrapper); f32 accumulation keeps the counts exact.
    deg = jnp.sum(a, axis=1, keepdims=True, dtype=jnp.float32)
    norm = lax.rsqrt(jnp.maximum(deg, 1.0))
    _propagate_resident(a, norm, y_ref[...], o_ref, num_layers, alpha)


def _resident_kernel_weighted(a_ref, norm_ref, y_ref, o_ref, *, num_layers, alpha):
    # Edge-weighted propagation: degrees (hence norm) still come from the
    # binary adjacency and are precomputed by the tiled norm kernel.
    _propagate_resident(a_ref[...], norm_ref[...], y_ref[...], o_ref,
                        num_layers, alpha)


def _resident_call(a_pad, y_pad, norm_pad, num_layers, alpha, budget):
    n_pad, c_pad = y_pad.shape
    a_bytes = a_pad.size * a_pad.dtype.itemsize
    cost = pl.CostEstimate(
        flops=2 * num_layers * n_pad * n_pad * c_pad,
        transcendentals=n_pad,
        bytes_accessed=a_bytes + 2 * n_pad * c_pad * 4,
    )
    if norm_pad is None:
        kern = functools.partial(_resident_kernel_unweighted,
                                 num_layers=num_layers, alpha=float(alpha))
        args = (a_pad, y_pad)
        in_specs = [pl.BlockSpec((n_pad, n_pad), lambda: (0, 0)),
                    pl.BlockSpec((n_pad, c_pad), lambda: (0, 0))]
    else:
        kern = functools.partial(_resident_kernel_weighted,
                                 num_layers=num_layers, alpha=float(alpha))
        args = (a_pad, norm_pad, y_pad)
        in_specs = [pl.BlockSpec((n_pad, n_pad), lambda: (0, 0)),
                    pl.BlockSpec((n_pad, 1), lambda: (0, 0)),
                    pl.BlockSpec((n_pad, c_pad), lambda: (0, 0))]
    return pl.pallas_call(
        kern,
        out_shape=jax.ShapeDtypeStruct((n_pad, c_pad), jnp.float32),
        in_specs=in_specs,
        out_specs=pl.BlockSpec((n_pad, c_pad), lambda: (0, 0)),
        compiler_params=pltpu.CompilerParams(vmem_limit_bytes=budget),
        cost_estimate=cost,
    )(*args)


# ----------------------------------------------------------------------------
# Kernel 2: tiled row-sum -> norm = rsqrt(clamp(deg, 1))  (for streamed path
# and for the edge-weighted case, where degrees come from the binary adj).
# ----------------------------------------------------------------------------
def _norm_kernel(a_ref, norm_ref, acc_ref):
    k = pl.program_id(1)

    @pl.when(k == 0)
    def _():
        acc_ref[...] = jnp.zeros_like(acc_ref)

    acc_ref[...] += jnp.sum(a_ref[...], axis=1, keepdims=True,
                            dtype=jnp.float32)

    @pl.when(k == pl.num_programs(1) - 1)
    def _():
        norm_ref[...] = lax.rsqrt(jnp.maximum(acc_ref[...], 1.0))


def _norm_from_adj(a_pad, budget):
    n_pad = a_pad.shape[0]
    tb = 128
    grid = (n_pad // tb, n_pad // tb)
    return pl.pallas_call(
        _norm_kernel,
        out_shape=jax.ShapeDtypeStruct((n_pad, 1), jnp.float32),
        grid_spec=pltpu.PrefetchScalarGridSpec(
            num_scalar_prefetch=0, grid=grid,
            in_specs=[pl.BlockSpec((tb, tb), lambda i, k: (i, k))],
            out_specs=pl.BlockSpec((tb, 1), lambda i, k: (i, 0)),
            scratch_shapes=[pltpu.VMEM((tb, 1), jnp.float32)]),
        compiler_params=pltpu.CompilerParams(
            dimension_semantics=("parallel", "arbitrary"),
            vmem_limit_bytes=budget),
        cost_estimate=pl.CostEstimate(
            flops=n_pad * n_pad, transcendentals=n_pad,
            bytes_accessed=a_pad.size * a_pad.dtype.itemsize + n_pad * 4),
    )(a_pad)


# ----------------------------------------------------------------------------
# Kernel 3: one propagation layer, tiled over (dst rows, K) — used when A does
# not fit in VMEM.  Row axis "parallel" (v7x megacore), K axis is the
# reduction ("arbitrary") with an f32 accumulator scratch.
# ----------------------------------------------------------------------------
def _prop_layer_kernel(a_ref, yprev_ref, nsrc_ref, ndst_ref, y0_ref, o_ref,
                       acc_ref, *, alpha):
    k = pl.program_id(1)

    @pl.when(k == 0)
    def _():
        acc_ref[...] = jnp.zeros_like(acc_ref)

    h = (nsrc_ref[...] * yprev_ref[...]).astype(a_ref.dtype)   # D^-1/2 Y, narrow
    acc_ref[...] += jnp.dot(a_ref[...], h,
                            preferred_element_type=jnp.float32)

    @pl.when(k == pl.num_programs(1) - 1)
    def _():
        o_ref[...] = jnp.clip(
            (1.0 - alpha) * y0_ref[...]
            + (alpha * ndst_ref[...]) * acc_ref[...], 0.0, 1.0)


def _prop_layer(a_pad, y_prev, norm, y0_pad, alpha, tm, tk, budget):
    n_pad = a_pad.shape[0]
    c_pad = y0_pad.shape[1]
    grid = (n_pad // tm, n_pad // tk)
    kern = functools.partial(_prop_layer_kernel, alpha=float(alpha))
    return pl.pallas_call(
        kern,
        out_shape=jax.ShapeDtypeStruct((n_pad, c_pad), jnp.float32),
        grid_spec=pltpu.PrefetchScalarGridSpec(
            num_scalar_prefetch=0, grid=grid,
            in_specs=[
                pl.BlockSpec((tm, tk), lambda i, k: (i, k)),     # A tile
                pl.BlockSpec((tk, c_pad), lambda i, k: (k, 0)),  # prev layer Y
                pl.BlockSpec((tk, 1), lambda i, k: (k, 0)),      # norm (src)
                pl.BlockSpec((tm, 1), lambda i, k: (i, 0)),      # norm (dst)
                pl.BlockSpec((tm, c_pad), lambda i, k: (i, 0)),  # y0 rows
            ],
            out_specs=pl.BlockSpec((tm, c_pad), lambda i, k: (i, 0)),
            scratch_shapes=[pltpu.VMEM((tm, c_pad), jnp.float32)]),
        compiler_params=pltpu.CompilerParams(
            dimension_semantics=("parallel", "arbitrary"),
            vmem_limit_bytes=budget),
        cost_estimate=pl.CostEstimate(
            flops=2 * n_pad * n_pad * c_pad, transcendentals=0,
            bytes_accessed=(a_pad.size * a_pad.dtype.itemsize
                            + 3 * n_pad * c_pad * 4 + 2 * n_pad * 4)),
    )(a_pad, y_prev, norm, norm, y0_pad)


# ----------------------------------------------------------------------------
# Python wrapper — equivalent of LabelPropagation.forward
# ----------------------------------------------------------------------------
def label_propagation(adj, y_labels, mask=None, edge_weight_adj=None, *,
                      num_layers=3, alpha=0.9, num_classes=None,
                      a_dtype=jnp.bfloat16, block_m=256, block_k=256,
                      force_tiled=False):
    """JAX/Pallas equivalent of LabelPropagation.forward.

    adj:             (N, N) binary adjacency, adj[dst, src] = 1 if edge src->dst
    y_labels:        (N,) int labels or (N, C) float soft labels
    mask:            (N,) bool training-node mask (or None)
    edge_weight_adj: optional (N, N) float adjacency carrying edge weights
    a_dtype:         storage/MXU dtype of the adjacency (bf16 default; binary
                     adjacency is exact in bf16; use float32 for bit-exactness
                     with the reference). Accumulation is always f32.
    block_m/block_k: tiles for the streamed path (use 128-multiples on v5e,
                     256-multiples on v6e/v7x).
    """
    n = adj.shape[0]

    # y.dtype == long  ->  one_hot(...).float()   (num_classes must be static)
    if jnp.issubdtype(y_labels.dtype, jnp.integer):
        if num_classes is None:
            raise ValueError("num_classes must be passed for integer labels "
                             "(no data-dependent max(): avoids a device sync).")
        y = jax.nn.one_hot(y_labels.reshape(-1), num_classes, dtype=jnp.float32)
    else:
        y = y_labels.astype(jnp.float32)
    c = y.shape[1]

    # out = zeros_like(y); out[mask] = y[mask]
    if mask is not None:
        y = jnp.where(mask.reshape(-1, 1), y, 0.0)

    weighted = edge_weight_adj is not None
    c_pad = max(128, _round_up(c, 128))          # lane-dense class dimension
    budget = _vmem_budget_bytes()

    # ---- choose resident (A in VMEM across layers) vs streamed/tiled path ----
    n_res = _round_up(max(n, 8), 128)
    a_itemsize = jnp.dtype(a_dtype).itemsize
    deg_tmp = 0 if (weighted or a_itemsize >= 4) else 4 * n_res * n_res
    resident_need = (n_res * n_res * a_itemsize + deg_tmp
                     + 16 * n_res * c_pad * 4 + (2 << 20))
    use_resident = (not force_tiled) and resident_need <= budget

    if use_resident:
        n_pad = n_res
    else:
        mult = math.lcm(math.lcm(block_m, block_k), 128)
        n_pad = _round_up(max(n, 8), mult)

    # Padded nodes have zero rows/cols and zero labels -> they stay exactly 0
    # and do not perturb real nodes (deg clamp(min=1) keeps norm finite).
    a_prop = (edge_weight_adj if weighted else adj).astype(a_dtype)
    a_pad = _pad2(a_prop, n_pad, n_pad)
    y_pad = _pad2(y, n_pad, c_pad)

    norm_pad = None
    if weighted:
        # in_degrees() counts edges even when edge weights are used.
        norm_pad = _norm_from_adj(_pad2(adj.astype(a_dtype), n_pad, n_pad),
                                  budget)

    if use_resident:
        out_pad = _resident_call(a_pad, y_pad, norm_pad, num_layers, alpha,
                                 budget)
    else:
        if norm_pad is None:  # unweighted: binary adjacency row-sum == degree
            norm_pad = _norm_from_adj(a_pad, budget)
        out_pad = y_pad
        for _ in range(num_layers):  # static, small; one streamed pass over A
            out_pad = _prop_layer(a_pad, out_pad, norm_pad, y_pad, alpha,
                                  block_m, block_k, budget)

    return out_pad[:n, :c]


# ----------------------------------------------------------------------------
# pure-JAX reference (PyTorch semantics)
# ----------------------------------------------------------------------------
def _reference(a_prop, deg, y0, num_layers, alpha):
    norm = jnp.power(jnp.maximum(deg, 1.0), -0.5)
    last = (1.0 - alpha) * y0
    out = y0
    for _ in range(num_layers):
        out = jnp.clip(last + alpha * (a_prop @ (norm * out)) * norm, 0.0, 1.0)
    return out


if __name__ == "__main__":
    key = jax.random.PRNGKey(0)
    N, NUM_CLASSES = 256, 16
    NUM_LAYERS, ALPHA = 3, 0.9

    k_adj, k_lbl, k_w = jax.random.split(key, 3)

    # random directed graph, no self loops
    adj = (jax.random.uniform(k_adj, (N, N)) < 0.05).astype(jnp.float32)
    adj = adj * (1.0 - jnp.eye(N, dtype=jnp.float32))
    labels = jax.random.randint(k_lbl, (N,), 0, NUM_CLASSES)   # "long" labels
    mask = jnp.arange(N) < N // 2                              # train: first half

    y0 = jnp.where(mask[:, None],
                   jax.nn.one_hot(labels, NUM_CLASSES, dtype=jnp.float32), 0.0)
    deg = jnp.sum(adj, axis=1, keepdims=True)
    ref = _reference(adj, deg, y0, NUM_LAYERS, ALPHA)

    # 1) exact-semantics path: f32 adjacency, single resident kernel.
    out_f32 = jax.block_until_ready(label_propagation(
        adj, labels, mask=mask, num_layers=NUM_LAYERS, alpha=ALPHA,
        num_classes=NUM_CLASSES, a_dtype=jnp.float32))
    assert out_f32.shape == (N, NUM_CLASSES) and out_f32.dtype == jnp.float32
    assert jnp.allclose(out_f32, ref, atol=1e-4, rtol=1e-4)

    # 2) default fast path: bf16 adjacency / bf16 MXU operands, f32 accumulate.
    out_bf16 = jax.block_until_ready(label_propagation(
        adj, labels, mask=mask, num_layers=NUM_LAYERS, alpha=ALPHA,
        num_classes=NUM_CLASSES))
    assert jnp.allclose(out_bf16, ref, atol=2e-2)

    # 3) streamed/tiled path (used for large N), forced here at a small size.
    out_tiled = jax.block_until_ready(label_propagation(
        adj, labels, mask=mask, num_layers=NUM_LAYERS, alpha=ALPHA,
        num_classes=NUM_CLASSES, force_tiled=True, block_m=128, block_k=128))
    assert jnp.allclose(out_tiled, ref, atol=2e-2)

    # 4) edge-weighted propagation (u_mul_e); degrees from the binary adjacency.
    w = jax.random.uniform(k_w, (N, N), minval=0.5, maxval=1.5)
    ew_adj = adj * w
    ref_w = _reference(ew_adj, deg, y0, NUM_LAYERS, ALPHA)
    out_w = jax.block_until_ready(label_propagation(
        adj, labels, mask=mask, edge_weight_adj=ew_adj,
        num_layers=NUM_LAYERS, alpha=ALPHA, num_classes=NUM_CLASSES,
        a_dtype=jnp.float32))
    assert jnp.allclose(out_w, ref_w, atol=1e-4, rtol=1e-4)

    print("KERNEL_OK")
</pallas_src>

<mosaic_0001>
module attributes {stable_mosaic.version = 11 : i64} {
  func.func @_resident_kernel_unweighted(%arg0: memref<256x256xf32, #tpu.memory_space<vmem>>, %arg1: memref<256x128xf32, #tpu.memory_space<vmem>>, %arg2: memref<256x128xf32, #tpu.memory_space<vmem>>) attributes {dimension_semantics = [], scalar_prefetch = 0 : i64, scratch_operands = 0 : i64, tpu.core_type = #tpu.core_type<tc>} {
    %c0 = arith.constant 0 : index
    %c0_0 = arith.constant 0 : index
    %0 = vector.load %arg0[%c0, %c0_0] : memref<256x256xf32, #tpu.memory_space<vmem>>, vector<256x256xf32>
    %cst = arith.constant dense<0.000000e+00> : vector<256xf32>
    %1 = vector.multi_reduction <add>, %0, %cst [1] : vector<256x256xf32> to vector<256xf32>
    %2 = vector.shape_cast %1 : vector<256xf32> to vector<256x1xf32>
    %cst_1 = arith.constant 1.000000e+00 : f32
    %3 = vector.broadcast %cst_1 : f32 to vector<256x1xf32>
    %4 = arith.maximumf %2, %3 : vector<256x1xf32>
    %5 = math.rsqrt %4 : vector<256x1xf32>
    %c0_2 = arith.constant 0 : index
    %c0_3 = arith.constant 0 : index
    %6 = vector.load %arg1[%c0_2, %c0_3] : memref<256x128xf32, #tpu.memory_space<vmem>>, vector<256x128xf32>
    %cst_4 = arith.constant 1.000000e-01 : f32
    %7 = vector.broadcast %cst_4 : f32 to vector<256x128xf32>
    %8 = arith.mulf %7, %6 : vector<256x128xf32>
    %cst_5 = arith.constant 0.899999976 : f32
    %9 = vector.broadcast %cst_5 : f32 to vector<256x1xf32>
    %10 = arith.mulf %9, %5 : vector<256x1xf32>
    %c0_i32 = arith.constant 0 : i32
    %11 = vector.broadcast %5 : vector<256x1xf32> to vector<256x128xf32>
    %12 = arith.mulf %11, %6 : vector<256x128xf32>
    %cst_6 = arith.constant dense<0.000000e+00> : vector<256x128xf32>
    %13 = tpu.matmul %0, %12, %cst_6 {dimension_numbers = #tpu.dot_dimension_numbers<[1], [0], [0], [1], [0, 0, 1, 1], [], []>} : vector<256x256xf32>, vector<256x128xf32>, vector<256x128xf32> -> vector<256x128xf32>
    %14 = vector.broadcast %10 : vector<256x1xf32> to vector<256x128xf32>
    %15 = arith.mulf %14, %13 : vector<256x128xf32>
    %16 = arith.addf %8, %15 : vector<256x128xf32>
    %cst_7 = arith.constant 0.000000e+00 : f32
    %cst_8 = arith.constant 1.000000e+00 : f32
    %17 = vector.broadcast %cst_7 : f32 to vector<256x128xf32>
    %18 = arith.maximumf %17, %16 : vector<256x128xf32>
    %19 = vector.broadcast %cst_8 : f32 to vector<256x128xf32>
    %20 = arith.minimumf %19, %18 : vector<256x128xf32>
    %c1_i32 = arith.constant 1 : i32
    %21 = vector.broadcast %5 : vector<256x1xf32> to vector<256x128xf32>
    %22 = arith.mulf %21, %20 : vector<256x128xf32>
    %cst_9 = arith.constant dense<0.000000e+00> : vector<256x128xf32>
    %23 = tpu.matmul %0, %22, %cst_9 {dimension_numbers = #tpu.dot_dimension_numbers<[1], [0], [0], [1], [0, 0, 1, 1], [], []>} : vector<256x256xf32>, vector<256x128xf32>, vector<256x128xf32> -> vector<256x128xf32>
    %24 = vector.broadcast %10 : vector<256x1xf32> to vector<256x128xf32>
    %25 = arith.mulf %24, %23 : vector<256x128xf32>
    %26 = arith.addf %8, %25 : vector<256x128xf32>
    %cst_10 = arith.constant 0.000000e+00 : f32
    %cst_11 = arith.constant 1.000000e+00 : f32
    %27 = vector.broadcast %cst_10 : f32 to vector<256x128xf32>
    %28 = arith.maximumf %27, %26 : vector<256x128xf32>
    %29 = vector.broadcast %cst_11 : f32 to vector<256x128xf32>
    %30 = arith.minimumf %29, %28 : vector<256x128xf32>
    %c2_i32 = arith.constant 2 : i32
    %31 = vector.broadcast %5 : vector<256x1xf32> to vector<256x128xf32>
    %32 = arith.mulf %31, %30 : vector<256x128xf32>
    %cst_12 = arith.constant dense<0.000000e+00> : vector<256x128xf32>
    %33 = tpu.matmul %0, %32, %cst_12 {dimension_numbers = #tpu.dot_dimension_numbers<[1], [0], [0], [1], [0, 0, 1, 1], [], []>} : vector<256x256xf32>, vector<256x128xf32>, vector<256x128xf32> -> vector<256x128xf32>
    %34 = vector.broadcast %10 : vector<256x1xf32> to vector<256x128xf32>
    %35 = arith.mulf %34, %33 : vector<256x128xf32>
    %36 = arith.addf %8, %35 : vector<256x128xf32>
    %cst_13 = arith.constant 0.000000e+00 : f32
    %cst_14 = arith.constant 1.000000e+00 : f32
    %37 = vector.broadcast %cst_13 : f32 to vector<256x128xf32>
    %38 = arith.maximumf %37, %36 : vector<256x128xf32>
    %39 = vector.broadcast %cst_14 : f32 to vector<256x128xf32>
    %40 = arith.minimumf %39, %38 : vector<256x128xf32>
    %c0_15 = arith.constant 0 : index
    %c0_16 = arith.constant 0 : index
    %41 = vector.load %arg2[%c0_15, %c0_16] : memref<256x128xf32, #tpu.memory_space<vmem>>, vector<256x128xf32>
    tpu.vector_store %arg2[%c0_15, %c0_16], %40 {strides = array<i32>} : memref<256x128xf32, #tpu.memory_space<vmem>>, vector<256x128xf32>,
    return
  }
}

</mosaic_0001>

<bundles_post_ra>
// kernel: tpu_custom_call.1
= control target key start
LH: loop header
LB: loop body
LE: loop exit
PB: predicated region body
PF: predicated region fallthrough
CT: control target
= control target key end

     0   :  { %7 = vsyncpa [#allocation3], 0  ;;  %s3254_s0 = inlined_call_operand.hbm [shape: f32[256,256], index: 0, kind: input, shape index: {}]   ;;  %s3255_s1 = inlined_call_operand.hbm [shape: f32[256,128], index: 1, kind: input, shape index: {}]   ;;  %s3256_s2 = inlined_call_operand.hbm [shape: f32[256,128], index: 2, kind: output, shape index: {}]  }
   0x1   :  { %8 = vsyncpa [#allocation6], 0 }
   0x2   :  { %9 = vsyncpa [#allocation4], 0  ;;  %s1831_s9 = smov [#allocation2]  }
   0x3   :  { %s15_s10 = sshll.u32 %s1831_s9, 4  ;;  %s16_s10 = int_to_ptr.vmem [resolvable:$true] %s15_s10 }
   0x4   :  { %s1773_s11 = scalar_lea.vmem %s16_s10, 8192  ;;  %p1778_p1 = scmp.lt.s32.totalorder %s16_s10, %s16_s10 }
   0x5   :  { %p1774_p0 = scmp.ne.s32.totalorder %s16_s10, %s1773_s11  ;;  %p1779_p2 = scmp.lt.s32.totalorder %s1773_s11, %s1773_s11 }
   0x7   :  { %p1780_p3 = por %p1779_p2, %p1778_p1 }
   0x9   :  { %p1781_p4 = pnand %p1780_p3, %p1774_p0 }
   0xb   :  { %1784 = shalt.err (!%p1781_p4)
}
   0xc   :  { %s1832_s12 = smov 256   ;;  %s1833_s13 = smov 16  }
   0xd   :  { %21 = dma.hbm_to_vmem [thread:$0]  %s3254_s0, 8192, %s16_s10, [#allocation3], %s1832_s12, %s1832_s12, %s1833_s13  }
   0xe   :  { %s1834_s16 = smov [#allocation5]  }
   0xf   :  { %s27_s17 = sshll.u32 %s1834_s16, 4  ;;  %s28_s17 = int_to_ptr.vmem [resolvable:$true] %s27_s17 }
  0x10   :  { %s1793_s18 = scalar_lea.vmem %s28_s17, 4096  ;;  %p1798_p6 = scmp.lt.s32.totalorder %s28_s17, %s28_s17 }
  0x11   :  { %p1794_p5 = scmp.ne.s32.totalorder %s28_s17, %s1793_s18  ;;  %p1799_p7 = scmp.lt.s32.totalorder %s1793_s18, %s1793_s18 }
  0x13   :  { %p1800_p8 = por %p1799_p7, %p1798_p6 }
  0x15   :  { %p1801_p9 = pnand %p1800_p8, %p1794_p5 }
  0x17   :  { %1804 = shalt.err (!%p1801_p9)
}
  0x18   :  { %s1835_s19 = smov 128   ;;  %s1836_s20 = smov 8  }
  0x19   :  { %33 = dma.hbm_to_vmem [thread:$0]  %s3255_s1, 4096, %s28_s17, [#allocation6], %s1835_s19, %s1835_s19, %s1836_s20  }
  0x1a   :  { %1825 = dma.done.wait [#allocation3], 8192  }
  0x1b   :  { %1826 = vsyncadd [#allocation3], 4294959104 }
  0x1c   :  { %1827 = dma.done.wait [#allocation6], 4096  }
  0x1d   :  { %1828 = vsyncadd [#allocation6], 4294963200  ;;  %v70_v0 = vld [vmem:[#allocation2 + $0xf0] sm:$0xff]  ;;  %v1863_v1 = vld [vmem:[#allocation2 + $0xf8] sm:$0xff]  ;;  %v3257_v53 = vmov 0.0   ;;  %s1838_s0 = smov [#allocation7]  }
  0x1e   :  { %3542 = vst [vmem:[#allocation11_spill] sm:$0xff] %v1863_v1  ;;  %v1865_v2 = vld [vmem:[#allocation2 + $0xe0] sm:$0xff]  ;;  %v149_v3 = vadd.f32 %v1863_v1, %v70_v0  ;;  %v1868_v4 = vld [vmem:[#allocation2 + $0xe8] sm:$0xff]  ;;  %v1870_v5 = vld [vmem:[#allocation2 + $0xd0] sm:$0xff]  ;;  %392 = vmatprep.subr.mxu0 %v3257_v53  ;;  %1565 = vmatprep.subr.mxu1 %v3257_v53  ;;  %s1552_s1 = sshll.u32 %s1838_s0, 4  ;;  %s1553_s1 = int_to_ptr.vmem [resolvable:$true] %s1552_s1 }
  0x1f   :  { %3543 = vst [vmem:[#allocation12_spill] sm:$0xff] %v1865_v2  ;;  %3544 = vst [vmem:[#allocation13_spill] sm:$0xff] %v1868_v4  ;;  %v1872_v6 = vld [vmem:[#allocation2 + $0xd8] sm:$0xff]  ;;  %v1876_v8 = vld [vmem:[#allocation2 + $0xc0] sm:$0xff]  ;;  %v146_v10 = vadd.f32 %v1868_v4, %v1865_v2  ;;  %s1805_s23 = scalar_lea.vmem %s1553_s1, 4096  ;;  %p1810_p11 = scmp.lt.s32.totalorder %s1553_s1, %s1553_s1 }
  0x20   :  { %3545 = vst [vmem:[#allocation14_spill] sm:$0xff] %v1870_v5  ;;  %3546 = vst [vmem:[#allocation15_spill] sm:$0xff] %v1872_v6  ;;  %v143_v7 = vadd.f32 %v1872_v6, %v1870_v5  ;;  %v1878_v9 = vld [vmem:[#allocation2 + $0xc8] sm:$0xff]  ;;  %150 = vadd.xlane.f32.xlu0 %v149_v3  ;;  %v1884_v12 = vld [vmem:[#allocation2 + $0xb0] sm:$0xff]  ;;  %p1806_p10 = scmp.ne.s32.totalorder %s1553_s1, %s1805_s23  ;;  %p1811_p12 = scmp.lt.s32.totalorder %s1805_s23, %s1805_s23 }
  0x21   :  { %3547 = vst [vmem:[#allocation16_spill] sm:$0xff] %v1876_v8  ;;  %v140_v11 = vadd.f32 %v1878_v9, %v1876_v8  ;;  %v1886_v13 = vld [vmem:[#allocation2 + $0xb8] sm:$0xff]  ;;  %v1888_v14 = vld [vmem:[#allocation2 + $0xa0] sm:$0xff]  ;;  %v1890_v15 = vld [vmem:[#allocation2 + $0xa8] sm:$0xff] }
  0x22   :  { %144 = vadd.xlane.f32.xlu1 %v143_v7  ;;  %v137_v16 = vadd.f32 %v1886_v13, %v1884_v12  ;;  %v134_v17 = vadd.f32 %v1890_v15, %v1888_v14  ;;  %v1896_v18 = vld [vmem:[#allocation2 + $0x90] sm:$0xff]  ;;  %v1898_v19 = vld [vmem:[#allocation2 + $0x98] sm:$0xff]  ;;  %v1900_v20 = vld [vmem:[#allocation2 + $0x80] sm:$0xff]  ;;  %p1812_p13 = por %p1811_p12, %p1810_p11 }
  0x23   :  { %v1902_v21 = vld [vmem:[#allocation2 + $0x88] sm:$0xff]  ;;  %v131_v23 = vadd.f32 %v1898_v19, %v1896_v18  ;;  %v1911_v25 = vld [vmem:[#allocation2 + $0x70] sm:$0xff]  ;;  %v1913_v26 = vld [vmem:[#allocation2 + $0x78] sm:$0xff] }
  0x24   :  { %147 = vadd.xlane.f32.xlu0 %v146_v10  ;;  %v1904_v22 = vld [vmem:[#allocation2 + $0x8] sm:$0xff]  ;;  %v128_v24 = vadd.f32 %v1902_v21, %v1900_v20  ;;  %v1915_v27 = vld [vmem:[#allocation2 + $0x60] sm:$0xff]  ;;  %v125_v29 = vadd.f32 %v1913_v26, %v1911_v25  ;;  %v1923_v31 = vld [vmem:[#allocation2 + $0x50] sm:$0xff]  ;;  %p1813_p0 = pnand %p1812_p13, %p1806_p10 }
  0x25   :  { %3548 = vst [vmem:[#allocation17_spill] sm:$0xff] %v1904_v22  ;;  %456 = vmatprep.mubr.f32.mxu0 %v1904_v22  ;;  %v1917_v28 = vld [vmem:[#allocation2 + $0x68] sm:$0xff]  ;;  %v1925_v32 = vld [vmem:[#allocation2 + $0x58] sm:$0xff]  ;;  %v1927_v33 = vld [vmem:[#allocation2 + $0x40] sm:$0xff] }
  0x26   :  { %141 = vadd.xlane.f32.xlu1 %v140_v11  ;;  %v122_v30 = vadd.f32 %v1917_v28, %v1915_v27  ;;  %v1929_v34 = vld [vmem:[#allocation2 + $0x48] sm:$0xff]  ;;  %v119_v35 = vadd.f32 %v1925_v32, %v1923_v31  ;;  %v1935_v37 = vld [vmem:[#allocation2 + $0x30] sm:$0xff]  ;;  %v1937_v38 = vld [vmem:[#allocation2 + $0x38] sm:$0xff] }
  0x27   :  { %v116_v36 = vadd.f32 %v1929_v34, %v1927_v33  ;;  %v1939_v39 = vld [vmem:[#allocation2 + $0x20] sm:$0xff]  ;;  %v1941_v40 = vld [vmem:[#allocation2 + $0x28] sm:$0xff]  ;;  %v113_v42 = vadd.f32 %v1937_v38, %v1935_v37  ;;  %v1950_v44 = vld [vmem:[#allocation2 + $0x10] sm:$0xff] }
  0x28   :  { %138 = vadd.xlane.f32.xlu0 %v137_v16  ;;  %v1943_v41 = vld [vmem:[#allocation2 + $0x108] sm:$0xff]  ;;  %v110_v43 = vadd.f32 %v1941_v40, %v1939_v39  ;;  %v1952_v45 = vld [vmem:[#allocation2 + $0x18] sm:$0xff]  ;;  %v1954_v46 = vld [vmem:[#allocation2] sm:$0xff] }
  0x29   :  { %536 = vmatprep.mubr.f32.mxu1 %v1943_v41  ;;  %v107_v47 = vadd.f32 %v1952_v45, %v1950_v44  ;;  %v104_v48 = vadd.f32 %v1904_v22, %v1954_v46  ;;  %v1960_v49 = vld [vmem:[#allocation2 + $0x1f0] sm:$0xff]  ;;  %v1962_v50 = vld [vmem:[#allocation2 + $0x1f8] sm:$0xff]  ;;  %v1964_v51 = vld [vmem:[#allocation2 + $0x1e0] sm:$0xff] }
  0x2a   :  { %135 = vadd.xlane.f32.xlu1 %v134_v17  ;;  %3549 = vst [vmem:[#allocation18_spill] sm:$0xff] %v1960_v49  ;;  %3550 = vst [vmem:[#allocation19_spill] sm:$0xff] %v1962_v50  ;;  %v1966_v52 = vld [vmem:[#allocation2 + $0x1e8] sm:$0xff]  ;;  %v197_v54 = vadd.f32 %v1962_v50, %v1960_v49  ;;  %v1974_v56 = vld [vmem:[#allocation2 + $0x1d0] sm:$0xff] }
  0x2b   :  { %3551 = vst [vmem:[#allocation20_spill] sm:$0xff] %v1964_v51  ;;  %3552 = vst [vmem:[#allocation21_spill] sm:$0xff] %v1966_v52  ;;  %v194_v55 = vadd.f32 %v1966_v52, %v1964_v51  ;;  %v1976_v57 = vld [vmem:[#allocation2 + $0x1d8] sm:$0xff]  ;;  %v1978_v58 = vld [vmem:[#allocation2 + $0x1c0] sm:$0xff] }
  0x2c   :  { %132 = vadd.xlane.f32.xlu0 %v131_v23  ;;  %3553 = vst [vmem:[#allocation22_spill] sm:$0xff] %v1974_v56  ;;  %3554 = vst [vmem:[#allocation23_spill] sm:$0xff] %v1976_v57  ;;  %v1980_v59 = vld [vmem:[#allocation2 + $0x1c8] sm:$0xff]  ;;  %v191_v60 = vadd.f32 %v1976_v57, %v1974_v56  ;;  %v1986_v62 = vld [vmem:[#allocation2 + $0x1b0] sm:$0xff] }
  0x2d   :  { %3555 = vst [vmem:[#allocation24_spill] sm:$0xff] %v1978_v58  ;;  %v188_v61 = vadd.f32 %v1980_v59, %v1978_v58  ;;  %v1988_v63 = vld [vmem:[#allocation2 + $0x1b8] sm:$0xff]  ;;  %v1990_v0 = vld [vmem:[#allocation2 + $0x1a0] sm:$0xff]  ;;  %v1992_v3 = vld [vmem:[#allocation2 + $0x1a8] sm:$0xff] }
  0x2e   :  { %129 = vadd.xlane.f32.xlu1 %v128_v24  ;;  %v185_v7 = vadd.f32 %v1988_v63, %v1986_v62  ;;  %v182_v10 = vadd.f32 %v1992_v3, %v1990_v0  ;;  %v1998_v11 = vld [vmem:[#allocation2 + $0x190] sm:$0xff]  ;;  %v2000_v16 = vld [vmem:[#allocation2 + $0x198] sm:$0xff]  ;;  %v2002_v17 = vld [vmem:[#allocation2 + $0x180] sm:$0xff] }
  0x2f   :  { %v2004_v23 = vld [vmem:[#allocation2 + $0x188] sm:$0xff]  ;;  %v179_v24 = vadd.f32 %v2000_v16, %v1998_v11  ;;  %v2048_v49 = vld [vmem:[#allocation2 + $0x118] sm:$0xff]  ;;  %v2050_v50 = vld [vmem:[#allocation2 + $0x100] sm:$0xff] }
  0x30   :  { %126 = vadd.xlane.f32.xlu0 %v125_v29  ;;  %v176_v29 = vadd.f32 %v2004_v23, %v2002_v17  ;;  %v2040_v53 = vld [vmem:[#allocation2 + $0x128] sm:$0xff]  ;;  %v2056_v8 = vld [vmem:[#allocation5 + $0x78] sm:$0xff] }
  0x31   :  { %3556 = vst [vmem:[#allocation25_spill] sm:$0xff] %v2056_v8 }
  0x32   :  { %123 = vadd.xlane.f32.xlu1 %v122_v30  ;;  %v2010_v30 = vld [vmem:[#allocation2 + $0x170] sm:$0xff] }
  0x34   :  { %120 = vadd.xlane.f32.xlu0 %v119_v35  ;;  %v2012_v35 = vld [vmem:[#allocation2 + $0x178] sm:$0xff] }
  0x36   :  { %117 = vadd.xlane.f32.xlu1 %v116_v36  ;;  %v2014_v36 = vld [vmem:[#allocation2 + $0x160] sm:$0xff] }
  0x38   :  { %114 = vadd.xlane.f32.xlu0 %v113_v42  ;;  %v2016_v42 = vld [vmem:[#allocation2 + $0x168] sm:$0xff] }
  0x3a   :  { %111 = vadd.xlane.f32.xlu1 %v110_v43  ;;  %v173_v43 = vadd.f32 %v2012_v35, %v2010_v30 }
  0x3c   :  { %108 = vadd.xlane.f32.xlu0 %v107_v47  ;;  %v170_v47 = vadd.f32 %v2016_v42, %v2014_v36 }
  0x3e   :  { %105 = vadd.xlane.f32.xlu1 %v104_v48  ;;  %v2022_v48 = vld [vmem:[#allocation2 + $0x150] sm:$0xff] }
  0x40   :  { %198 = vadd.xlane.f32.xlu0 %v197_v54  ;;  %v2024_v54 = vld [vmem:[#allocation2 + $0x158] sm:$0xff] }
  0x42   :  { %195 = vadd.xlane.f32.xlu1 %v194_v55  ;;  %v2026_v55 = vld [vmem:[#allocation2 + $0x140] sm:$0xff] }
  0x44   :  { %192 = vadd.xlane.f32.xlu0 %v191_v60  ;;  %v2028_v60 = vld [vmem:[#allocation2 + $0x148] sm:$0xff] }
  0x46   :  { %189 = vadd.xlane.f32.xlu1 %v188_v61  ;;  %v167_v61 = vadd.f32 %v2024_v54, %v2022_v48 }
  0x48   :  { %186 = vadd.xlane.f32.xlu0 %v185_v7  ;;  %v164_v7 = vadd.f32 %v2028_v60, %v2026_v55 }
  0x4a   :  { %183 = vadd.xlane.f32.xlu1 %v182_v10  ;;  %v2034_v10 = vld [vmem:[#allocation2 + $0x130] sm:$0xff] }
  0x4c   :  { %180 = vadd.xlane.f32.xlu0 %v179_v24  ;;  %v2036_v24 = vld [vmem:[#allocation2 + $0x138] sm:$0xff] }
  0x4d   :  { %v161_v22 = vadd.f32 %v2036_v24, %v2034_v10 }
  0x4e   :  { %177 = vadd.xlane.f32.xlu1 %v176_v29  ;;  %v2038_v29 = vld [vmem:[#allocation2 + $0x120] sm:$0xff] }
  0x50   :  { %174 = vadd.xlane.f32.xlu0 %v173_v43  ;;  %v158_v43 = vadd.f32 %v2040_v53, %v2038_v29 }
  0x52   :  { %171 = vadd.xlane.f32.xlu1 %v170_v47  ;;  %v2046_v47 = vld [vmem:[#allocation2 + $0x110] sm:$0xff] }
  0x53   :  { %v155_v1 = vadd.f32 %v2048_v49, %v2046_v47 }
  0x54   :  { %168 = vadd.xlane.f32.xlu0 %v167_v61  ;;  %v152_v61 = vadd.f32 %v1943_v41, %v2050_v50 }
  0x56   :  { %165 = vadd.xlane.f32.xlu1 %v164_v7 }
  0x58   :  { %162 = vadd.xlane.f32.xlu0 %v161_v22 }
  0x5a   :  { %159 = vadd.xlane.f32.xlu1 %v158_v43 }
  0x5c   :  { %156 = vadd.xlane.f32.xlu0 %v155_v1 }
  0x5e   :  { %153 = vadd.xlane.f32.xlu1 %v152_v61 }
  0xa9   :  { %v151_v7 = vpop.xlane.xlu0 %150 }
  0xaa   :  { %v215_v51 = vmax.f32 %v151_v7, 1.0 }
  0xab   :  { %v145_v2 = vpop.xlane.xlu1 %144 }
  0xac   :  { %v213_v52 = vmax.f32 %v145_v2, 1.0  ;;  %1637 = vrsqrt.f32 %v215_v51 }
  0xad   :  { %v148_v4 = vpop.xlane.xlu0 %147 }
  0xae   :  { %v214_v56 = vmax.f32 %v148_v4, 1.0  ;;  %1639 = vrsqrt.f32 %v213_v52 }
  0xaf   :  { %v142_v5 = vpop.xlane.xlu1 %141 }
  0xb0   :  { %v212_v57 = vmax.f32 %v142_v5, 1.0  ;;  %1641 = vrsqrt.f32 %v214_v56 }
  0xb1   :  { %v139_v22 = vpop.xlane.xlu0 %138 }
  0xb2   :  { %1643 = vrsqrt.f32 %v212_v57  ;;  %v211_v6 = vmax.f32 %v139_v22, 1.0  ;;  %v2062_v57 = vld [vmem:[#allocation5 + $0x70] sm:$0xff]  ;;  %v3561_v22 = vmov 0.0  }
  0xb3   :  { %v136_v43 = vpop.xlane.xlu1 %135  ;;  %3558 = vst [vmem:[#allocation27_spill] sm:$0xff] %v2062_v57 }
  0xb4   :  { %v210_v58 = vmax.f32 %v136_v43, 1.0  ;;  %1645 = vrsqrt.f32 %v211_v6 }
  0xb5   :  { %v133_v1 = vpop.xlane.xlu0 %132 }
  0xb6   :  { %1647 = vrsqrt.f32 %v210_v58  ;;  %v209_v41 = vmax.f32 %v133_v1, 1.0  ;;  %v2070_v1 = vld [vmem:[#allocation5 + $0x68] sm:$0xff] }
  0xb7   :  { %v130_v61 = vpop.xlane.xlu1 %129  ;;  %3562 = vst [vmem:[#allocation30_spill] sm:$0xff] %v2070_v1 }
  0xb8   :  { %v208_v7 = vmax.f32 %v130_v61, 1.0  ;;  %1649 = vrsqrt.f32 %v209_v41  ;;  %v2072_v41 = vld [vmem:[#allocation5 + $0x60] sm:$0xff] }
  0xb9   :  { %v2058_v2 = vpop.eup %1637  ;;  %v127_v4 = vpop.xlane.xlu0 %126  ;;  %3563 = vst [vmem:[#allocation31_spill] sm:$0xff] %v2072_v41 }
  0xba   :  { %3557 = vst [vmem:[#allocation26_spill] sm:$0xff] %v2058_v2  ;;  %1651 = vrsqrt.f32 %v208_v7  ;;  %v207_v5 = vmax.f32 %v127_v4, 1.0  ;;  %v375_v51 = vmul.f32 %v2058_v2, %v2056_v8 }
  0xbb   :  { %v124_v52 = vpop.xlane.xlu1 %123  ;;  %v2064_v6 = vpop.eup %1639 }
  0xbc   :  { %v206_v56 = vmax.f32 %v124_v52, 1.0  ;;  %3559 = vst [vmem:[#allocation28_spill] sm:$0xff] %v2064_v6  ;;  %1653 = vrsqrt.f32 %v207_v5  ;;  %393 = vmatpush1.msra.mxu0 %v375_v51  ;;  %1597 = vmatpush1.msra.mxu1 %v375_v51  ;;  %v2078_v52 = vld [vmem:[#allocation5 + $0x58] sm:$0xff] }
  0xbd   :  { %v2066_v58 = vpop.eup %1641  ;;  %394 = vmatprep.subr.mxu0 %v3561_v22  ;;  %1566 = vmatprep.subr.mxu1 %v3561_v22  ;;  %v121_v43 = vpop.xlane.xlu0 %120  ;;  %3565 = vst [vmem:[#allocation33_spill] sm:$0xff] %v2078_v52 }
  0xbe   :  { %3560 = vst [vmem:[#allocation29_spill] sm:$0xff] %v2066_v58  ;;  %1655 = vrsqrt.f32 %v206_v56  ;;  %v205_v7 = vmax.f32 %v121_v43, 1.0  ;;  %v374_v4 = vmul.f32 %v2066_v58, %v2062_v57  ;;  %v373_v56 = vmul.f32 %v2064_v6, %v2070_v1 }
  0xbf   :  { %v2074_v61 = vpop.eup %1643  ;;  %v118_v5 = vpop.xlane.xlu1 %117 }
  0xc0   :  { %3564 = vst [vmem:[#allocation32_spill] sm:$0xff] %v2074_v61  ;;  %v204_v51 = vmax.f32 %v118_v5, 1.0  ;;  %1657 = vrsqrt.f32 %v205_v7  ;;  %395 = vmatpush1.msra.mxu0 %v374_v4  ;;  %1598 = vmatpush1.msra.mxu1 %v374_v4  ;;  %v372_v2 = vmul.f32 %v2074_v61, %v2072_v41  ;;  %v2088_v5 = vld [vmem:[#allocation5 + $0x50] sm:$0xff]  ;;  %v2096_v61 = vld [vmem:[#allocation5 + $0x48] sm:$0xff] }
  0xc1   :  { %v2084_v8 = vpop.eup %1645  ;;  %396 = vmatprep.subr.mxu0 %v3561_v22  ;;  %1567 = vmatprep.subr.mxu1 %v3561_v22  ;;  %v115_v43 = vpop.xlane.xlu0 %114  ;;  %3567 = vst [vmem:[#allocation35_spill] sm:$0xff] %v2088_v5  ;;  %3569 = vst [vmem:[#allocation37_spill] sm:$0xff] %v2096_v61 }
  0xc2   :  { %3566 = vst [vmem:[#allocation34_spill] sm:$0xff] %v2084_v8  ;;  %1659 = vrsqrt.f32 %v204_v51  ;;  %397 = vmatpush1.msra.mxu0 %v373_v56  ;;  %1599 = vmatpush1.msra.mxu1 %v373_v56  ;;  %v203_v7 = vmax.f32 %v115_v43, 1.0  ;;  %v371_v1 = vmul.f32 %v2084_v8, %v2078_v52  ;;  %v2104_v43 = vld [vmem:[#allocation5 + $0x40] sm:$0xff] }
  0xc3   :  { %v2090_v58 = vpop.eup %1647  ;;  %v112_v4 = vpop.xlane.xlu1 %111  ;;  %398 = vmatprep.subr.mxu0 %v3561_v22  ;;  %1568 = vmatprep.subr.mxu1 %v3561_v22  ;;  %3571 = vst [vmem:[#allocation39_spill] sm:$0xff] %v2104_v43 }
  0xc4   :  { %3568 = vst [vmem:[#allocation36_spill] sm:$0xff] %v2090_v58  ;;  %v202_v41 = vmax.f32 %v112_v4, 1.0  ;;  %1661 = vrsqrt.f32 %v203_v7  ;;  %399 = vmatpush1.msra.mxu0 %v372_v2  ;;  %1600 = vmatpush1.msra.mxu1 %v372_v2  ;;  %v370_v51 = vmul.f32 %v2090_v58, %v2088_v5  ;;  %v2112_v58 = vld [vmem:[#allocation5 + $0x38] sm:$0xff] }
  0xc5   :  { %v2100_v57 = vpop.eup %1649  ;;  %400 = vmatprep.subr.mxu0 %v3561_v22  ;;  %1569 = vmatprep.subr.mxu1 %v3561_v22  ;;  %v109_v56 = vpop.xlane.xlu0 %108  ;;  %3573 = vst [vmem:[#allocation41_spill] sm:$0xff] %v2112_v58 }
  0xc6   :  { %3570 = vst [vmem:[#allocation38_spill] sm:$0xff] %v2100_v57  ;;  %1663 = vrsqrt.f32 %v202_v41  ;;  %401 = vmatpush1.msra.mxu0 %v371_v1  ;;  %1601 = vmatpush1.msra.mxu1 %v371_v1  ;;  %v201_v7 = vmax.f32 %v109_v56, 1.0  ;;  %v369_v2 = vmul.f32 %v2100_v57, %v2096_v61  ;;  %v2120_v56 = vld [vmem:[#allocation5 + $0x30] sm:$0xff] }
  0xc7   :  { %v2106_v52 = vpop.eup %1651  ;;  %v106_v4 = vpop.xlane.xlu1 %105  ;;  %402 = vmatprep.subr.mxu0 %v3561_v22  ;;  %1570 = vmatprep.subr.mxu1 %v3561_v22  ;;  %3575 = vst [vmem:[#allocation43_spill] sm:$0xff] %v2120_v56 }
  0xc8   :  { %3572 = vst [vmem:[#allocation40_spill] sm:$0xff] %v2106_v52  ;;  %v200_v5 = vmax.f32 %v106_v4, 1.0  ;;  %1665 = vrsqrt.f32 %v201_v7  ;;  %403 = vmatpush1.msra.mxu0 %v370_v51  ;;  %1602 = vmatpush1.msra.mxu1 %v370_v51  ;;  %v368_v41 = vmul.f32 %v2106_v52, %v2104_v43  ;;  %v2128_v52 = vld [vmem:[#allocation5 + $0x28] sm:$0xff] }
  0xc9   :  { %v2116_v8 = vpop.eup %1653  ;;  %404 = vmatprep.subr.mxu0 %v3561_v22  ;;  %1571 = vmatprep.subr.mxu1 %v3561_v22  ;;  %v199_v1 = vpop.xlane.xlu0 %198  ;;  %3577 = vst [vmem:[#allocation45_spill] sm:$0xff] %v2128_v52 }
  0xca   :  { %3574 = vst [vmem:[#allocation42_spill] sm:$0xff] %v2116_v8  ;;  %1667 = vrsqrt.f32 %v200_v5  ;;  %405 = vmatpush1.msra.mxu0 %v369_v2  ;;  %1603 = vmatpush1.msra.mxu1 %v369_v2  ;;  %v231_v7 = vmax.f32 %v199_v1, 1.0  ;;  %v367_v51 = vmul.f32 %v2116_v8, %v2112_v58  ;;  %v2136_v1 = vld [vmem:[#allocation5 + $0x20] sm:$0xff] }
  0xcb   :  { %v2122_v61 = vpop.eup %1655  ;;  %v196_v4 = vpop.xlane.xlu1 %195  ;;  %406 = vmatprep.subr.mxu0 %v3561_v22  ;;  %1572 = vmatprep.subr.mxu1 %v3561_v22  ;;  %3579 = vst [vmem:[#allocation47_spill] sm:$0xff] %v2136_v1 }
  0xcc   :  { %3576 = vst [vmem:[#allocation44_spill] sm:$0xff] %v2122_v61  ;;  %v230_v43 = vmax.f32 %v196_v4, 1.0  ;;  %1669 = vrsqrt.f32 %v231_v7  ;;  %407 = vmatpush1.msra.mxu0 %v368_v41  ;;  %1604 = vmatpush1.msra.mxu1 %v368_v41  ;;  %v366_v5 = vmul.f32 %v2122_v61, %v2120_v56  ;;  %v2144_v61 = vld [vmem:[#allocation5 + $0x18] sm:$0xff] }
  0xcd   :  { %v2132_v57 = vpop.eup %1657  ;;  %408 = vmatprep.subr.mxu0 %v3561_v22  ;;  %1573 = vmatprep.subr.mxu1 %v3561_v22  ;;  %v193_v2 = vpop.xlane.xlu0 %192  ;;  %3581 = vst [vmem:[#allocation49_spill] sm:$0xff] %v2144_v61 }
  0xce   :  { %3578 = vst [vmem:[#allocation46_spill] sm:$0xff] %v2132_v57  ;;  %1671 = vrsqrt.f32 %v230_v43  ;;  %409 = vmatpush1.msra.mxu0 %v367_v51  ;;  %1605 = vmatpush1.msra.mxu1 %v367_v51  ;;  %v229_v7 = vmax.f32 %v193_v2, 1.0  ;;  %v365_v41 = vmul.f32 %v2132_v57, %v2128_v52  ;;  %v2152_v2 = vld [vmem:[#allocation5 + $0x10] sm:$0xff] }
  0xcf   :  { %v2138_v58 = vpop.eup %1659  ;;  %v190_v4 = vpop.xlane.xlu1 %189  ;;  %410 = vmatprep.subr.mxu0 %v3561_v22  ;;  %1574 = vmatprep.subr.mxu1 %v3561_v22  ;;  %3583 = vst [vmem:[#allocation51_spill] sm:$0xff] %v2152_v2 }
  0xd0   :  { %3580 = vst [vmem:[#allocation48_spill] sm:$0xff] %v2138_v58  ;;  %v228_v56 = vmax.f32 %v190_v4, 1.0  ;;  %1673 = vrsqrt.f32 %v229_v7  ;;  %411 = vmatpush1.msra.mxu0 %v366_v5  ;;  %1606 = vmatpush1.msra.mxu1 %v366_v5  ;;  %v364_v43 = vmul.f32 %v2138_v58, %v2136_v1  ;;  %v2160_v58 = vld [vmem:[#allocation5 + $0x8] sm:$0xff] }
  0xd1   :  { %v2148_v8 = vpop.eup %1661  ;;  %412 = vmatprep.subr.mxu0 %v3561_v22  ;;  %1575 = vmatprep.subr.mxu1 %v3561_v22  ;;  %v187_v51 = vpop.xlane.xlu0 %186  ;;  %3585 = vst [vmem:[#allocation53_spill] sm:$0xff] %v2160_v58 }
  0xd2   :  { %3582 = vst [vmem:[#allocation50_spill] sm:$0xff] %v2148_v8  ;;  %1675 = vrsqrt.f32 %v228_v56  ;;  %413 = vmatpush1.msra.mxu0 %v365_v41  ;;  %1607 = vmatpush1.msra.mxu1 %v365_v41  ;;  %v227_v7 = vmax.f32 %v187_v51, 1.0  ;;  %v363_v5 = vmul.f32 %v2148_v8, %v2144_v61  ;;  %v2168_v51 = vld [vmem:[#allocation5] sm:$0xff] }
  0xd3   :  { %v2154_v52 = vpop.eup %1663  ;;  %v184_v4 = vpop.xlane.xlu1 %183  ;;  %414 = vmatprep.subr.mxu0 %v3561_v22  ;;  %1576 = vmatprep.subr.mxu1 %v3561_v22  ;;  %3587 = vst [vmem:[#allocation55_spill] sm:$0xff] %v2168_v51 }
  0xd4   :  { %3584 = vst [vmem:[#allocation52_spill] sm:$0xff] %v2154_v52  ;;  %v226_v1 = vmax.f32 %v184_v4, 1.0  ;;  %1677 = vrsqrt.f32 %v227_v7  ;;  %415 = vmatpush1.msra.mxu0 %v364_v43  ;;  %1608 = vmatpush1.msra.mxu1 %v364_v43  ;;  %v362_v56 = vmul.f32 %v2154_v52, %v2152_v2  ;;  %v2176_v52 = vld [vmem:[#allocation5 + $0xf8] sm:$0xff] }
  0xd5   :  { %v2164_v57 = vpop.eup %1665  ;;  %416 = vmatprep.subr.mxu0 %v3561_v22  ;;  %1577 = vmatprep.subr.mxu1 %v3561_v22  ;;  %v181_v41 = vpop.xlane.xlu0 %180  ;;  %3589 = vst [vmem:[#allocation57_spill] sm:$0xff] %v2176_v52 }
  0xd6   :  { %3586 = vst [vmem:[#allocation54_spill] sm:$0xff] %v2164_v57  ;;  %1679 = vrsqrt.f32 %v226_v1  ;;  %417 = vmatpush1.msra.mxu0 %v363_v5  ;;  %1609 = vmatpush1.msra.mxu1 %v363_v5  ;;  %v225_v7 = vmax.f32 %v181_v41, 1.0  ;;  %v361_v43 = vmul.f32 %v2164_v57, %v2160_v58  ;;  %v2184_v41 = vld [vmem:[#allocation5 + $0xf0] sm:$0xff] }
  0xd7   :  { %v2170_v61 = vpop.eup %1667  ;;  %v178_v4 = vpop.xlane.xlu1 %177  ;;  %418 = vmatprep.subr.mxu0 %v3561_v22  ;;  %1578 = vmatprep.subr.mxu1 %v3561_v22  ;;  %3591 = vst [vmem:[#allocation59_spill] sm:$0xff] %v2184_v41 }
  0xd8   :  { %3588 = vst [vmem:[#allocation56_spill] sm:$0xff] %v2170_v61  ;;  %v224_v2 = vmax.f32 %v178_v4, 1.0  ;;  %1681 = vrsqrt.f32 %v225_v7  ;;  %419 = vmatpush1.msra.mxu0 %v362_v56  ;;  %1610 = vmatpush1.msra.mxu1 %v362_v56  ;;  %v360_v1 = vmul.f32 %v2170_v61, %v2168_v51  ;;  %v2192_v61 = vld [vmem:[#allocation5 + $0xe8] sm:$0xff] }
  0xd9   :  { %v2180_v8 = vpop.eup %1669  ;;  %420 = vmatprep.subr.mxu0 %v3561_v22  ;;  %1579 = vmatprep.subr.mxu1 %v3561_v22  ;;  %v175_v5 = vpop.xlane.xlu0 %174  ;;  %3593 = vst [vmem:[#allocation61_spill] sm:$0xff] %v2192_v61 }
  0xda   :  { %3590 = vst [vmem:[#allocation58_spill] sm:$0xff] %v2180_v8  ;;  %1683 = vrsqrt.f32 %v224_v2  ;;  %421 = vmatpush1.msra.mxu0 %v361_v43  ;;  %1611 = vmatpush1.msra.mxu1 %v361_v43  ;;  %v223_v7 = vmax.f32 %v175_v5, 1.0  ;;  %v391_v56 = vmul.f32 %v2180_v8, %v2176_v52  ;;  %v2200_v5 = vld [vmem:[#allocation5 + $0xe0] sm:$0xff] }
  0xdb   :  { %v2186_v58 = vpop.eup %1671  ;;  %v172_v4 = vpop.xlane.xlu1 %171  ;;  %422 = vmatprep.subr.mxu0 %v3561_v22  ;;  %1580 = vmatprep.subr.mxu1 %v3561_v22  ;;  %3595 = vst [vmem:[#allocation63_spill] sm:$0xff] %v2200_v5 }
  0xdc   :  { %3592 = vst [vmem:[#allocation60_spill] sm:$0xff] %v2186_v58  ;;  %v222_v51 = vmax.f32 %v172_v4, 1.0  ;;  %1685 = vrsqrt.f32 %v223_v7  ;;  %423 = vmatpush1.msra.mxu0 %v360_v1  ;;  %1612 = vmatpush1.msra.mxu1 %v360_v1  ;;  %v390_v2 = vmul.f32 %v2186_v58, %v2184_v41  ;;  %v2208_v58 = vld [vmem:[#allocation5 + $0xd8] sm:$0xff] }
  0xdd   :  { %v2196_v57 = vpop.eup %1673  ;;  %424 = vmatprep.subr.mxu0 %v3561_v22  ;;  %1581 = vmatprep.subr.mxu1 %v3561_v22  ;;  %v169_v43 = vpop.xlane.xlu0 %168  ;;  %3597 = vst [vmem:[#allocation65_spill] sm:$0xff] %v2208_v58 }
  0xde   :  { %3594 = vst [vmem:[#allocation62_spill] sm:$0xff] %v2196_v57  ;;  %1687 = vrsqrt.f32 %v222_v51  ;;  %425 = vmatpush2.msra.mxu0 %v391_v56  ;;  %1613 = vmatpush2.msra.mxu1 %v391_v56  ;;  %v221_v7 = vmax.f32 %v169_v43, 1.0  ;;  %v389_v1 = vmul.f32 %v2196_v57, %v2192_v61  ;;  %v2216_v43 = vld [vmem:[#allocation5 + $0xd0] sm:$0xff] }
  0xdf   :  { %v2202_v52 = vpop.eup %1675  ;;  %v166_v4 = vpop.xlane.xlu1 %165  ;;  %426 = vmatprep.subr.mxu0 %v3561_v22  ;;  %1582 = vmatprep.subr.mxu1 %v3561_v22  ;;  %3599 = vst [vmem:[#allocation67_spill] sm:$0xff] %v2216_v43 }
  0xe0   :  { %3596 = vst [vmem:[#allocation64_spill] sm:$0xff] %v2202_v52  ;;  %v220_v41 = vmax.f32 %v166_v4, 1.0  ;;  %1689 = vrsqrt.f32 %v221_v7  ;;  %427 = vmatpush2.msra.mxu0 %v390_v2  ;;  %1614 = vmatpush2.msra.mxu1 %v390_v2  ;;  %v388_v51 = vmul.f32 %v2202_v52, %v2200_v5  ;;  %v2224_v52 = vld [vmem:[#allocation5 + $0xc8] sm:$0xff] }
  0xe1   :  { %v2212_v8 = vpop.eup %1677  ;;  %428 = vmatprep.subr.mxu0 %v3561_v22  ;;  %1583 = vmatprep.subr.mxu1 %v3561_v22  ;;  %v163_v56 = vpop.xlane.xlu0 %162 }
  0xe2   :  { %3598 = vst [vmem:[#allocation66_spill] sm:$0xff] %v2212_v8  ;;  %1691 = vrsqrt.f32 %v220_v41  ;;  %429 = vmatpush2.msra.mxu0 %v389_v1  ;;  %1615 = vmatpush2.msra.mxu1 %v389_v1  ;;  %v219_v7 = vmax.f32 %v163_v56, 1.0  ;;  %v387_v2 = vmul.f32 %v2212_v8, %v2208_v58  ;;  %v2232_v56 = vld [vmem:[#allocation5 + $0xc0] sm:$0xff] }
  0xe3   :  { %v2218_v61 = vpop.eup %1679  ;;  %v160_v4 = vpop.xlane.xlu1 %159  ;;  %430 = vmatprep.subr.mxu0 %v3561_v22  ;;  %1584 = vmatprep.subr.mxu1 %v3561_v22 }
  0xe4   :  { %3600 = vst [vmem:[#allocation68_spill] sm:$0xff] %v2218_v61  ;;  %v218_v5 = vmax.f32 %v160_v4, 1.0  ;;  %1693 = vrsqrt.f32 %v219_v7  ;;  %431 = vmatpush2.msra.mxu0 %v388_v51  ;;  %1616 = vmatpush2.msra.mxu1 %v388_v51  ;;  %v386_v41 = vmul.f32 %v2218_v61, %v2216_v43  ;;  %v2240_v61 = vld [vmem:[#allocation5 + $0xb8] sm:$0xff] }
  0xe5   :  { %v2228_v57 = vpop.eup %1681  ;;  %432 = vmatprep.subr.mxu0 %v3561_v22  ;;  %1585 = vmatprep.subr.mxu1 %v3561_v22  ;;  %v157_v1 = vpop.xlane.xlu0 %156  ;;  %3603 = vst [vmem:[#allocation71_spill] sm:$0xff] %v2240_v61 }
  0xe6   :  { %3601 = vst [vmem:[#allocation69_spill] sm:$0xff] %v2228_v57  ;;  %1695 = vrsqrt.f32 %v218_v5  ;;  %433 = vmatpush2.msra.mxu0 %v387_v2  ;;  %1617 = vmatpush2.msra.mxu1 %v387_v2  ;;  %v217_v7 = vmax.f32 %v157_v1, 1.0  ;;  %v385_v51 = vmul.f32 %v2228_v57, %v2224_v52  ;;  %v2248_v2 = vld [vmem:[#allocation5 + $0xb0] sm:$0xff] }
  0xe7   :  { %v2234_v58 = vpop.eup %1683  ;;  %v154_v4 = vpop.xlane.xlu1 %153  ;;  %434 = vmatprep.subr.mxu0 %v3561_v22  ;;  %1586 = vmatprep.subr.mxu1 %v3561_v22  ;;  %3605 = vst [vmem:[#allocation73_spill] sm:$0xff] %v2248_v2 }
  0xe8   :  { %3602 = vst [vmem:[#allocation70_spill] sm:$0xff] %v2234_v58  ;;  %v216_v43 = vmax.f32 %v154_v4, 1.0  ;;  %1697 = vrsqrt.f32 %v217_v7  ;;  %435 = vmatpush2.msra.mxu0 %v386_v41  ;;  %1618 = vmatpush2.msra.mxu1 %v386_v41  ;;  %v384_v5 = vmul.f32 %v2234_v58, %v2232_v56  ;;  %v2256_v41 = vld [vmem:[#allocation5 + $0xa8] sm:$0xff] }
  0xe9   :  { %v2244_v8 = vpop.eup %1685  ;;  %436 = vmatprep.subr.mxu0 %v3561_v22  ;;  %1587 = vmatprep.subr.mxu1 %v3561_v22  ;;  %3607 = vst [vmem:[#allocation75_spill] sm:$0xff] %v2256_v41 }
  0xea   :  { %3604 = vst [vmem:[#allocation72_spill] sm:$0xff] %v2244_v8  ;;  %1699 = vrsqrt.f32 %v216_v43  ;;  %437 = vmatpush2.msra.mxu0 %v385_v51  ;;  %1619 = vmatpush2.msra.mxu1 %v385_v51  ;;  %v383_v7 = vmul.f32 %v2244_v8, %v2240_v61  ;;  %v2264_v51 = vld [vmem:[#allocation5 + $0xa0] sm:$0xff] }
  0xeb   :  { %v2250_v1 = vpop.eup %1687  ;;  %438 = vmatprep.subr.mxu0 %v3561_v22  ;;  %1588 = vmatprep.subr.mxu1 %v3561_v22  ;;  %3609 = vst [vmem:[#allocation77_spill] sm:$0xff] %v2264_v51 }
  0xec   :  { %3606 = vst [vmem:[#allocation74_spill] sm:$0xff] %v2250_v1  ;;  %439 = vmatpush2.msra.mxu0 %v384_v5  ;;  %1620 = vmatpush2.msra.mxu1 %v384_v5  ;;  %v382_v43 = vmul.f32 %v2250_v1, %v2248_v2  ;;  %v2272_v5 = vld [vmem:[#allocation5 + $0x98] sm:$0xff] }
  0xed   :  { %v2260_v4 = vpop.eup %1689  ;;  %440 = vmatprep.subr.mxu0 %v3561_v22  ;;  %1589 = vmatprep.subr.mxu1 %v3561_v22  ;;  %3611 = vst [vmem:[#allocation79_spill] sm:$0xff] %v2272_v5 }
  0xee   :  { %3608 = vst [vmem:[#allocation76_spill] sm:$0xff] %v2260_v4  ;;  %441 = vmatpush2.msra.mxu0 %v383_v7  ;;  %1621 = vmatpush2.msra.mxu1 %v383_v7  ;;  %v381_v8 = vmul.f32 %v2260_v4, %v2256_v41  ;;  %v2280_v7 = vld [vmem:[#allocation5 + $0x90] sm:$0xff] }
  0xef   :  { %v2266_v61 = vpop.eup %1691  ;;  %442 = vmatprep.subr.mxu0 %v3561_v22  ;;  %1590 = vmatprep.subr.mxu1 %v3561_v22 }
  0xf0   :  { %3610 = vst [vmem:[#allocation78_spill] sm:$0xff] %v2266_v61  ;;  %443 = vmatpush2.msra.mxu0 %v382_v43  ;;  %1622 = vmatpush2.msra.mxu1 %v382_v43  ;;  %v380_v2 = vmul.f32 %v2266_v61, %v2264_v51  ;;  %v2288_v43 = vld [vmem:[#allocation5 + $0x88] sm:$0xff] }
  0xf1   :  { %v2276_v1 = vpop.eup %1693  ;;  %444 = vmatprep.subr.mxu0 %v3561_v22  ;;  %1591 = vmatprep.subr.mxu1 %v3561_v22  ;;  %3614 = vst [vmem:[#allocation82_spill] sm:$0xff] %v2288_v43 }
  0xf2   :  { %3612 = vst [vmem:[#allocation80_spill] sm:$0xff] %v2276_v1  ;;  %445 = vmatpush2.msra.mxu0 %v381_v8  ;;  %1623 = vmatpush2.msra.mxu1 %v381_v8  ;;  %v379_v4 = vmul.f32 %v2276_v1, %v2272_v5  ;;  %v2296_v8 = vld [vmem:[#allocation5 + $0x80] sm:$0xff] }
  0xf3   :  { %v2282_v41 = vpop.eup %1695  ;;  %446 = vmatprep.subr.mxu0 %v3561_v22  ;;  %1592 = vmatprep.subr.mxu1 %v3561_v22  ;;  %3616 = vst [vmem:[#allocation84_spill] sm:$0xff] %v2296_v8 }
  0xf4   :  { %3613 = vst [vmem:[#allocation81_spill] sm:$0xff] %v2282_v41  ;;  %447 = vmatpush2.msra.mxu0 %v380_v2  ;;  %1624 = vmatpush2.msra.mxu1 %v380_v2  ;;  %v378_v51 = vmul.f32 %v2282_v41, %v2280_v7 }
  0xf5   :  { %v2292_v61 = vpop.eup %1697  ;;  %448 = vmatprep.subr.mxu0 %v3561_v22  ;;  %1593 = vmatprep.subr.mxu1 %v3561_v22 }
  0xf6   :  { %3615 = vst [vmem:[#allocation83_spill] sm:$0xff] %v2292_v61  ;;  %449 = vmatpush2.msra.mxu0 %v379_v4  ;;  %1625 = vmatpush2.msra.mxu1 %v379_v4  ;;  %v377_v1 = vmul.f32 %v2292_v61, %v2288_v43 }
  0xf7   :  { %v2298_v5 = vpop.eup %1699  ;;  %450 = vmatprep.subr.mxu0 %v3561_v22  ;;  %1594 = vmatprep.subr.mxu1 %v3561_v22 }
  0xf8   :  { %3617 = vst [vmem:[#allocation85_spill] sm:$0xff] %v2298_v5  ;;  %451 = vmatpush2.msra.mxu0 %v378_v51  ;;  %1626 = vmatpush2.msra.mxu1 %v378_v51  ;;  %v376_v2 = vmul.f32 %v2298_v5, %v2296_v8 }
  0xf9   :  { %452 = vmatprep.subr.mxu0 %v3561_v22  ;;  %1595 = vmatprep.subr.mxu1 %v3561_v22 }
  0xfa   :  { %453 = vmatpush2.msra.mxu0 %v377_v1  ;;  %1627 = vmatpush2.msra.mxu1 %v377_v1 }
  0xfb   :  { %454 = vmatprep.subr.mxu0 %v3561_v22  ;;  %1596 = vmatprep.subr.mxu1 %v3561_v22 }
  0xfc   :  { %455 = vmatpush2.msra.mxu0 %v376_v2  ;;  %1628 = vmatpush2.msra.mxu1 %v376_v2 }
  0xfd   :  { %457 = vmatmul.mubr.f32.vlgmr.msra.gmra.mxu0 %v1954_v46  ;;  %537 = vmatmul.mubr.f32.vlgmr.msra.gmra.mxu1 %v2050_v50 }
  0xfe   :  { %461 = vmatprep.mubr.f32.mxu0 %v1952_v45  ;;  %541 = vmatprep.mubr.f32.mxu1 %v2048_v49 }
  0xff   :  { %777 = vmatprep.subr.mxu1 %v3561_v22  ;;  %1162 = vmatprep.subr.mxu0 %v3561_v22 }
 0x101   :  { %462 = vmatmul.mubr.f32.gmra.mxu0 %v1950_v44  ;;  %542 = vmatmul.mubr.f32.gmra.mxu1 %v2046_v47 }
 0x102   :  { %466 = vmatprep.mubr.f32.mxu0 %v1941_v40  ;;  %546 = vmatprep.mubr.f32.mxu1 %v2040_v53 }
 0x105   :  { %467 = vmatmul.mubr.f32.gmra.mxu0 %v1939_v39  ;;  %547 = vmatmul.mubr.f32.gmra.mxu1 %v2038_v29 }
 0x106   :  { %471 = vmatprep.mubr.f32.mxu0 %v1937_v38  ;;  %551 = vmatprep.mubr.f32.mxu1 %v2036_v24 }
 0x109   :  { %472 = vmatmul.mubr.f32.gmra.mxu0 %v1935_v37  ;;  %552 = vmatmul.mubr.f32.gmra.mxu1 %v2034_v10 }
 0x10a   :  { %476 = vmatprep.mubr.f32.mxu0 %v1929_v34  ;;  %556 = vmatprep.mubr.f32.mxu1 %v2028_v60 }
 0x10d   :  { %477 = vmatmul.mubr.f32.gmra.mxu0 %v1927_v33  ;;  %557 = vmatmul.mubr.f32.gmra.mxu1 %v2026_v55 }
 0x10e   :  { %481 = vmatprep.mubr.f32.mxu0 %v1925_v32  ;;  %561 = vmatprep.mubr.f32.mxu1 %v2024_v54  ;;  %v3632_v32 = vld [vmem:[#allocation17_spill] sm:$0xff] }
 0x111   :  { %482 = vmatmul.mubr.f32.gmra.mxu0 %v1923_v31  ;;  %562 = vmatmul.mubr.f32.gmra.mxu1 %v2022_v48  ;;  %v3631_v31 = vld [vmem:[#allocation18_spill] sm:$0xff] }
 0x112   :  { %486 = vmatprep.mubr.f32.mxu0 %v1917_v28  ;;  %566 = vmatprep.mubr.f32.mxu1 %v2016_v42  ;;  %v2372_v28 = vld [vmem:[#allocation2 + $0xf0] sm:$0xff] }
 0x115   :  { %487 = vmatmul.mubr.f32.gmra.mxu0 %v1915_v27  ;;  %567 = vmatmul.mubr.f32.gmra.mxu1 %v2014_v36  ;;  %v3629_v27 = vld [vmem:[#allocation19_spill] sm:$0xff] }
 0x116   :  { %491 = vmatprep.mubr.f32.mxu0 %v1913_v26  ;;  %571 = vmatprep.mubr.f32.mxu1 %v2012_v35  ;;  %v3628_v26 = vld [vmem:[#allocation11_spill] sm:$0xff] }
 0x119   :  { %492 = vmatmul.mubr.f32.gmra.mxu0 %v1911_v25  ;;  %572 = vmatmul.mubr.f32.gmra.mxu1 %v2010_v30  ;;  %v3626_v25 = vld [vmem:[#allocation12_spill] sm:$0xff] }
 0x11a   :  { %496 = vmatprep.mubr.f32.mxu0 %v1902_v21  ;;  %576 = vmatprep.mubr.f32.mxu1 %v2004_v23  ;;  %v3624_v21 = vld [vmem:[#allocation13_spill] sm:$0xff] }
 0x11d   :  { %497 = vmatmul.mubr.f32.gmra.mxu0 %v1900_v20  ;;  %577 = vmatmul.mubr.f32.gmra.mxu1 %v2002_v17  ;;  %v3622_v20 = vld [vmem:[#allocation14_spill] sm:$0xff] }
 0x11e   :  { %501 = vmatprep.mubr.f32.mxu0 %v1898_v19  ;;  %581 = vmatprep.mubr.f32.mxu1 %v2000_v16  ;;  %v3620_v19 = vld [vmem:[#allocation15_spill] sm:$0xff] }
 0x121   :  { %502 = vmatmul.mubr.f32.gmra.mxu0 %v1896_v18  ;;  %582 = vmatmul.mubr.f32.gmra.mxu1 %v1998_v11  ;;  %v3618_v18 = vld [vmem:[#allocation16_spill] sm:$0xff] }
 0x122   :  { %506 = vmatprep.mubr.f32.mxu0 %v1890_v15  ;;  %586 = vmatprep.mubr.f32.mxu1 %v1992_v3  ;;  %v3619_v15 = vld [vmem:[#allocation24_spill] sm:$0xff]  ;;  %3630 = vst [vmem:[#allocation16_spill] sm:$0xff] %v2372_v28 }
 0x125   :  { %507 = vmatmul.mubr.f32.gmra.mxu0 %v1888_v14  ;;  %587 = vmatmul.mubr.f32.gmra.mxu1 %v1990_v0  ;;  %v3621_v14 = vld [vmem:[#allocation23_spill] sm:$0xff] }
 0x126   :  { %511 = vmatprep.mubr.f32.mxu0 %v1886_v13  ;;  %591 = vmatprep.mubr.f32.mxu1 %v1988_v63  ;;  %v3623_v13 = vld [vmem:[#allocation22_spill] sm:$0xff] }
 0x129   :  { %512 = vmatmul.mubr.f32.gmra.mxu0 %v1884_v12  ;;  %592 = vmatmul.mubr.f32.gmra.mxu1 %v1986_v62  ;;  %v3625_v12 = vld [vmem:[#allocation21_spill] sm:$0xff] }
 0x12a   :  { %516 = vmatprep.mubr.f32.mxu0 %v1878_v9  ;;  %596 = vmatprep.mubr.f32.mxu1 %v1980_v59  ;;  %v3627_v9 = vld [vmem:[#allocation20_spill] sm:$0xff] }
 0x12d   :  { %517 = vmatmul.mubr.f32.gmra.mxu0 %v3618_v18  ;;  %597 = vmatmul.mubr.f32.gmra.mxu1 %v3619_v15 }
 0x12e   :  { %521 = vmatprep.mubr.f32.mxu0 %v3620_v19  ;;  %601 = vmatprep.mubr.f32.mxu1 %v3621_v14 }
 0x131   :  { %522 = vmatmul.mubr.f32.gmra.mxu0 %v3622_v20  ;;  %602 = vmatmul.mubr.f32.gmra.mxu1 %v3623_v13 }
 0x132   :  { %526 = vmatprep.mubr.f32.mxu0 %v3624_v21  ;;  %606 = vmatprep.mubr.f32.mxu1 %v3625_v12 }
 0x135   :  { %527 = vmatmul.mubr.f32.gmra.mxu0 %v3626_v25  ;;  %607 = vmatmul.mubr.f32.gmra.mxu1 %v3627_v9 }
 0x136   :  { %531 = vmatprep.mubr.f32.mxu0 %v3628_v26  ;;  %611 = vmatprep.mubr.f32.mxu1 %v3629_v27 }
 0x139   :  { %532 = vmatmul.mubr.f32.gmra.mxu0 %v2372_v28  ;;  %612 = vmatmul.mubr.f32.gmra.mxu1 %v3631_v31 }
 0x13a   :  { %841 = vmatprep.mubr.f32.mxu1 %v3632_v32  ;;  %1226 = vmatprep.mubr.f32.mxu0 %v3632_v32 }
 0x1bd   :  { %v2378_v33 = vpop.f32.mrf.mxu0  ;;  %v2380_v34 = vpop.f32.mrf.mxu1 }
 0x1be   :  { %3633 = vst [vmem:[#allocation24_spill] sm:$0xff] %v2380_v34  ;;  %v3659_v34 = vld [vmem:[#allocation38_spill] sm:$0xff] }
 0x1bf   :  { %v460_v37 = vpop.f32.mrf.mxu0  ;;  %v540_v38 = vpop.f32.mrf.mxu1 }
 0x1c1   :  { %v2382_v39 = vpop.f32.mrf.mxu0  ;;  %v2384_v40 = vpop.f32.mrf.mxu1 }
 0x1c2   :  { %3634 = vst [vmem:[#allocation15_spill] sm:$0xff] %v2384_v40 }
 0x1c3   :  { %v465_v44 = vpop.f32.mrf.mxu0  ;;  %v545_v45 = vpop.f32.mrf.mxu1 }
 0x1c5   :  { %v2386_v46 = vpop.f32.mrf.mxu0  ;;  %v2388_v49 = vpop.f32.mrf.mxu1 }
 0x1c6   :  { %3635 = vst [vmem:[#allocation23_spill] sm:$0xff] %v2388_v49 }
 0x1c7   :  { %v470_v50 = vpop.f32.mrf.mxu0  ;;  %v550_v53 = vpop.f32.mrf.mxu1 }
 0x1c8   :  { %v2425_v53 = vmul.f32 0.9, %v2064_v6 }
 0x1c9   :  { %v2390_v59 = vpop.f32.mrf.mxu0  ;;  %v2392_v62 = vpop.f32.mrf.mxu1 }
 0x1ca   :  { %3636 = vst [vmem:[#allocation14_spill] sm:$0xff] %v2425_v53 }
 0x1cb   :  { %v475_v63 = vpop.f32.mrf.mxu0  ;;  %v555_v0 = vpop.f32.mrf.mxu1 }
 0x1cc   :  { %v3637_v63 = vld [vmem:[#allocation27_spill] sm:$0xff] }
 0x1cd   :  { %v2394_v3 = vpop.f32.mrf.mxu0  ;;  %v2396_v11 = vpop.f32.mrf.mxu1  ;;  %v2428_v0 = vmul.f32 0.1, %v3637_v63 }
 0x1cf   :  { %v480_v16 = vpop.f32.mrf.mxu0  ;;  %v560_v17 = vpop.f32.mrf.mxu1  ;;  %3638 = vst [vmem:[#allocation22_spill] sm:$0xff] %v2428_v0 }
 0x1d0   :  { %v3639_v16 = vld [vmem:[#allocation29_spill] sm:$0xff] }
 0x1d1   :  { %v2398_v23 = vpop.f32.mrf.mxu0  ;;  %v2400_v30 = vpop.f32.mrf.mxu1  ;;  %v2431_v17 = vmul.f32 0.9, %v3639_v16 }
 0x1d3   :  { %v485_v35 = vpop.f32.mrf.mxu0  ;;  %v565_v36 = vpop.f32.mrf.mxu1  ;;  %3640 = vst [vmem:[#allocation13_spill] sm:$0xff] %v2431_v17 }
 0x1d5   :  { %v2402_v42 = vpop.f32.mrf.mxu0  ;;  %v2404_v48 = vpop.f32.mrf.mxu1 }
 0x1d7   :  { %v490_v54 = vpop.f32.mrf.mxu0  ;;  %v570_v55 = vpop.f32.mrf.mxu1 }
 0x1d8   :  { %v3641_v54 = vld [vmem:[#allocation30_spill] sm:$0xff] }
 0x1d9   :  { %v2406_v60 = vpop.f32.mrf.mxu0  ;;  %v2408_v10 = vpop.f32.mrf.mxu1  ;;  %v2436_v55 = vmul.f32 0.1, %v3641_v54  ;;  %v3653_v54 = vld [vmem:[#allocation33_spill] sm:$0xff] }
 0x1db   :  { %v495_v24 = vpop.f32.mrf.mxu0  ;;  %v575_v29 = vpop.f32.mrf.mxu1  ;;  %3642 = vst [vmem:[#allocation21_spill] sm:$0xff] %v2436_v55 }
 0x1dc   :  { %v3643_v24 = vld [vmem:[#allocation32_spill] sm:$0xff] }
 0x1dd   :  { %v2410_v47 = vpop.f32.mrf.mxu0  ;;  %v2412_v1 = vpop.f32.mrf.mxu1  ;;  %v2439_v29 = vmul.f32 0.9, %v3643_v24 }
 0x1df   :  { %v500_v4 = vpop.f32.mrf.mxu0  ;;  %v580_v51 = vpop.f32.mrf.mxu1  ;;  %3644 = vst [vmem:[#allocation12_spill] sm:$0xff] %v2439_v29 }
 0x1e0   :  { %v3645_v51 = vld [vmem:[#allocation25_spill] sm:$0xff] }
 0x1e1   :  { %v503_v2 = vpop.f32.mrf.mxu0  ;;  %v2414_v18 = vpop.f32.mrf.mxu1 }
 0x1e3   :  { %v505_v15 = vpop.f32.mrf.mxu0  ;;  %v585_v19 = vpop.f32.mrf.mxu1 }
 0x1e4   :  { %v2443_v15 = vmul.f32 0.1, %v3645_v51 }
 0x1e5   :  { %v508_v14 = vpop.f32.mrf.mxu0  ;;  %v2416_v20 = vpop.f32.mrf.mxu1 }
 0x1e6   :  { %3646 = vst [vmem:[#allocation20_spill] sm:$0xff] %v2443_v15 }
 0x1e7   :  { %v510_v13 = vpop.f32.mrf.mxu0  ;;  %v590_v21 = vpop.f32.mrf.mxu1 }
 0x1e9   :  { %v513_v12 = vpop.f32.mrf.mxu0  ;;  %v2418_v25 = vpop.f32.mrf.mxu1 }
 0x1eb   :  { %v515_v9 = vpop.f32.mrf.mxu0  ;;  %v595_v26 = vpop.f32.mrf.mxu1 }
 0x1ec   :  { %v3647_v9 = vld [vmem:[#allocation31_spill] sm:$0xff] }
 0x1ed   :  { %v518_v27 = vpop.f32.mrf.mxu0  ;;  %v2420_v31 = vpop.f32.mrf.mxu1  ;;  %v2447_v26 = vmul.f32 0.1, %v3647_v9 }
 0x1ef   :  { %v520_v32 = vpop.f32.mrf.mxu0  ;;  %v600_v37 = vpop.f32.mrf.mxu1  ;;  %3648 = vst [vmem:[#allocation11_spill] sm:$0xff] %v2447_v26 }
 0x1f0   :  { %v3649_v32 = vld [vmem:[#allocation34_spill] sm:$0xff] }
 0x1f1   :  { %v523_v38 = vpop.f32.mrf.mxu0  ;;  %v2422_v44 = vpop.f32.mrf.mxu1  ;;  %v2450_v37 = vmul.f32 0.9, %v3649_v32 }
 0x1f2   :  { %v630_v4 = vmul.f32 %v523_v38, %v2425_v53  ;;  %v2457_v38 = vmul.f32 0.1, %v3653_v54  ;;  %v2472_v54 = vmul.f32 0.9, %v3659_v34 }
 0x1f3   :  { %v525_v45 = vpop.f32.mrf.mxu0  ;;  %v605_v50 = vpop.f32.mrf.mxu1  ;;  %3650 = vst [vmem:[#allocation19_spill] sm:$0xff] %v2450_v37  ;;  %v628_v9 = vmul.f32 %v513_v12, %v2450_v37  ;;  %v3661_v12 = vld [vmem:[#allocation37_spill] sm:$0xff] }
 0x1f4   :  { %v629_v45 = vmul.f32 %v518_v27, %v2439_v29  ;;  %v3651_v50 = vld [vmem:[#allocation26_spill] sm:$0xff]  ;;  %3654 = vst [vmem:[#allocation17_spill] sm:$0xff] %v2457_v38  ;;  %v3657_v29 = vld [vmem:[#allocation35_spill] sm:$0xff]  ;;  %3660 = vst [vmem:[#allocation25_spill] sm:$0xff] %v2472_v54  ;;  %v2478_v37 = vmul.f32 0.1, %v3661_v12 }
 0x1f5   :  { %v528_v35 = vpop.f32.mrf.mxu0  ;;  %v2433_v36 = vpop.f32.mrf.mxu1  ;;  %v2454_v63 = vmul.f32 0.9, %v3651_v50  ;;  %v2469_v28 = vmul.f32 0.1, %v3657_v29  ;;  %v626_v29 = vmul.f32 %v503_v2, %v2472_v54 }
 0x1f6   :  { %v631_v19 = vmul.f32 %v528_v35, %v2431_v17  ;;  %v662_v17 = vadd.f32 %v630_v4, %v2436_v55  ;;  %v661_v40 = vadd.f32 %v629_v45, %v2447_v26  ;;  %3662 = vst [vmem:[#allocation31_spill] sm:$0xff] %v2478_v37  ;;  %v3663_v4 = vld [vmem:[#allocation40_spill] sm:$0xff] }
 0x1f7   :  { %v530_v13 = vpop.f32.mrf.mxu0  ;;  %v610_v21 = vpop.f32.mrf.mxu1  ;;  %3652 = vst [vmem:[#allocation18_spill] sm:$0xff] %v2454_v63  ;;  %3658 = vst [vmem:[#allocation30_spill] sm:$0xff] %v2469_v28 }
 0x1f8   :  { %v663_v51 = vadd.f32 %v631_v19, %v2428_v0  ;;  %v3655_v13 = vld [vmem:[#allocation36_spill] sm:$0xff]  ;;  %v694_v55 = vmax.f32 %v662_v17, 0.0  ;;  %v693_v12 = vmax.f32 %v661_v40, 0.0 }
 0x1f9   :  { %v533_v53 = vpop.f32.mrf.mxu0  ;;  %v2460_v35 = vpop.f32.mrf.mxu1  ;;  %v2463_v21 = vmul.f32 0.9, %v3655_v13 }
 0x1fa   :  { %v632_v27 = vmul.f32 %v533_v53, %v2454_v63  ;;  %v695_v5 = vmax.f32 %v663_v51, 0.0  ;;  %v2481_v53 = vmul.f32 0.9, %v3663_v4  ;;  %v660_v63 = vadd.f32 %v628_v9, %v2457_v38  ;;  %v3668_v9 = vld [vmem:[#allocation44_spill] sm:$0xff] }
 0x1fb   :  { %3656 = vst [vmem:[#allocation27_spill] sm:$0xff] %v2463_v21  ;;  %v535_v8 = vpop.f32.mrf.mxu0  ;;  %v615_v19 = vpop.f32.mrf.mxu1  ;;  %v627_v0 = vmul.f32 %v508_v14, %v2463_v21  ;;  %v3666_v14 = vld [vmem:[#allocation42_spill] sm:$0xff]  ;;  %v3667_v21 = vld [vmem:[#allocation41_spill] sm:$0xff]  ;;  %v2498_v17 = vmul.f32 0.9, %v3668_v9  ;;  %v726_v54 = vmin.f32 %v694_v55, 1.0 }
 0x1fc   :  { %v664_v43 = vadd.f32 %v632_v27, %v2443_v15  ;;  %3664 = vst [vmem:[#allocation26_spill] sm:$0xff] %v2481_v53  ;;  %v3665_v19 = vld [vmem:[#allocation39_spill] sm:$0xff]  ;;  %v2489_v45 = vmul.f32 0.9, %v3666_v14  ;;  %v625_v51 = vmul.f32 %v2410_v47, %v2481_v53  ;;  %v727_v15 = vmin.f32 %v695_v5, 1.0  ;;  %v3671_v5 = vld [vmem:[#allocation46_spill] sm:$0xff] }
 0x1fd   :  { %v2486_v49 = vmul.f32 0.1, %v3665_v19  ;;  %v659_v27 = vadd.f32 %v627_v0, %v2469_v28  ;;  %v2495_v2 = vmul.f32 0.1, %v3667_v21  ;;  %3669 = vst [vmem:[#allocation33_spill] sm:$0xff] %v2498_v17  ;;  %v658_v19 = vadd.f32 %v626_v29, %v2478_v37  ;;  %v3670_v53 = vld [vmem:[#allocation43_spill] sm:$0xff] }
 0x1fe   :  { %v696_v8 = vmax.f32 %v664_v43, 0.0  ;;  %v624_v43 = vmul.f32 %v2406_v60, %v2489_v45  ;;  %v692_v38 = vmax.f32 %v660_v63, 0.0  ;;  %v2505_v0 = vmul.f32 0.1, %v3670_v53  ;;  %v3673_v63 = vld [vmem:[#allocation45_spill] sm:$0xff] }
 0x1ff   :  { %v2508_v40 = vmul.f32 0.9, %v3671_v5  ;;  %v623_v21 = vmul.f32 %v2402_v42, %v2498_v17  ;;  %v691_v28 = vmax.f32 %v659_v27, 0.0  ;;  %v725_v61 = vmin.f32 %v693_v12, 1.0 }
 0x200   :  { %v728_v26 = vmin.f32 %v696_v8, 1.0  ;;  %v657_v8 = vadd.f32 %v625_v51, %v2486_v49  ;;  %v759_v60 = vmul.f32 %v3639_v16, %v727_v15  ;;  %v2515_v55 = vmul.f32 0.1, %v3673_v63  ;;  %v3676_v15 = vld [vmem:[#allocation47_spill] sm:$0xff] }
 0x201   :  { %3672 = vst [vmem:[#allocation35_spill] sm:$0xff] %v2508_v40  ;;  %v622_v53 = vmul.f32 %v2398_v23, %v2508_v40  ;;  %v656_v42 = vadd.f32 %v624_v43, %v2495_v2  ;;  %v690_v17 = vmax.f32 %v658_v19, 0.0  ;;  %v724_v51 = vmin.f32 %v692_v38, 1.0 }
 0x202   :  { %v760_v47 = vmul.f32 %v3651_v50, %v728_v26  ;;  %v3674_v26 = vld [vmem:[#allocation48_spill] sm:$0xff]  ;;  %v758_v27 = vmul.f32 %v2064_v6, %v726_v54  ;;  %v2526_v12 = vmul.f32 0.1, %v3676_v15  ;;  %v655_v23 = vadd.f32 %v623_v21, %v2505_v0  ;;  %v3679_v54 = vld [vmem:[#allocation49_spill] sm:$0xff] }
 0x203   :  { %v2518_v29 = vmul.f32 0.9, %v3674_v26  ;;  %v689_v40 = vmax.f32 %v657_v8, 0.0  ;;  %v723_v43 = vmin.f32 %v691_v28, 1.0  ;;  %v757_v38 = vmul.f32 %v3643_v24, %v725_v61  ;;  %v3683_v61 = vld [vmem:[#allocation51_spill] sm:$0xff] }
 0x204   :  { %778 = vmatpush1.msra.mxu1 %v760_v47  ;;  %v3677_v47 = vld [vmem:[#allocation50_spill] sm:$0xff]  ;;  %v2537_v19 = vmul.f32 0.1, %v3679_v54  ;;  %v722_v21 = vmin.f32 %v690_v17, 1.0  ;;  %v756_v28 = vmul.f32 %v3649_v32, %v724_v51  ;;  %v2548_v8 = vmul.f32 0.1, %v3683_v61 }
 0x205   :  { %3675 = vst [vmem:[#allocation37_spill] sm:$0xff] %v2518_v29  ;;  %779 = vmatprep.subr.mxu1 %v3561_v22  ;;  %v2529_v63 = vmul.f32 0.9, %v3677_v47  ;;  %v621_v16 = vmul.f32 %v2394_v3, %v2518_v29  ;;  %v654_v3 = vadd.f32 %v622_v53, %v2515_v55  ;;  %v688_v29 = vmax.f32 %v656_v42, 0.0  ;;  %v3686_v42 = vld [vmem:[#allocation53_spill] sm:$0xff] }
 0x206   :  { %780 = vmatpush1.msra.mxu1 %v759_v60  ;;  %3680 = vst [vmem:[#allocation39_spill] sm:$0xff] %v2537_v19  ;;  %v3681_v60 = vld [vmem:[#allocation52_spill] sm:$0xff]  ;;  %v721_v53 = vmin.f32 %v689_v40, 1.0  ;;  %v755_v17 = vmul.f32 %v3655_v13, %v723_v43  ;;  %v2559_v51 = vmul.f32 0.1, %v3686_v42  ;;  %v754_v40 = vmul.f32 %v3659_v34, %v722_v21  ;;  %v3692_v42 = vld [vmem:[#allocation58_spill] sm:$0xff] }
 0x207   :  { %3678 = vst [vmem:[#allocation40_spill] sm:$0xff] %v2529_v63  ;;  %781 = vmatprep.subr.mxu1 %v3561_v22  ;;  %v2540_v15 = vmul.f32 0.9, %v3681_v60  ;;  %v620_v6 = vmul.f32 %v2390_v59, %v2529_v63  ;;  %v653_v59 = vadd.f32 %v621_v16, %v2526_v12  ;;  %v687_v63 = vmax.f32 %v655_v23, 0.0  ;;  %v3690_v23 = vld [vmem:[#allocation55_spill] sm:$0xff] }
 0x208   :  { %782 = vmatpush1.msra.mxu1 %v758_v27  ;;  %v3684_v27 = vld [vmem:[#allocation54_spill] sm:$0xff]  ;;  %3687 = vst [vmem:[#allocation44_spill] sm:$0xff] %v2559_v51  ;;  %v720_v16 = vmin.f32 %v688_v29, 1.0  ;;  %v2570_v43 = vmul.f32 0.1, %v3690_v23  ;;  %v753_v29 = vmul.f32 %v3663_v4, %v721_v53  ;;  %v3696_v23 = vld [vmem:[#allocation60_spill] sm:$0xff] }
 0x209   :  { %3682 = vst [vmem:[#allocation42_spill] sm:$0xff] %v2540_v15  ;;  %783 = vmatprep.subr.mxu1 %v3561_v22  ;;  %v2551_v54 = vmul.f32 0.9, %v3684_v27  ;;  %v619_v24 = vmul.f32 %v2386_v46, %v2540_v15  ;;  %v652_v46 = vadd.f32 %v620_v6, %v2537_v19  ;;  %v686_v15 = vmax.f32 %v654_v3, 0.0  ;;  %v3694_v3 = vld [vmem:[#allocation57_spill] sm:$0xff] }
 0x20a   :  { %784 = vmatpush1.msra.mxu1 %v757_v38  ;;  %v3688_v38 = vld [vmem:[#allocation56_spill] sm:$0xff]  ;;  %3691 = vst [vmem:[#allocation46_spill] sm:$0xff] %v2570_v43  ;;  %v2575_v13 = vmul.f32 0.9, %v3692_v42  ;;  %v719_v6 = vmin.f32 %v687_v63, 1.0  ;;  %v752_v19 = vmul.f32 %v3666_v14, %v720_v16  ;;  %v3698_v63 = vld [vmem:[#allocation59_spill] sm:$0xff] }
 0x20b   :  { %3685 = vst [vmem:[#allocation41_spill] sm:$0xff] %v2551_v54  ;;  %785 = vmatprep.subr.mxu1 %v3561_v22  ;;  %v2562_v61 = vmul.f32 0.9, %v3688_v38  ;;  %v618_v32 = vmul.f32 %v2382_v39, %v2551_v54  ;;  %v651_v39 = vadd.f32 %v619_v24, %v2548_v8  ;;  %v685_v54 = vmax.f32 %v653_v59, 0.0 }
 0x20c   :  { %786 = vmatpush1.msra.mxu1 %v756_v28  ;;  %3693 = vst [vmem:[#allocation45_spill] sm:$0xff] %v2575_v13  ;;  %v2581_v21 = vmul.f32 0.1, %v3694_v3  ;;  %v2585_v34 = vmul.f32 0.9, %v3696_v23  ;;  %v648_v24 = vmul.f32 %v2460_v35, %v2575_v13  ;;  %v3702_v35 = vld [vmem:[#allocation61_spill] sm:$0xff] }
 0x20d   :  { %3689 = vst [vmem:[#allocation43_spill] sm:$0xff] %v2562_v61  ;;  %787 = vmatprep.subr.mxu1 %v3561_v22  ;;  %v617_v28 = vmul.f32 %v2378_v33, %v2562_v61  ;;  %v684_v33 = vmax.f32 %v652_v46, 0.0  ;;  %v718_v61 = vmin.f32 %v686_v15, 1.0  ;;  %v2592_v59 = vmul.f32 0.1, %v3698_v63  ;;  %v3704_v63 = vld [vmem:[#allocation64_spill] sm:$0xff] }
 0x20e   :  { %788 = vmatpush1.msra.mxu1 %v755_v17  ;;  %3695 = vst [vmem:[#allocation48_spill] sm:$0xff] %v2581_v21  ;;  %v650_v17 = vadd.f32 %v618_v32, %v2559_v51  ;;  %3697 = vst [vmem:[#allocation47_spill] sm:$0xff] %v2585_v34  ;;  %v683_v3 = vmax.f32 %v651_v39, 0.0  ;;  %v717_v51 = vmin.f32 %v685_v54, 1.0  ;;  %v751_v15 = vmul.f32 %v3668_v9, %v719_v6 }
 0x20f   :  { %789 = vmatprep.subr.mxu1 %v3561_v22  ;;  %3699 = vst [vmem:[#allocation50_spill] sm:$0xff] %v2592_v59  ;;  %v649_v53 = vadd.f32 %v617_v28, %v2570_v43  ;;  %v647_v46 = vmul.f32 %v2433_v36, %v2585_v34  ;;  %v2603_v16 = vmul.f32 0.1, %v3702_v35  ;;  %v2606_v13 = vmul.f32 0.9, %v3704_v63  ;;  %v3706_v36 = vld [vmem:[#allocation63_spill] sm:$0xff] }
 0x210   :  { %790 = vmatpush1.msra.mxu1 %v754_v40  ;;  %v3700_v40 = vld [vmem:[#allocation62_spill] sm:$0xff]  ;;  %v716_v28 = vmin.f32 %v684_v33, 1.0  ;;  %v750_v43 = vmul.f32 %v3671_v5, %v718_v61  ;;  %v680_v39 = vadd.f32 %v648_v24, %v2581_v21  ;;  %v715_v34 = vmin.f32 %v683_v3, 1.0  ;;  %v3710_v24 = vld [vmem:[#allocation65_spill] sm:$0xff]  ;;  %v3712_v21 = vld [vmem:[#allocation68_spill] sm:$0xff] }
 0x211   :  { %791 = vmatprep.subr.mxu1 %v3561_v22  ;;  %v2596_v32 = vmul.f32 0.9, %v3700_v40  ;;  %3703 = vst [vmem:[#allocation52_spill] sm:$0xff] %v2603_v16  ;;  %3705 = vst [vmem:[#allocation51_spill] sm:$0xff] %v2606_v13  ;;  %v681_v6 = vmax.f32 %v649_v53, 0.0  ;;  %v3708_v35 = vld [vmem:[#allocation66_spill] sm:$0xff]  ;;  %v749_v33 = vmul.f32 %v3674_v26, %v717_v51  ;;  %v645_v61 = vmul.f32 %v2420_v31, %v2606_v13 }
 0x212   :  { %792 = vmatpush1.msra.mxu1 %v753_v29  ;;  %v682_v29 = vmax.f32 %v650_v17, 0.0  ;;  %v2617_v17 = vmul.f32 0.9, %v3708_v35  ;;  %v2628_v53 = vmul.f32 0.9, %v3712_v21  ;;  %v712_v31 = vmax.f32 %v680_v39, 0.0 }
 0x213   :  { %3701 = vst [vmem:[#allocation49_spill] sm:$0xff] %v2596_v32  ;;  %793 = vmatprep.subr.mxu1 %v3561_v22  ;;  %v646_v54 = vmul.f32 %v2422_v44, %v2596_v32  ;;  %v679_v44 = vadd.f32 %v647_v46, %v2592_v59  ;;  %v748_v32 = vmul.f32 %v3677_v47, %v716_v28  ;;  %v3713_v46 = vld [vmem:[#allocation67_spill] sm:$0xff] }
 0x214   :  { %794 = vmatpush1.msra.mxu1 %v752_v19  ;;  %v2614_v19 = vmul.f32 0.1, %v3706_v36  ;;  %3709 = vst [vmem:[#allocation53_spill] sm:$0xff] %v2617_v17  ;;  %v714_v36 = vmin.f32 %v682_v29, 1.0  ;;  %v644_v51 = vmul.f32 %v2418_v25, %v2617_v17  ;;  %v2639_v29 = vmul.f32 0.9, %v2228_v57 }
 0x215   :  { %795 = vmatprep.subr.mxu1 %v3561_v22  ;;  %v678_v3 = vadd.f32 %v646_v54, %v2603_v16  ;;  %v747_v59 = vmul.f32 %v3681_v60, %v715_v34  ;;  %v643_v28 = vmul.f32 %v2416_v20, %v2628_v53  ;;  %v711_v17 = vmax.f32 %v679_v44, 0.0 }
 0x216   :  { %796 = vmatpush1.msra.mxu1 %v751_v15  ;;  %3707 = vst [vmem:[#allocation54_spill] sm:$0xff] %v2614_v19  ;;  %v2625_v15 = vmul.f32 0.1, %v3710_v24  ;;  %v713_v24 = vmin.f32 %v681_v6, 1.0  ;;  %3715 = vst [vmem:[#allocation57_spill] sm:$0xff] %v2639_v29  ;;  %v677_v25 = vadd.f32 %v645_v61, %v2614_v19  ;;  %v746_v39 = vmul.f32 %v3684_v27, %v714_v36  ;;  %v3716_v61 = vld [vmem:[#allocation72_spill] sm:$0xff] }
 0x217   :  { %797 = vmatprep.subr.mxu1 %v3561_v22  ;;  %v2647_v54 = vmul.f32 0.1, %v2224_v52  ;;  %v2651_v6 = vmul.f32 0.9, %v2234_v58  ;;  %v642_v34 = vmul.f32 %v2414_v18, %v2639_v29  ;;  %v710_v20 = vmax.f32 %v678_v3, 0.0  ;;  %v3718_v3 = vld [vmem:[#allocation71_spill] sm:$0xff] }
 0x218   :  { %798 = vmatpush1.msra.mxu1 %v750_v43  ;;  %3711 = vst [vmem:[#allocation56_spill] sm:$0xff] %v2625_v15  ;;  %v2636_v43 = vmul.f32 0.1, %v3713_v46  ;;  %v744_v46 = vmin.f32 %v712_v31, 1.0  ;;  %v745_v52 = vmul.f32 %v3688_v38, %v713_v24  ;;  %v2662_v44 = vmul.f32 0.9, %v3716_v61 }
 0x219   :  { %799 = vmatprep.subr.mxu1 %v3561_v22  ;;  %v641_v36 = vmul.f32 %v2412_v1, %v2651_v6  ;;  %v709_v29 = vmax.f32 %v677_v25, 0.0  ;;  %v742_v1 = vmin.f32 %v710_v20, 1.0  ;;  %v3724_v20 = vld [vmem:[#allocation75_spill] sm:$0xff] }
 0x21a   :  { %800 = vmatpush1.msra.mxu1 %v749_v33  ;;  %3714 = vst [vmem:[#allocation55_spill] sm:$0xff] %v2636_v43  ;;  %v676_v33 = vadd.f32 %v644_v51, %v2625_v15  ;;  %3717 = vst [vmem:[#allocation59_spill] sm:$0xff] %v2662_v44  ;;  %v675_v18 = vadd.f32 %v643_v28, %v2636_v43  ;;  %v743_v51 = vmin.f32 %v711_v17, 1.0  ;;  %v3721_v17 = vld [vmem:[#allocation73_spill] sm:$0xff] }
 0x21b   :  { %801 = vmatprep.subr.mxu1 %v3561_v22  ;;  %v640_v24 = vmul.f32 %v2408_v10, %v2662_v44  ;;  %v674_v15 = vadd.f32 %v642_v34, %v2647_v54  ;;  %v776_v28 = vmul.f32 %v3692_v42, %v744_v46  ;;  %v2680_v25 = vmul.f32 0.1, %v3721_v17 }
 0x21c   :  { %802 = vmatpush1.msra.mxu1 %v748_v32  ;;  %v2658_v32 = vmul.f32 0.1, %v2232_v56  ;;  %v3719_v56 = vld [vmem:[#allocation74_spill] sm:$0xff]  ;;  %v708_v19 = vmax.f32 %v676_v33, 0.0  ;;  %v707_v44 = vmax.f32 %v675_v18, 0.0  ;;  %v741_v34 = vmin.f32 %v709_v29, 1.0 }
 0x21d   :  { %803 = vmatprep.subr.mxu1 %v3561_v22  ;;  %v2672_v31 = vmul.f32 0.9, %v3719_v56  ;;  %v775_v33 = vmul.f32 %v3696_v23, %v743_v51  ;;  %v2691_v46 = vmul.f32 0.1, %v3724_v20  ;;  %v774_v29 = vmul.f32 %v3700_v40, %v742_v1  ;;  %v3728_v18 = vld [vmem:[#allocation77_spill] sm:$0xff] }
 0x21e   :  { %804 = vmatpush1.msra.mxu1 %v747_v59  ;;  %v2669_v59 = vmul.f32 0.1, %v3718_v3  ;;  %v673_v10 = vadd.f32 %v641_v36, %v2658_v32  ;;  %v740_v36 = vmin.f32 %v708_v19, 1.0  ;;  %v2702_v51 = vmul.f32 0.1, %v3728_v18 }
 0x21f   :  { %805 = vmatprep.subr.mxu1 %v3561_v22  ;;  %3720 = vst [vmem:[#allocation62_spill] sm:$0xff] %v2672_v31  ;;  %v639_v43 = vmul.f32 %v2404_v48, %v2672_v31  ;;  %3725 = vst [vmem:[#allocation63_spill] sm:$0xff] %v2691_v46  ;;  %v706_v31 = vmax.f32 %v674_v15, 0.0  ;;  %v773_v19 = vmul.f32 %v3704_v63, %v741_v34  ;;  %v3732_v15 = vld [vmem:[#allocation79_spill] sm:$0xff] }
 0x220   :  { %806 = vmatpush1.msra.mxu1 %v746_v39  ;;  %v3722_v39 = vld [vmem:[#allocation76_spill] sm:$0xff]  ;;  %v672_v48 = vadd.f32 %v640_v24, %v2669_v59  ;;  %3729 = vst [vmem:[#allocation67_spill] sm:$0xff] %v2702_v51  ;;  %v739_v24 = vmin.f32 %v707_v44, 1.0  ;;  %v2713_v1 = vmul.f32 0.1, %v3732_v15  ;;  %v772_v44 = vmul.f32 %v3708_v35, %v740_v36  ;;  %v3736_v34 = vld [vmem:[#allocation83_spill] sm:$0xff] }
 0x221   :  { %807 = vmatprep.subr.mxu1 %v3561_v22  ;;  %v2683_v3 = vmul.f32 0.9, %v3722_v39  ;;  %v3738_v15 = vld [vmem:[#allocation23_spill] sm:$0xff] }
 0x222   :  { %808 = vmatpush1.msra.mxu1 %v745_v52  ;;  %v3726_v52 = vld [vmem:[#allocation78_spill] sm:$0xff]  ;;  %3733 = vst [vmem:[#allocation73_spill] sm:$0xff] %v2713_v1  ;;  %v3743_v35 = vld [vmem:[#allocation15_spill] sm:$0xff] }
 0x223   :  { %3723 = vst [vmem:[#allocation61_spill] sm:$0xff] %v2683_v3  ;;  %809 = vmatprep.subr.mxu1 %v3561_v22  ;;  %v2694_v17 = vmul.f32 0.9, %v3726_v52  ;;  %v638_v42 = vmul.f32 %v2400_v30, %v2683_v3  ;;  %v671_v30 = vadd.f32 %v639_v43, %v2680_v25  ;;  %v705_v3 = vmax.f32 %v673_v10, 0.0 }
 0x224   :  { %810 = vmatpush2.msra.mxu1 %v776_v28  ;;  %v3730_v28 = vld [vmem:[#allocation80_spill] sm:$0xff]  ;;  %v738_v43 = vmin.f32 %v706_v31, 1.0  ;;  %v2724_v10 = vmul.f32 0.1, %v2280_v7  ;;  %v771_v31 = vmul.f32 %v3712_v21, %v739_v24  ;;  %v3741_v7 = vld [vmem:[#allocation85_spill] sm:$0xff] }
 0x225   :  { %3727 = vst [vmem:[#allocation65_spill] sm:$0xff] %v2694_v17  ;;  %811 = vmatprep.subr.mxu1 %v3561_v22  ;;  %v2705_v20 = vmul.f32 0.9, %v3730_v28  ;;  %v637_v23 = vmul.f32 %v2396_v11, %v2694_v17  ;;  %v670_v11 = vadd.f32 %v638_v42, %v2691_v46  ;;  %v704_v17 = vmax.f32 %v672_v48, 0.0  ;;  %v3739_v48 = vld [vmem:[#allocation82_spill] sm:$0xff] }
 0x226   :  { %812 = vmatpush2.msra.mxu1 %v775_v33  ;;  %v2716_v33 = vmul.f32 0.9, %v2282_v41  ;;  %3735 = vst [vmem:[#allocation77_spill] sm:$0xff] %v2724_v10  ;;  %v737_v42 = vmin.f32 %v705_v3, 1.0  ;;  %v2735_v36 = vmul.f32 0.1, %v3739_v48  ;;  %v770_v3 = vmul.f32 %v2228_v57, %v738_v43 }
 0x227   :  { %3731 = vst [vmem:[#allocation71_spill] sm:$0xff] %v2705_v20  ;;  %813 = vmatprep.subr.mxu1 %v3561_v22  ;;  %v636_v18 = vmul.f32 %v2392_v62, %v2705_v20  ;;  %v669_v62 = vadd.f32 %v637_v23, %v2702_v51  ;;  %v703_v20 = vmax.f32 %v671_v30, 0.0  ;;  %v736_v23 = vmin.f32 %v704_v17, 1.0  ;;  %v3744_v30 = vld [vmem:[#allocation84_spill] sm:$0xff]  ;;  %v3818_v57 = vld [vmem:[#allocation11_spill] sm:$0xff] }
 0x228   :  { %814 = vmatpush2.msra.mxu1 %v774_v29  ;;  %3734 = vst [vmem:[#allocation75_spill] sm:$0xff] %v2716_v33  ;;  %v2727_v29 = vmul.f32 0.9, %v3736_v34  ;;  %v635_v63 = vmul.f32 %v3738_v15, %v2716_v33  ;;  %3740 = vst [vmem:[#allocation23_spill] sm:$0xff] %v2735_v36  ;;  %v702_v33 = vmax.f32 %v670_v11, 0.0  ;;  %v769_v51 = vmul.f32 %v2234_v58, %v737_v42 }
 0x229   :  { %815 = vmatprep.subr.mxu1 %v3561_v22  ;;  %v668_v15 = vadd.f32 %v636_v18, %v2713_v1  ;;  %v2746_v24 = vmul.f32 0.1, %v3744_v30  ;;  %v768_v43 = vmul.f32 %v3716_v61, %v736_v23 }
 0x22a   :  { %816 = vmatpush2.msra.mxu1 %v773_v19  ;;  %3737 = vst [vmem:[#allocation79_spill] sm:$0xff] %v2727_v29  ;;  %v2738_v19 = vmul.f32 0.9, %v3741_v7  ;;  %v634_v46 = vmul.f32 %v3743_v35, %v2727_v29  ;;  %v667_v21 = vadd.f32 %v635_v63, %v2724_v10  ;;  %v701_v35 = vmax.f32 %v669_v62, 0.0 }
 0x22b   :  { %817 = vmatprep.subr.mxu1 %v3561_v22  ;;  %3745 = vst [vmem:[#allocation15_spill] sm:$0xff] %v2746_v24  ;;  %v735_v29 = vmin.f32 %v703_v20, 1.0  ;;  %v700_v18 = vmax.f32 %v668_v15, 0.0  ;;  %v734_v11 = vmin.f32 %v702_v33, 1.0 }
 0x22c   :  { %818 = vmatpush2.msra.mxu1 %v772_v44  ;;  %3742 = vst [vmem:[#allocation82_spill] sm:$0xff] %v2738_v19  ;;  %v3746_v44 = vld [vmem:[#allocation24_spill] sm:$0xff]  ;;  %v666_v17 = vadd.f32 %v634_v46, %v2735_v36  ;;  %v699_v30 = vmax.f32 %v667_v21, 0.0  ;;  %v733_v63 = vmin.f32 %v701_v35, 1.0  ;;  %v2772_v35 = vld [vmem:[#allocation2] sm:$0xff] }
 0x22d   :  { %819 = vmatprep.subr.mxu1 %v3561_v22  ;;  %v633_v48 = vmul.f32 %v3746_v44, %v2738_v19  ;;  %v767_v20 = vmul.f32 %v3719_v56, %v735_v29  ;;  %v732_v42 = vmin.f32 %v700_v18, 1.0  ;;  %v766_v46 = vmul.f32 %v3722_v39, %v734_v11  ;;  %3747 = vst [vmem:[#allocation84_spill] sm:$0xff] %v2772_v35  ;;  %v2778_v18 = vld [vmem:[#allocation2 + $0x10] sm:$0xff]  ;;  %v2781_v11 = vld [vmem:[#allocation2 + $0x28] sm:$0xff]  ;;  %v3817_v19 = vld [vmem:[#allocation27_spill] sm:$0xff] }
 0x22e   :  { %820 = vmatpush2.msra.mxu1 %v771_v31  ;;  %v698_v62 = vmax.f32 %v666_v17, 0.0  ;;  %v765_v15 = vmul.f32 %v3726_v52, %v733_v63  ;;  %v2775_v17 = vld [vmem:[#allocation2 + $0x18] sm:$0xff]  ;;  %3749 = vst [vmem:[#allocation86_spill] sm:$0xff] %v2778_v18  ;;  %3750 = vst [vmem:[#allocation87_spill] sm:$0xff] %v2781_v11  ;;  %v2793_v63 = vld [vmem:[#allocation2 + $0x48] sm:$0xff] }
 0x22f   :  { %821 = vmatprep.subr.mxu1 %v3561_v22  ;;  %v665_v31 = vadd.f32 %v633_v48, %v2746_v24  ;;  %v764_v29 = vmul.f32 %v3730_v28, %v732_v42  ;;  %3748 = vst [vmem:[#allocation24_spill] sm:$0xff] %v2775_v17  ;;  %3754 = vst [vmem:[#allocation91_spill] sm:$0xff] %v2793_v63  ;;  %v2802_v42 = vld [vmem:[#allocation2 + $0x50] sm:$0xff]  ;;  %v3812_v56 = vld [vmem:[#allocation12_spill] sm:$0xff] }
 0x230   :  { %822 = vmatpush2.msra.mxu1 %v770_v3  ;;  %v730_v21 = vmin.f32 %v698_v62, 1.0  ;;  %v2799_v62 = vld [vmem:[#allocation2 + $0x58] sm:$0xff]  ;;  %3757 = vst [vmem:[#allocation94_spill] sm:$0xff] %v2802_v42 }
 0x231   :  { %823 = vmatprep.subr.mxu1 %v3561_v22  ;;  %v697_v33 = vmax.f32 %v665_v31, 0.0  ;;  %v2787_v31 = vld [vmem:[#allocation2 + $0x38] sm:$0xff]  ;;  %3756 = vst [vmem:[#allocation93_spill] sm:$0xff] %v2799_v62 }
 0x232   :  { %824 = vmatpush2.msra.mxu1 %v769_v51  ;;  %v731_v51 = vmin.f32 %v699_v30, 1.0  ;;  %v762_v44 = vmul.f32 %v3736_v34, %v730_v21  ;;  %3752 = vst [vmem:[#allocation89_spill] sm:$0xff] %v2787_v31  ;;  %v2790_v30 = vld [vmem:[#allocation2 + $0x30] sm:$0xff]  ;;  %v2817_v21 = vld [vmem:[#allocation2 + $0x88] sm:$0xff]  ;;  %v3813_v24 = vld [vmem:[#allocation22_spill] sm:$0xff] }
 0x233   :  { %825 = vmatprep.subr.mxu1 %v3561_v22  ;;  %v729_v23 = vmin.f32 %v697_v33, 1.0  ;;  %3753 = vst [vmem:[#allocation90_spill] sm:$0xff] %v2790_v30  ;;  %v2808_v33 = vld [vmem:[#allocation2 + $0x60] sm:$0xff]  ;;  %3762 = vst [vmem:[#allocation99_spill] sm:$0xff] %v2817_v21 }
 0x234   :  { %826 = vmatpush2.msra.mxu1 %v768_v43  ;;  %v763_v3 = vmul.f32 %v2282_v41, %v731_v51  ;;  %v2784_v43 = vld [vmem:[#allocation2 + $0x20] sm:$0xff]  ;;  %3759 = vst [vmem:[#allocation96_spill] sm:$0xff] %v2808_v33  ;;  %v2811_v51 = vld [vmem:[#allocation2 + $0x78] sm:$0xff] }
 0x235   :  { %827 = vmatprep.subr.mxu1 %v3561_v22  ;;  %v761_v48 = vmul.f32 %v3741_v7, %v729_v23  ;;  %3751 = vst [vmem:[#allocation88_spill] sm:$0xff] %v2784_v43  ;;  %3760 = vst [vmem:[#allocation97_spill] sm:$0xff] %v2811_v51  ;;  %v2823_v23 = vld [vmem:[#allocation2 + $0x98] sm:$0xff] }
 0x236   :  { %828 = vmatpush2.msra.mxu1 %v767_v20  ;;  %v2796_v20 = vld [vmem:[#allocation2 + $0x40] sm:$0xff]  ;;  %3764 = vst [vmem:[#allocation101_spill] sm:$0xff] %v2823_v23 }
 0x237   :  { %829 = vmatprep.subr.mxu1 %v3561_v22  ;;  %3755 = vst [vmem:[#allocation92_spill] sm:$0xff] %v2796_v20 }
 0x238   :  { %830 = vmatpush2.msra.mxu1 %v766_v46  ;;  %v2805_v46 = vld [vmem:[#allocation2 + $0x68] sm:$0xff] }
 0x239   :  { %831 = vmatprep.subr.mxu1 %v3561_v22  ;;  %3758 = vst [vmem:[#allocation95_spill] sm:$0xff] %v2805_v46 }
 0x23a   :  { %832 = vmatpush2.msra.mxu1 %v765_v15  ;;  %v2814_v15 = vld [vmem:[#allocation2 + $0x70] sm:$0xff] }
 0x23b   :  { %833 = vmatprep.subr.mxu1 %v3561_v22  ;;  %3761 = vst [vmem:[#allocation98_spill] sm:$0xff] %v2814_v15 }
 0x23c   :  { %834 = vmatpush2.msra.mxu1 %v764_v29  ;;  %v2820_v29 = vld [vmem:[#allocation2 + $0x80] sm:$0xff] }
 0x23d   :  { %835 = vmatprep.subr.mxu1 %v3561_v22  ;;  %3763 = vst [vmem:[#allocation100_spill] sm:$0xff] %v2820_v29 }
 0x23e   :  { %836 = vmatpush2.msra.mxu1 %v763_v3  ;;  %v2826_v3 = vld [vmem:[#allocation2 + $0x90] sm:$0xff] }
 0x23f   :  { %837 = vmatprep.subr.mxu1 %v3561_v22  ;;  %3765 = vst [vmem:[#allocation102_spill] sm:$0xff] %v2826_v3 }
 0x240   :  { %838 = vmatpush2.msra.mxu1 %v762_v44  ;;  %v2829_v44 = vld [vmem:[#allocation2 + $0xa8] sm:$0xff] }
 0x241   :  { %839 = vmatprep.subr.mxu1 %v3561_v22  ;;  %3766 = vst [vmem:[#allocation103_spill] sm:$0xff] %v2829_v44 }
 0x242   :  { %840 = vmatpush2.msra.mxu1 %v761_v48  ;;  %v2832_v48 = vld [vmem:[#allocation2 + $0xa0] sm:$0xff] }
 0x243   :  { %842 = vmatmul.mubr.f32.vlgmr.msra.gmra.mxu1 %v2772_v35  ;;  %3767 = vst [vmem:[#allocation104_spill] sm:$0xff] %v2832_v48 }
 0x244   :  { %846 = vmatprep.mubr.f32.mxu1 %v2775_v17 }
 0x247   :  { %847 = vmatmul.mubr.f32.gmra.mxu1 %v2778_v18 }
 0x248   :  { %851 = vmatprep.mubr.f32.mxu1 %v2781_v11 }
 0x24b   :  { %852 = vmatmul.mubr.f32.gmra.mxu1 %v2784_v43 }
 0x24c   :  { %856 = vmatprep.mubr.f32.mxu1 %v2787_v31 }
 0x24f   :  { %857 = vmatmul.mubr.f32.gmra.mxu1 %v2790_v30 }
 0x250   :  { %861 = vmatprep.mubr.f32.mxu1 %v2793_v63 }
 0x253   :  { %862 = vmatmul.mubr.f32.gmra.mxu1 %v2796_v20 }
 0x254   :  { %866 = vmatprep.mubr.f32.mxu1 %v2799_v62 }
 0x257   :  { %867 = vmatmul.mubr.f32.gmra.mxu1 %v2802_v42 }
 0x258   :  { %871 = vmatprep.mubr.f32.mxu1 %v2805_v46 }
 0x25b   :  { %872 = vmatmul.mubr.f32.gmra.mxu1 %v2808_v33 }
 0x25c   :  { %876 = vmatprep.mubr.f32.mxu1 %v2811_v51 }
 0x25f   :  { %877 = vmatmul.mubr.f32.gmra.mxu1 %v2814_v15  ;;  %v2863_v15 = vld [vmem:[#allocation2 + $0x108] sm:$0xff] }
 0x260   :  { %881 = vmatprep.mubr.f32.mxu1 %v2817_v21  ;;  %v2835_v21 = vld [vmem:[#allocation2 + $0xb8] sm:$0xff] }
 0x261   :  { %3768 = vst [vmem:[#allocation105_spill] sm:$0xff] %v2835_v21 }
 0x263   :  { %882 = vmatmul.mubr.f32.gmra.mxu1 %v2820_v29  ;;  %v2838_v29 = vld [vmem:[#allocation2 + $0xb0] sm:$0xff] }
 0x264   :  { %886 = vmatprep.mubr.f32.mxu1 %v2823_v23  ;;  %3769 = vst [vmem:[#allocation106_spill] sm:$0xff] %v2838_v29  ;;  %v2841_v23 = vld [vmem:[#allocation2 + $0xc8] sm:$0xff] }
 0x265   :  { %3770 = vst [vmem:[#allocation107_spill] sm:$0xff] %v2841_v23 }
 0x267   :  { %887 = vmatmul.mubr.f32.gmra.mxu1 %v2826_v3  ;;  %v2844_v3 = vld [vmem:[#allocation2 + $0xc0] sm:$0xff] }
 0x268   :  { %891 = vmatprep.mubr.f32.mxu1 %v2829_v44  ;;  %3771 = vst [vmem:[#allocation108_spill] sm:$0xff] %v2844_v3  ;;  %v2847_v44 = vld [vmem:[#allocation2 + $0xd8] sm:$0xff] }
 0x269   :  { %3772 = vst [vmem:[#allocation109_spill] sm:$0xff] %v2847_v44 }
 0x26b   :  { %892 = vmatmul.mubr.f32.gmra.mxu1 %v2832_v48  ;;  %v2850_v48 = vld [vmem:[#allocation2 + $0xd0] sm:$0xff] }
 0x26c   :  { %896 = vmatprep.mubr.f32.mxu1 %v2835_v21  ;;  %3773 = vst [vmem:[#allocation110_spill] sm:$0xff] %v2850_v48  ;;  %v2853_v21 = vld [vmem:[#allocation2 + $0xe8] sm:$0xff] }
 0x26d   :  { %3774 = vst [vmem:[#allocation111_spill] sm:$0xff] %v2853_v21 }
 0x26f   :  { %897 = vmatmul.mubr.f32.gmra.mxu1 %v2838_v29  ;;  %v2856_v29 = vld [vmem:[#allocation2 + $0xe0] sm:$0xff] }
 0x270   :  { %901 = vmatprep.mubr.f32.mxu1 %v2841_v23  ;;  %3775 = vst [vmem:[#allocation112_spill] sm:$0xff] %v2856_v29  ;;  %v2859_v23 = vld [vmem:[#allocation2 + $0xf8] sm:$0xff] }
 0x271   :  { %3776 = vst [vmem:[#allocation113_spill] sm:$0xff] %v2859_v23 }
 0x273   :  { %902 = vmatmul.mubr.f32.gmra.mxu1 %v2844_v3  ;;  %v3777_v3 = vld [vmem:[#allocation16_spill] sm:$0xff] }
 0x274   :  { %906 = vmatprep.mubr.f32.mxu1 %v2847_v44  ;;  %3778 = vst [vmem:[#allocation16_spill] sm:$0xff] %v2863_v15  ;;  %v2866_v44 = vld [vmem:[#allocation2 + $0x100] sm:$0xff] }
 0x275   :  { %3779 = vst [vmem:[#allocation114_spill] sm:$0xff] %v2866_v44 }
 0x277   :  { %907 = vmatmul.mubr.f32.gmra.mxu1 %v2850_v48  ;;  %v2869_v48 = vld [vmem:[#allocation2 + $0x118] sm:$0xff] }
 0x278   :  { %911 = vmatprep.mubr.f32.mxu1 %v2853_v21  ;;  %3780 = vst [vmem:[#allocation115_spill] sm:$0xff] %v2869_v48  ;;  %v2872_v21 = vld [vmem:[#allocation2 + $0x110] sm:$0xff] }
 0x279   :  { %3781 = vst [vmem:[#allocation116_spill] sm:$0xff] %v2872_v21 }
 0x27b   :  { %912 = vmatmul.mubr.f32.gmra.mxu1 %v2856_v29  ;;  %v2875_v29 = vld [vmem:[#allocation2 + $0x128] sm:$0xff] }
 0x27c   :  { %916 = vmatprep.mubr.f32.mxu1 %v2859_v23  ;;  %3782 = vst [vmem:[#allocation117_spill] sm:$0xff] %v2875_v29 }
 0x27f   :  { %917 = vmatmul.mubr.f32.gmra.mxu1 %v3777_v3  ;;  %v2878_v3 = vld [vmem:[#allocation2 + $0x120] sm:$0xff] }
 0x280   :  { %921 = vmatprep.mubr.f32.mxu1 %v2863_v15  ;;  %3783 = vst [vmem:[#allocation118_spill] sm:$0xff] %v2878_v3  ;;  %v2881_v15 = vld [vmem:[#allocation2 + $0x138] sm:$0xff] }
 0x281   :  { %3784 = vst [vmem:[#allocation119_spill] sm:$0xff] %v2881_v15 }
 0x283   :  { %922 = vmatmul.mubr.f32.gmra.mxu1 %v2866_v44  ;;  %v2884_v44 = vld [vmem:[#allocation2 + $0x130] sm:$0xff] }
 0x284   :  { %926 = vmatprep.mubr.f32.mxu1 %v2869_v48  ;;  %3785 = vst [vmem:[#allocation120_spill] sm:$0xff] %v2884_v44  ;;  %v2887_v48 = vld [vmem:[#allocation2 + $0x148] sm:$0xff] }
 0x285   :  { %3786 = vst [vmem:[#allocation121_spill] sm:$0xff] %v2887_v48 }
 0x287   :  { %927 = vmatmul.mubr.f32.gmra.mxu1 %v2872_v21  ;;  %v2890_v21 = vld [vmem:[#allocation2 + $0x140] sm:$0xff] }
 0x288   :  { %931 = vmatprep.mubr.f32.mxu1 %v2875_v29  ;;  %3787 = vst [vmem:[#allocation122_spill] sm:$0xff] %v2890_v21  ;;  %v2893_v29 = vld [vmem:[#allocation2 + $0x158] sm:$0xff] }
 0x289   :  { %3788 = vst [vmem:[#allocation123_spill] sm:$0xff] %v2893_v29 }
 0x28b   :  { %932 = vmatmul.mubr.f32.gmra.mxu1 %v2878_v3  ;;  %v2896_v3 = vld [vmem:[#allocation2 + $0x150] sm:$0xff] }
 0x28c   :  { %936 = vmatprep.mubr.f32.mxu1 %v2881_v15  ;;  %3789 = vst [vmem:[#allocation124_spill] sm:$0xff] %v2896_v3  ;;  %v2899_v15 = vld [vmem:[#allocation2 + $0x168] sm:$0xff] }
 0x28d   :  { %3790 = vst [vmem:[#allocation125_spill] sm:$0xff] %v2899_v15 }
 0x28f   :  { %937 = vmatmul.mubr.f32.gmra.mxu1 %v2884_v44  ;;  %v2902_v44 = vld [vmem:[#allocation2 + $0x160] sm:$0xff] }
 0x290   :  { %941 = vmatprep.mubr.f32.mxu1 %v2887_v48  ;;  %3791 = vst [vmem:[#allocation126_spill] sm:$0xff] %v2902_v44  ;;  %v2905_v48 = vld [vmem:[#allocation2 + $0x178] sm:$0xff] }
 0x291   :  { %3792 = vst [vmem:[#allocation127_spill] sm:$0xff] %v2905_v48 }
 0x293   :  { %942 = vmatmul.mubr.f32.gmra.mxu1 %v2890_v21  ;;  %v2908_v21 = vld [vmem:[#allocation2 + $0x170] sm:$0xff] }
 0x294   :  { %946 = vmatprep.mubr.f32.mxu1 %v2893_v29  ;;  %3793 = vst [vmem:[#allocation128_spill] sm:$0xff] %v2908_v21  ;;  %v2911_v29 = vld [vmem:[#allocation2 + $0x188] sm:$0xff] }
 0x295   :  { %3794 = vst [vmem:[#allocation129_spill] sm:$0xff] %v2911_v29 }
 0x297   :  { %947 = vmatmul.mubr.f32.gmra.mxu1 %v2896_v3  ;;  %v2914_v3 = vld [vmem:[#allocation2 + $0x180] sm:$0xff] }
 0x298   :  { %951 = vmatprep.mubr.f32.mxu1 %v2899_v15  ;;  %3795 = vst [vmem:[#allocation130_spill] sm:$0xff] %v2914_v3  ;;  %v2917_v15 = vld [vmem:[#allocation2 + $0x198] sm:$0xff] }
 0x299   :  { %3796 = vst [vmem:[#allocation131_spill] sm:$0xff] %v2917_v15 }
 0x29b   :  { %952 = vmatmul.mubr.f32.gmra.mxu1 %v2902_v44  ;;  %v2920_v44 = vld [vmem:[#allocation2 + $0x190] sm:$0xff] }
 0x29c   :  { %956 = vmatprep.mubr.f32.mxu1 %v2905_v48  ;;  %3797 = vst [vmem:[#allocation132_spill] sm:$0xff] %v2920_v44  ;;  %v2923_v48 = vld [vmem:[#allocation2 + $0x1a8] sm:$0xff] }
 0x29d   :  { %3798 = vst [vmem:[#allocation133_spill] sm:$0xff] %v2923_v48 }
 0x29f   :  { %957 = vmatmul.mubr.f32.gmra.mxu1 %v2908_v21  ;;  %v2926_v21 = vld [vmem:[#allocation2 + $0x1a0] sm:$0xff] }
 0x2a0   :  { %961 = vmatprep.mubr.f32.mxu1 %v2911_v29  ;;  %3799 = vst [vmem:[#allocation134_spill] sm:$0xff] %v2926_v21  ;;  %v2929_v29 = vld [vmem:[#allocation2 + $0x1b8] sm:$0xff] }
 0x2a1   :  { %3800 = vst [vmem:[#allocation135_spill] sm:$0xff] %v2929_v29 }
 0x2a3   :  { %962 = vmatmul.mubr.f32.gmra.mxu1 %v2914_v3  ;;  %v2932_v3 = vld [vmem:[#allocation2 + $0x1b0] sm:$0xff] }
 0x2a4   :  { %966 = vmatprep.mubr.f32.mxu1 %v2917_v15  ;;  %3801 = vst [vmem:[#allocation136_spill] sm:$0xff] %v2932_v3  ;;  %v2935_v15 = vld [vmem:[#allocation2 + $0x1c8] sm:$0xff] }
 0x2a5   :  { %3802 = vst [vmem:[#allocation137_spill] sm:$0xff] %v2935_v15 }
 0x2a7   :  { %967 = vmatmul.mubr.f32.gmra.mxu1 %v2920_v44  ;;  %v2938_v44 = vld [vmem:[#allocation2 + $0x1c0] sm:$0xff] }
 0x2a8   :  { %971 = vmatprep.mubr.f32.mxu1 %v2923_v48  ;;  %3803 = vst [vmem:[#allocation138_spill] sm:$0xff] %v2938_v44  ;;  %v2941_v48 = vld [vmem:[#allocation2 + $0x1d8] sm:$0xff] }
 0x2a9   :  { %3804 = vst [vmem:[#allocation139_spill] sm:$0xff] %v2941_v48 }
 0x2ab   :  { %972 = vmatmul.mubr.f32.gmra.mxu1 %v2926_v21  ;;  %v2944_v21 = vld [vmem:[#allocation2 + $0x1d0] sm:$0xff] }
 0x2ac   :  { %976 = vmatprep.mubr.f32.mxu1 %v2929_v29  ;;  %3805 = vst [vmem:[#allocation140_spill] sm:$0xff] %v2944_v21  ;;  %v2947_v29 = vld [vmem:[#allocation2 + $0x1e8] sm:$0xff] }
 0x2ad   :  { %3806 = vst [vmem:[#allocation141_spill] sm:$0xff] %v2947_v29 }
 0x2af   :  { %977 = vmatmul.mubr.f32.gmra.mxu1 %v2932_v3  ;;  %v2950_v3 = vld [vmem:[#allocation2 + $0x1e0] sm:$0xff] }
 0x2b0   :  { %981 = vmatprep.mubr.f32.mxu1 %v2935_v15  ;;  %3807 = vst [vmem:[#allocation142_spill] sm:$0xff] %v2950_v3  ;;  %v2953_v15 = vld [vmem:[#allocation2 + $0x1f8] sm:$0xff] }
 0x2b1   :  { %3808 = vst [vmem:[#allocation143_spill] sm:$0xff] %v2953_v15 }
 0x2b3   :  { %982 = vmatmul.mubr.f32.gmra.mxu1 %v2938_v44  ;;  %v2956_v44 = vld [vmem:[#allocation2 + $0x1f0] sm:$0xff] }
 0x2b4   :  { %986 = vmatprep.mubr.f32.mxu1 %v2941_v48  ;;  %3809 = vst [vmem:[#allocation144_spill] sm:$0xff] %v2956_v44 }
 0x2b7   :  { %987 = vmatmul.mubr.f32.gmra.mxu1 %v2944_v21 }
 0x2b8   :  { %991 = vmatprep.mubr.f32.mxu1 %v2947_v29 }
 0x2bb   :  { %992 = vmatmul.mubr.f32.gmra.mxu1 %v2950_v3 }
 0x2bc   :  { %996 = vmatprep.mubr.f32.mxu1 %v2953_v15 }
 0x2bf   :  { %997 = vmatmul.mubr.f32.gmra.mxu1 %v2956_v44 }
 0x303   :  { %v2959_v48 = vpop.f32.mrf.mxu1 }
 0x305   :  { %v845_v23 = vpop.f32.mrf.mxu1 }
 0x307   :  { %v2961_v21 = vpop.f32.mrf.mxu1 }
 0x309   :  { %v850_v51 = vpop.f32.mrf.mxu1 }
 0x30b   :  { %v2963_v33 = vpop.f32.mrf.mxu1 }
 0x30d   :  { %v855_v29 = vpop.f32.mrf.mxu1 }
 0x30f   :  { %v2965_v46 = vpop.f32.mrf.mxu1 }
 0x311   :  { %v860_v3 = vpop.f32.mrf.mxu1 }
 0x313   :  { %v2967_v42 = vpop.f32.mrf.mxu1 }
 0x315   :  { %v865_v62 = vpop.f32.mrf.mxu1 }
 0x316   :  { %v3810_v62 = vld [vmem:[#allocation14_spill] sm:$0xff] }
 0x317   :  { %v868_v15 = vpop.f32.mrf.mxu1 }
 0x319   :  { %v870_v20 = vpop.f32.mrf.mxu1 }
 0x31a   :  { %v3811_v20 = vld [vmem:[#allocation13_spill] sm:$0xff] }
 0x31b   :  { %v873_v63 = vpop.f32.mrf.mxu1 }
 0x31d   :  { %v875_v30 = vpop.f32.mrf.mxu1 }
 0x31f   :  { %v878_v44 = vpop.f32.mrf.mxu1 }
 0x321   :  { %v880_v31 = vpop.f32.mrf.mxu1 }
 0x323   :  { %v883_v43 = vpop.f32.mrf.mxu1 }
 0x325   :  { %v885_v23 = vpop.f32.mrf.mxu1 }
 0x327   :  { %v888_v11 = vpop.f32.mrf.mxu1 }
 0x329   :  { %v890_v18 = vpop.f32.mrf.mxu1 }
 0x32a   :  { %v3814_v18 = vld [vmem:[#allocation19_spill] sm:$0xff] }
 0x32b   :  { %v893_v51 = vpop.f32.mrf.mxu1 }
 0x32d   :  { %v895_v17 = vpop.f32.mrf.mxu1 }
 0x32e   :  { %v3815_v17 = vld [vmem:[#allocation21_spill] sm:$0xff] }
 0x32f   :  { %v898_v35 = vpop.f32.mrf.mxu1 }
 0x330   :  { %v1013_v36 = vmul.f32 %v898_v35, %v3814_v18  ;;  %v3822_v18 = vld [vmem:[#allocation26_spill] sm:$0xff] }
 0x331   :  { %v900_v29 = vpop.f32.mrf.mxu1 }
 0x332   :  { %v3816_v29 = vld [vmem:[#allocation18_spill] sm:$0xff] }
 0x333   :  { %v903_v7 = vpop.f32.mrf.mxu1 }
 0x334   :  { %v1014_v31 = vmul.f32 %v903_v7, %v3812_v56  ;;  %v3820_v7 = vld [vmem:[#allocation25_spill] sm:$0xff] }
 0x335   :  { %v905_v34 = vpop.f32.mrf.mxu1 }
 0x336   :  { %v1046_v1 = vadd.f32 %v1014_v31, %v3818_v57  ;;  %v1009_v31 = vmul.f32 %v878_v44, %v2489_v45 }
 0x337   :  { %v908_v3 = vpop.f32.mrf.mxu1 }
 0x338   :  { %v1015_v52 = vmul.f32 %v908_v3, %v3810_v62  ;;  %v3819_v62 = vld [vmem:[#allocation20_spill] sm:$0xff] }
 0x339   :  { %v910_v41 = vpop.f32.mrf.mxu1 }
 0x33a   :  { %v1047_v58 = vadd.f32 %v1015_v52, %v3815_v17  ;;  %v1012_v41 = vmul.f32 %v893_v51, %v3817_v19  ;;  %v1010_v52 = vmul.f32 %v883_v43, %v3822_v18 }
 0x33b   :  { %v913_v28 = vpop.f32.mrf.mxu1 }
 0x33c   :  { %v1016_v39 = vmul.f32 %v913_v28, %v3811_v20  ;;  %v1011_v20 = vmul.f32 %v888_v11, %v3820_v7  ;;  %v1079_v56 = vmax.f32 %v1047_v58, 0.0  ;;  %v3824_v58 = vld [vmem:[#allocation33_spill] sm:$0xff]  ;;  %v1042_v43 = vadd.f32 %v1010_v52, %v2486_v49 }
 0x33d   :  { %v915_v30 = vpop.f32.mrf.mxu1 }
 0x33e   :  { %v1048_v23 = vadd.f32 %v1016_v39, %v3813_v24  ;;  %v3821_v39 = vld [vmem:[#allocation17_spill] sm:$0xff]  ;;  %v1111_v11 = vmin.f32 %v1079_v56, 1.0  ;;  %v1041_v56 = vadd.f32 %v1009_v31, %v2495_v2 }
 0x33f   :  { %v918_v61 = vpop.f32.mrf.mxu1  ;;  %v1045_v24 = vadd.f32 %v1013_v36, %v3821_v39 }
 0x340   :  { %v1017_v10 = vmul.f32 %v918_v61, %v3816_v29  ;;  %v1080_v3 = vmax.f32 %v1048_v23, 0.0  ;;  %v3823_v61 = vld [vmem:[#allocation30_spill] sm:$0xff]  ;;  %v1078_v29 = vmax.f32 %v1046_v1, 0.0  ;;  %v3825_v1 = vld [vmem:[#allocation29_spill] sm:$0xff] }
 0x341   :  { %v920_v34 = vpop.f32.mrf.mxu1 }
 0x342   :  { %v1049_v28 = vadd.f32 %v1017_v10, %v3819_v62  ;;  %v1044_v34 = vadd.f32 %v1012_v41, %v3823_v61  ;;  %v1112_v51 = vmin.f32 %v1080_v3, 1.0  ;;  %v1043_v10 = vadd.f32 %v1011_v20, %v2478_v37  ;;  %v3834_v61 = vld [vmem:[#allocation41_spill] sm:$0xff] }
 0x343   :  { %v2979_v30 = vpop.f32.mrf.mxu1  ;;  %v1077_v62 = vmax.f32 %v1045_v24, 0.0  ;;  %v1110_v41 = vmin.f32 %v1078_v29, 1.0 }
 0x344   :  { %v1081_v35 = vmax.f32 %v1049_v28, 0.0  ;;  %v1008_v28 = vmul.f32 %v873_v63, %v3824_v58  ;;  %v1144_v3 = vmul.f32 %v3825_v1, %v1112_v51  ;;  %v1075_v24 = vmax.f32 %v1043_v10, 0.0  ;;  %v3829_v51 = vld [vmem:[#allocation32_spill] sm:$0xff] }
 0x345   :  { %v925_v17 = vpop.f32.mrf.mxu1  ;;  %v3830_v1 = vld [vmem:[#allocation40_spill] sm:$0xff] }
 0x346   :  { %v1113_v19 = vmin.f32 %v1081_v35, 1.0  ;;  %v1076_v17 = vmax.f32 %v1044_v34, 0.0  ;;  %v3826_v35 = vld [vmem:[#allocation35_spill] sm:$0xff]  ;;  %v1040_v52 = vadd.f32 %v1008_v28, %v2505_v0  ;;  %v1005_v31 = vmul.f32 %v2965_v46, %v3830_v1  ;;  %v3832_v28 = vld [vmem:[#allocation42_spill] sm:$0xff] }
 0x347   :  { %v2986_v23 = vpop.f32.mrf.mxu1  ;;  %v1007_v44 = vmul.f32 %v868_v15, %v3826_v35  ;;  %v1074_v15 = vmax.f32 %v1042_v43, 0.0  ;;  %v1004_v43 = vmul.f32 %v2963_v33, %v3832_v28 }
 0x348   :  { %v1145_v36 = vmul.f32 %v3651_v50, %v1113_v19  ;;  %v1109_v50 = vmin.f32 %v1077_v62, 1.0  ;;  %v3827_v19 = vld [vmem:[#allocation28_spill] sm:$0xff]  ;;  %v1108_v34 = vmin.f32 %v1076_v17, 1.0  ;;  %v1072_v46 = vmax.f32 %v1040_v52, 0.0 }
 0x349   :  { %v930_v57 = vpop.f32.mrf.mxu1  ;;  %v1143_v63 = vmul.f32 %v3827_v19, %v1111_v11  ;;  %v1039_v10 = vadd.f32 %v1007_v44, %v2515_v55  ;;  %v1107_v11 = vmin.f32 %v1075_v24, 1.0  ;;  %v1003_v44 = vmul.f32 %v2961_v21, %v3834_v61  ;;  %v3835_v24 = vld [vmem:[#allocation39_spill] sm:$0xff] }
 0x34a   :  { %1163 = vmatpush1.msra.mxu0 %v1145_v36  ;;  %v3828_v57 = vld [vmem:[#allocation37_spill] sm:$0xff]  ;;  %v1142_v36 = vmul.f32 %v3829_v51, %v1110_v41 }
 0x34b   :  { %v2994_v39 = vpop.f32.mrf.mxu1  ;;  %1164 = vmatprep.subr.mxu0 %v3561_v22  ;;  %v1006_v20 = vmul.f32 %v2967_v42, %v3828_v57  ;;  %v1073_v42 = vmax.f32 %v1041_v56, 0.0  ;;  %v1071_v33 = vmax.f32 %v1039_v10, 0.0 }
 0x34c   :  { %1165 = vmatpush1.msra.mxu0 %v1144_v3  ;;  %v3831_v3 = vld [vmem:[#allocation34_spill] sm:$0xff] }
 0x34d   :  { %v935_v29 = vpop.f32.mrf.mxu1  ;;  %1166 = vmatprep.subr.mxu0 %v3561_v22  ;;  %v1141_v19 = vmul.f32 %v3831_v3, %v1109_v50  ;;  %v1038_v41 = vadd.f32 %v1006_v20, %v2526_v12  ;;  %v1037_v50 = vadd.f32 %v1005_v31, %v3835_v24  ;;  %v3836_v3 = vld [vmem:[#allocation38_spill] sm:$0xff]  ;;  %v3837_v20 = vld [vmem:[#allocation43_spill] sm:$0xff]  ;;  %v3838_v31 = vld [vmem:[#allocation44_spill] sm:$0xff] }
 0x34e   :  { %1167 = vmatpush1.msra.mxu0 %v1143_v63  ;;  %v1106_v63 = vmin.f32 %v1074_v15, 1.0  ;;  %v3833_v29 = vld [vmem:[#allocation36_spill] sm:$0xff]  ;;  %v1002_v52 = vmul.f32 %v2959_v48, %v3837_v20  ;;  %v1035_v10 = vadd.f32 %v1003_v44, %v3838_v31 }
 0x34f   :  { %v3006_v62 = vpop.f32.mrf.mxu1  ;;  %1168 = vmatprep.subr.mxu0 %v3561_v22  ;;  %v1140_v51 = vmul.f32 %v3833_v29, %v1108_v34  ;;  %v1036_v34 = vadd.f32 %v1004_v43, %v2548_v8  ;;  %v1070_v21 = vmax.f32 %v1038_v41, 0.0  ;;  %v3839_v43 = vld [vmem:[#allocation46_spill] sm:$0xff] }
 0x350   :  { %1169 = vmatpush1.msra.mxu0 %v1142_v36  ;;  %v1105_v36 = vmin.f32 %v1073_v42, 1.0  ;;  %v1138_v29 = vmul.f32 %v3663_v4, %v1106_v63  ;;  %v1069_v42 = vmax.f32 %v1037_v50, 0.0  ;;  %v1034_v41 = vadd.f32 %v1002_v52, %v3839_v43 }
 0x351   :  { %v940_v17 = vpop.f32.mrf.mxu1  ;;  %1170 = vmatprep.subr.mxu0 %v3561_v22  ;;  %v1067_v44 = vmax.f32 %v1035_v10, 0.0 }
 0x352   :  { %1171 = vmatpush1.msra.mxu0 %v1141_v19  ;;  %v1139_v17 = vmul.f32 %v3836_v3, %v1107_v11  ;;  %v1104_v19 = vmin.f32 %v1072_v46, 1.0  ;;  %v1103_v11 = vmin.f32 %v1071_v33, 1.0  ;;  %v1137_v48 = vmul.f32 %v3666_v14, %v1105_v36 }
 0x353   :  { %v3018_v56 = vpop.f32.mrf.mxu1  ;;  %1172 = vmatprep.subr.mxu0 %v3561_v22  ;;  %v1068_v46 = vmax.f32 %v1036_v34, 0.0  ;;  %v1102_v3 = vmin.f32 %v1070_v21, 1.0  ;;  %v1101_v50 = vmin.f32 %v1069_v42, 1.0  ;;  %v1066_v36 = vmax.f32 %v1034_v41, 0.0 }
 0x354   :  { %1173 = vmatpush1.msra.mxu0 %v1140_v51  ;;  %v1136_v4 = vmul.f32 %v3668_v9, %v1104_v19  ;;  %v1135_v33 = vmul.f32 %v3671_v5, %v1103_v11  ;;  %v1099_v9 = vmin.f32 %v1067_v44, 1.0 }
 0x355   :  { %v945_v15 = vpop.f32.mrf.mxu1  ;;  %1174 = vmatprep.subr.mxu0 %v3561_v22  ;;  %v1134_v52 = vmul.f32 %v3674_v26, %v1102_v3  ;;  %v1133_v34 = vmul.f32 %v3677_v47, %v1101_v50  ;;  %v1098_v5 = vmin.f32 %v1066_v36, 1.0  ;;  %v3840_v50 = vld [vmem:[#allocation49_spill] sm:$0xff] }
 0x356   :  { %1175 = vmatpush1.msra.mxu0 %v1139_v17  ;;  %v1100_v17 = vmin.f32 %v1068_v46, 1.0  ;;  %v1131_v26 = vmul.f32 %v3684_v27, %v1099_v9 }
 0x357   :  { %v3028_v37 = vpop.f32.mrf.mxu1  ;;  %1176 = vmatprep.subr.mxu0 %v3561_v22  ;;  %v1130_v42 = vmul.f32 %v3688_v38, %v1098_v5  ;;  %v3841_v38 = vld [vmem:[#allocation47_spill] sm:$0xff] }
 0x358   :  { %1177 = vmatpush1.msra.mxu0 %v1138_v29  ;;  %v1132_v19 = vmul.f32 %v3681_v60, %v1100_v17 }
 0x359   :  { %v950_v51 = vpop.f32.mrf.mxu1  ;;  %1178 = vmatprep.subr.mxu0 %v3561_v22 }
 0x35a   :  { %1179 = vmatpush1.msra.mxu0 %v1137_v48 }
 0x35b   :  { %v3036_v63 = vpop.f32.mrf.mxu1  ;;  %1180 = vmatprep.subr.mxu0 %v3561_v22 }
 0x35c   :  { %1181 = vmatpush1.msra.mxu0 %v1136_v4 }
 0x35d   :  { %v955_v14 = vpop.f32.mrf.mxu1  ;;  %1182 = vmatprep.subr.mxu0 %v3561_v22 }
 0x35e   :  { %1183 = vmatpush1.msra.mxu0 %v1135_v33 }
 0x35f   :  { %v958_v15 = vpop.f32.mrf.mxu1  ;;  %1184 = vmatprep.subr.mxu0 %v3561_v22 }
 0x360   :  { %1185 = vmatpush1.msra.mxu0 %v1134_v52  ;;  %v3842_v52 = vld [vmem:[#allocation50_spill] sm:$0xff] }
 0x361   :  { %v960_v21 = vpop.f32.mrf.mxu1  ;;  %1186 = vmatprep.subr.mxu0 %v3561_v22 }
 0x362   :  { %1187 = vmatpush1.msra.mxu0 %v1133_v34  ;;  %v3843_v21 = vld [vmem:[#allocation53_spill] sm:$0xff] }
 0x363   :  { %v963_v29 = vpop.f32.mrf.mxu1  ;;  %1188 = vmatprep.subr.mxu0 %v3561_v22 }
 0x364   :  { %1189 = vmatpush1.msra.mxu0 %v1132_v19 }
 0x365   :  { %v965_v10 = vpop.f32.mrf.mxu1  ;;  %1190 = vmatprep.subr.mxu0 %v3561_v22 }
 0x366   :  { %1191 = vmatpush1.msra.mxu0 %v1131_v26  ;;  %v3844_v26 = vld [vmem:[#allocation45_spill] sm:$0xff] }
 0x367   :  { %v968_v47 = vpop.f32.mrf.mxu1  ;;  %1192 = vmatprep.subr.mxu0 %v3561_v22 }
 0x368   :  { %1193 = vmatpush1.msra.mxu0 %v1130_v42 }
 0x369   :  { %v970_v11 = vpop.f32.mrf.mxu1  ;;  %1194 = vmatprep.subr.mxu0 %v3561_v22 }
 0x36b   :  { %v973_v60 = vpop.f32.mrf.mxu1 }
 0x36c   :  { %v1028_v11 = vmul.f32 %v973_v60, %v2628_v53 }
 0x36d   :  { %v975_v48 = vpop.f32.mrf.mxu1 }
 0x36e   :  { %v3845_v48 = vld [vmem:[#allocation54_spill] sm:$0xff] }
 0x36f   :  { %v978_v51 = vpop.f32.mrf.mxu1 }
 0x370   :  { %v1029_v5 = vmul.f32 %v978_v51, %v3843_v21  ;;  %v1026_v51 = vmul.f32 %v963_v29, %v2651_v6 }
 0x371   :  { %v980_v41 = vpop.f32.mrf.mxu1 }
 0x373   :  { %v983_v46 = vpop.f32.mrf.mxu1 }
 0x374   :  { %v1030_v17 = vmul.f32 %v983_v46, %v2606_v13  ;;  %v3848_v46 = vld [vmem:[#allocation56_spill] sm:$0xff] }
 0x375   :  { %v985_v27 = vpop.f32.mrf.mxu1  ;;  %v3853_v13 = vld [vmem:[#allocation60_spill] sm:$0xff] }
 0x376   :  { %v1062_v41 = vadd.f32 %v1030_v17, %v3845_v48 }
 0x377   :  { %v988_v3 = vpop.f32.mrf.mxu1 }
 0x378   :  { %v1031_v33 = vmul.f32 %v988_v3, %v3840_v50  ;;  %v3846_v3 = vld [vmem:[#allocation48_spill] sm:$0xff]  ;;  %v3849_v50 = vld [vmem:[#allocation55_spill] sm:$0xff] }
 0x379   :  { %v990_v4 = vpop.f32.mrf.mxu1 }
 0x37a   :  { %v1063_v19 = vadd.f32 %v1031_v33, %v2603_v16  ;;  %v1060_v33 = vadd.f32 %v1028_v11, %v3849_v50  ;;  %v1094_v16 = vmax.f32 %v1062_v41, 0.0  ;;  %v3854_v41 = vld [vmem:[#allocation61_spill] sm:$0xff] }
 0x37b   :  { %v993_v44 = vpop.f32.mrf.mxu1 }
 0x37c   :  { %v1032_v14 = vmul.f32 %v993_v44, %v3841_v38  ;;  %v3847_v44 = vld [vmem:[#allocation57_spill] sm:$0xff]  ;;  %v1061_v38 = vadd.f32 %v1029_v5, %v3848_v46  ;;  %v1126_v29 = vmin.f32 %v1094_v16, 1.0 }
 0x37d   :  { %v995_v36 = vpop.f32.mrf.mxu1 }
 0x37e   :  { %v1064_v9 = vadd.f32 %v1032_v14, %v3842_v52  ;;  %v1027_v36 = vmul.f32 %v968_v47, %v3847_v44  ;;  %v1095_v14 = vmax.f32 %v1063_v19, 0.0  ;;  %v3852_v47 = vld [vmem:[#allocation62_spill] sm:$0xff]  ;;  %v1058_v19 = vadd.f32 %v1026_v51, %v2658_v32  ;;  %v3856_v51 = vld [vmem:[#allocation64_spill] sm:$0xff] }
 0x37f   :  { %v998_v34 = vpop.f32.mrf.mxu1  ;;  %v1024_v5 = vmul.f32 %v3036_v63, %v3852_v47  ;;  %v3855_v63 = vld [vmem:[#allocation65_spill] sm:$0xff] }
 0x380   :  { %v1033_v10 = vmul.f32 %v998_v34, %v3844_v26  ;;  %v1096_v27 = vmax.f32 %v1064_v9, 0.0  ;;  %v3850_v26 = vld [vmem:[#allocation59_spill] sm:$0xff]  ;;  %v1059_v17 = vadd.f32 %v1027_v36, %v2647_v54  ;;  %v1093_v9 = vmax.f32 %v1061_v38, 0.0 }
 0x381   :  { %v1000_v42 = vpop.f32.mrf.mxu1  ;;  %v1025_v60 = vmul.f32 %v958_v15, %v3850_v26  ;;  %v1127_v48 = vmin.f32 %v1095_v14, 1.0  ;;  %v1022_v14 = vmul.f32 %v3018_v56, %v3855_v63  ;;  %v1090_v16 = vmax.f32 %v1058_v19, 0.0 }
 0x382   :  { %v1065_v4 = vadd.f32 %v1033_v10, %v3846_v3  ;;  %v1128_v34 = vmin.f32 %v1096_v27, 1.0  ;;  %v3851_v10 = vld [vmem:[#allocation58_spill] sm:$0xff]  ;;  %v1091_v38 = vmax.f32 %v1059_v17, 0.0  ;;  %v1125_v27 = vmin.f32 %v1093_v9, 1.0  ;;  %v3860_v9 = vld [vmem:[#allocation75_spill] sm:$0xff] }
 0x383   :  { %v1057_v15 = vadd.f32 %v1025_v60, %v2669_v59  ;;  %v1159_v36 = vmul.f32 %v3700_v40, %v1127_v48  ;;  %v3859_v17 = vld [vmem:[#allocation66_spill] sm:$0xff] }
 0x384   :  { %v1097_v52 = vmax.f32 %v1065_v4, 0.0  ;;  %v1092_v4 = vmax.f32 %v1060_v33, 0.0  ;;  %v1160_v11 = vmul.f32 %v3853_v13, %v1128_v34  ;;  %v1056_v13 = vadd.f32 %v1024_v5, %v2680_v25  ;;  %v3857_v33 = vld [vmem:[#allocation71_spill] sm:$0xff] }
 0x385   :  { %v1021_v34 = vmul.f32 %v3006_v62, %v3857_v33  ;;  %v1089_v48 = vmax.f32 %v1057_v15, 0.0  ;;  %v1123_v60 = vmin.f32 %v1091_v38, 1.0  ;;  %v1157_v56 = vmul.f32 %v3859_v17, %v1125_v27  ;;  %v3861_v5 = vld [vmem:[#allocation67_spill] sm:$0xff]  ;;  %v3864_v15 = vld [vmem:[#allocation73_spill] sm:$0xff]  ;;  %v3866_v17 = vld [vmem:[#allocation82_spill] sm:$0xff] }
 0x386   :  { %v1129_v42 = vmin.f32 %v1097_v52, 1.0  ;;  %v1023_v52 = vmul.f32 %v3028_v37, %v3854_v41  ;;  %v1158_v37 = vmul.f32 %v3856_v51, %v1126_v29  ;;  %v1054_v19 = vadd.f32 %v1022_v14, %v3861_v5 }
 0x387   :  { %v1122_v29 = vmin.f32 %v1090_v16, 1.0  ;;  %v1053_v38 = vadd.f32 %v1021_v34, %v3864_v15  ;;  %v1121_v51 = vmin.f32 %v1089_v48, 1.0  ;;  %v1018_v14 = vmul.f32 %v2979_v30, %v3866_v17  ;;  %v3869_v34 = vld [vmem:[#allocation23_spill] sm:$0xff] }
 0x388   :  { %v1161_v3 = vmul.f32 %v3851_v10, %v1129_v42  ;;  %v3858_v42 = vld [vmem:[#allocation63_spill] sm:$0xff]  ;;  %v1020_v10 = vmul.f32 %v2994_v39, %v3860_v9 }
 0x389   :  { %v1055_v40 = vadd.f32 %v1023_v52, %v3858_v42  ;;  %v1085_v48 = vmax.f32 %v1053_v38, 0.0  ;;  %v3871_v30 = vld [vmem:[#allocation15_spill] sm:$0xff] }
 0x38a   :  { %1195 = vmatpush2.msra.mxu0 %v1161_v3  ;;  %v1124_v3 = vmin.f32 %v1092_v4, 1.0  ;;  %v1088_v4 = vmax.f32 %v1056_v13, 0.0  ;;  %v3867_v13 = vld [vmem:[#allocation77_spill] sm:$0xff] }
 0x38b   :  { %1196 = vmatprep.subr.mxu0 %v3561_v22  ;;  %v1087_v27 = vmax.f32 %v1055_v40, 0.0  ;;  %v1052_v16 = vadd.f32 %v1020_v10, %v3867_v13 }
 0x38c   :  { %1197 = vmatpush2.msra.mxu0 %v1160_v11  ;;  %v3862_v11 = vld [vmem:[#allocation68_spill] sm:$0xff] }
 0x38d   :  { %1198 = vmatprep.subr.mxu0 %v3561_v22  ;;  %v1156_v62 = vmul.f32 %v3862_v11, %v1124_v3  ;;  %v1086_v3 = vmax.f32 %v1054_v19, 0.0  ;;  %v3868_v11 = vld [vmem:[#allocation70_spill] sm:$0xff]  ;;  %v1119_v46 = vmin.f32 %v1087_v27, 1.0  ;;  %v1084_v21 = vmax.f32 %v1052_v16, 0.0  ;;  %v3875_v16 = vld [vmem:[#allocation80_spill] sm:$0xff] }
 0x38e   :  { %1199 = vmatpush2.msra.mxu0 %v1159_v36  ;;  %v3863_v36 = vld [vmem:[#allocation79_spill] sm:$0xff]  ;;  %v3872_v19 = vld [vmem:[#allocation74_spill] sm:$0xff] }
 0x38f   :  { %1200 = vmatprep.subr.mxu0 %v3561_v22  ;;  %v1019_v52 = vmul.f32 %v2986_v23, %v3863_v36  ;;  %v1154_v23 = vmul.f32 %v3868_v11, %v1122_v29  ;;  %v1118_v10 = vmin.f32 %v1086_v3, 1.0  ;;  %v3873_v11 = vld [vmem:[#allocation76_spill] sm:$0xff]  ;;  %v1116_v27 = vmin.f32 %v1084_v21, 1.0  ;;  %v3878_v21 = vld [vmem:[#allocation85_spill] sm:$0xff] }
 0x390   :  { %1201 = vmatpush2.msra.mxu0 %v1158_v37  ;;  %v3865_v37 = vld [vmem:[#allocation69_spill] sm:$0xff] }
 0x391   :  { %1202 = vmatprep.subr.mxu0 %v3561_v22  ;;  %v1155_v39 = vmul.f32 %v3865_v37, %v1123_v60  ;;  %v1051_v40 = vadd.f32 %v1019_v52, %v3869_v34  ;;  %v3870_v60 = vld [vmem:[#allocation72_spill] sm:$0xff]  ;;  %v1050_v37 = vadd.f32 %v1018_v14, %v3871_v30  ;;  %v1151_v52 = vmul.f32 %v3873_v11, %v1119_v46  ;;  %v3877_v46 = vld [vmem:[#allocation83_spill] sm:$0xff]  ;;  %v3885_v11 = vld [vmem:[#allocation90_spill] sm:$0xff] }
 0x392   :  { %1203 = vmatpush2.msra.mxu0 %v1157_v56  ;;  %v1120_v56 = vmin.f32 %v1088_v4, 1.0 }
 0x393   :  { %1204 = vmatprep.subr.mxu0 %v3561_v22  ;;  %v1083_v29 = vmax.f32 %v1051_v40, 0.0  ;;  %v1082_v38 = vmax.f32 %v1050_v37, 0.0  ;;  %v3876_v40 = vld [vmem:[#allocation81_spill] sm:$0xff]  ;;  %v3879_v37 = vld [vmem:[#allocation84_spill] sm:$0xff] }
 0x394   :  { %1205 = vmatpush2.msra.mxu0 %v1156_v62  ;;  %v1153_v62 = vmul.f32 %v3870_v60, %v1121_v51  ;;  %v1152_v4 = vmul.f32 %v3872_v19, %v1120_v56  ;;  %v3874_v51 = vld [vmem:[#allocation78_spill] sm:$0xff] }
 0x395   :  { %1206 = vmatprep.subr.mxu0 %v3561_v22  ;;  %v1115_v14 = vmin.f32 %v1083_v29, 1.0  ;;  %v1114_v56 = vmin.f32 %v1082_v38, 1.0  ;;  %v3881_v19 = vld [vmem:[#allocation86_spill] sm:$0xff]  ;;  %v3883_v29 = vld [vmem:[#allocation88_spill] sm:$0xff] }
 0x396   :  { %1207 = vmatpush2.msra.mxu0 %v1155_v39  ;;  %v1117_v39 = vmin.f32 %v1085_v48, 1.0  ;;  %v1148_v48 = vmul.f32 %v3876_v40, %v1116_v27  ;;  %v3887_v38 = vld [vmem:[#allocation92_spill] sm:$0xff]  ;;  %v3889_v27 = vld [vmem:[#allocation94_spill] sm:$0xff]  ;;  %v3896_v40 = vld [vmem:[#allocation101_spill] sm:$0xff] }
 0x397   :  { %1208 = vmatprep.subr.mxu0 %v3561_v22  ;;  %v1147_v60 = vmul.f32 %v3877_v46, %v1115_v14  ;;  %v3892_v14 = vld [vmem:[#allocation97_spill] sm:$0xff]  ;;  %v3898_v46 = vld [vmem:[#allocation103_spill] sm:$0xff] }
 0x398   :  { %1209 = vmatpush2.msra.mxu0 %v1154_v23  ;;  %v1150_v23 = vmul.f32 %v3874_v51, %v1118_v10  ;;  %v1149_v3 = vmul.f32 %v3875_v16, %v1117_v39  ;;  %v3880_v10 = vld [vmem:[#allocation24_spill] sm:$0xff]  ;;  %v3884_v39 = vld [vmem:[#allocation89_spill] sm:$0xff]  ;;  %v3890_v51 = vld [vmem:[#allocation95_spill] sm:$0xff] }
 0x399   :  { %1210 = vmatprep.subr.mxu0 %v3561_v22  ;;  %v3893_v16 = vld [vmem:[#allocation98_spill] sm:$0xff] }
 0x39a   :  { %1211 = vmatpush2.msra.mxu0 %v1153_v62  ;;  %v1146_v62 = vmul.f32 %v3878_v21, %v1114_v56  ;;  %v3895_v56 = vld [vmem:[#allocation100_spill] sm:$0xff]  ;;  %v3900_v21 = vld [vmem:[#allocation105_spill] sm:$0xff] }
 0x39b   :  { %1212 = vmatprep.subr.mxu0 %v3561_v22 }
 0x39c   :  { %1213 = vmatpush2.msra.mxu0 %v1152_v4  ;;  %v3882_v4 = vld [vmem:[#allocation87_spill] sm:$0xff] }
 0x39d   :  { %1214 = vmatprep.subr.mxu0 %v3561_v22 }
 0x39e   :  { %1215 = vmatpush2.msra.mxu0 %v1151_v52  ;;  %v3886_v52 = vld [vmem:[#allocation91_spill] sm:$0xff] }
 0x39f   :  { %1216 = vmatprep.subr.mxu0 %v3561_v22 }
 0x3a0   :  { %1217 = vmatpush2.msra.mxu0 %v1150_v23  ;;  %v3891_v23 = vld [vmem:[#allocation96_spill] sm:$0xff] }
 0x3a1   :  { %1218 = vmatprep.subr.mxu0 %v3561_v22 }
 0x3a2   :  { %1219 = vmatpush2.msra.mxu0 %v1149_v3  ;;  %v3894_v3 = vld [vmem:[#allocation99_spill] sm:$0xff] }
 0x3a3   :  { %1220 = vmatprep.subr.mxu0 %v3561_v22 }
 0x3a4   :  { %1221 = vmatpush2.msra.mxu0 %v1148_v48  ;;  %v3897_v48 = vld [vmem:[#allocation102_spill] sm:$0xff] }
 0x3a5   :  { %1222 = vmatprep.subr.mxu0 %v3561_v22 }
 0x3a6   :  { %1223 = vmatpush2.msra.mxu0 %v1147_v60  ;;  %v3899_v60 = vld [vmem:[#allocation104_spill] sm:$0xff] }
 0x3a7   :  { %1224 = vmatprep.subr.mxu0 %v3561_v22  ;;  %v3888_v22 = vld [vmem:[#allocation93_spill] sm:$0xff] }
 0x3a8   :  { %1225 = vmatpush2.msra.mxu0 %v1146_v62  ;;  %v3901_v62 = vld [vmem:[#allocation106_spill] sm:$0xff] }
 0x3a9   :  { %1227 = vmatmul.mubr.f32.vlgmr.msra.gmra.mxu0 %v3879_v37  ;;  %v3902_v37 = vld [vmem:[#allocation107_spill] sm:$0xff] }
 0x3aa   :  { %1231 = vmatprep.mubr.f32.mxu0 %v3880_v10  ;;  %v3903_v10 = vld [vmem:[#allocation108_spill] sm:$0xff] }
 0x3ad   :  { %1232 = vmatmul.mubr.f32.gmra.mxu0 %v3881_v19  ;;  %v3904_v19 = vld [vmem:[#allocation109_spill] sm:$0xff] }
 0x3ae   :  { %1236 = vmatprep.mubr.f32.mxu0 %v3882_v4  ;;  %v3905_v4 = vld [vmem:[#allocation110_spill] sm:$0xff] }
 0x3b1   :  { %1237 = vmatmul.mubr.f32.gmra.mxu0 %v3883_v29  ;;  %v3906_v29 = vld [vmem:[#allocation111_spill] sm:$0xff] }
 0x3b2   :  { %1241 = vmatprep.mubr.f32.mxu0 %v3884_v39  ;;  %v3907_v39 = vld [vmem:[#allocation112_spill] sm:$0xff] }
 0x3b5   :  { %1242 = vmatmul.mubr.f32.gmra.mxu0 %v3885_v11  ;;  %v3908_v11 = vld [vmem:[#allocation113_spill] sm:$0xff] }
 0x3b6   :  { %1246 = vmatprep.mubr.f32.mxu0 %v3886_v52  ;;  %v1764_v52 = vld [vmem:[#allocation2 + $0xf0] sm:$0xff] }
 0x3b9   :  { %1247 = vmatmul.mubr.f32.gmra.mxu0 %v3887_v38  ;;  %v3909_v38 = vld [vmem:[#allocation16_spill] sm:$0xff] }
 0x3ba   :  { %1251 = vmatprep.mubr.f32.mxu0 %v3888_v22  ;;  %v3910_v22 = vld [vmem:[#allocation114_spill] sm:$0xff] }
 0x3bd   :  { %1252 = vmatmul.mubr.f32.gmra.mxu0 %v3889_v27  ;;  %v3911_v27 = vld [vmem:[#allocation115_spill] sm:$0xff] }
 0x3be   :  { %1256 = vmatprep.mubr.f32.mxu0 %v3890_v51  ;;  %v3912_v51 = vld [vmem:[#allocation116_spill] sm:$0xff] }
 0x3c1   :  { %1257 = vmatmul.mubr.f32.gmra.mxu0 %v3891_v23  ;;  %v3913_v23 = vld [vmem:[#allocation117_spill] sm:$0xff] }
 0x3c2   :  { %1261 = vmatprep.mubr.f32.mxu0 %v3892_v14  ;;  %v3914_v14 = vld [vmem:[#allocation118_spill] sm:$0xff] }
 0x3c5   :  { %1262 = vmatmul.mubr.f32.gmra.mxu0 %v3893_v16  ;;  %v3915_v16 = vld [vmem:[#allocation119_spill] sm:$0xff] }
 0x3c6   :  { %1266 = vmatprep.mubr.f32.mxu0 %v3894_v3  ;;  %v3916_v3 = vld [vmem:[#allocation120_spill] sm:$0xff] }
 0x3c9   :  { %1267 = vmatmul.mubr.f32.gmra.mxu0 %v3895_v56  ;;  %v3917_v56 = vld [vmem:[#allocation121_spill] sm:$0xff] }
 0x3ca   :  { %1271 = vmatprep.mubr.f32.mxu0 %v3896_v40  ;;  %v3918_v40 = vld [vmem:[#allocation122_spill] sm:$0xff] }
 0x3cd   :  { %1272 = vmatmul.mubr.f32.gmra.mxu0 %v3897_v48  ;;  %v3919_v48 = vld [vmem:[#allocation123_spill] sm:$0xff] }
 0x3ce   :  { %1276 = vmatprep.mubr.f32.mxu0 %v3898_v46  ;;  %v3920_v46 = vld [vmem:[#allocation124_spill] sm:$0xff] }
 0x3d1   :  { %1277 = vmatmul.mubr.f32.gmra.mxu0 %v3899_v60  ;;  %v3921_v60 = vld [vmem:[#allocation125_spill] sm:$0xff] }
 0x3d2   :  { %1281 = vmatprep.mubr.f32.mxu0 %v3900_v21  ;;  %v3922_v21 = vld [vmem:[#allocation126_spill] sm:$0xff] }
 0x3d5   :  { %1282 = vmatmul.mubr.f32.gmra.mxu0 %v3901_v62  ;;  %v3923_v62 = vld [vmem:[#allocation127_spill] sm:$0xff] }
 0x3d6   :  { %1286 = vmatprep.mubr.f32.mxu0 %v3902_v37  ;;  %v3924_v37 = vld [vmem:[#allocation128_spill] sm:$0xff] }
 0x3d9   :  { %1287 = vmatmul.mubr.f32.gmra.mxu0 %v3903_v10  ;;  %v3925_v10 = vld [vmem:[#allocation129_spill] sm:$0xff] }
 0x3da   :  { %1291 = vmatprep.mubr.f32.mxu0 %v3904_v19  ;;  %v3926_v19 = vld [vmem:[#allocation130_spill] sm:$0xff] }
 0x3dd   :  { %1292 = vmatmul.mubr.f32.gmra.mxu0 %v3905_v4  ;;  %v3927_v4 = vld [vmem:[#allocation131_spill] sm:$0xff] }
 0x3de   :  { %1296 = vmatprep.mubr.f32.mxu0 %v3906_v29  ;;  %v3928_v29 = vld [vmem:[#allocation132_spill] sm:$0xff] }
 0x3e1   :  { %1297 = vmatmul.mubr.f32.gmra.mxu0 %v3907_v39  ;;  %v3929_v39 = vld [vmem:[#allocation133_spill] sm:$0xff] }
 0x3e2   :  { %1301 = vmatprep.mubr.f32.mxu0 %v3908_v11  ;;  %v3930_v11 = vld [vmem:[#allocation134_spill] sm:$0xff] }
 0x3e5   :  { %1302 = vmatmul.mubr.f32.gmra.mxu0 %v1764_v52  ;;  %v3931_v52 = vld [vmem:[#allocation135_spill] sm:$0xff] }
 0x3e6   :  { %1306 = vmatprep.mubr.f32.mxu0 %v3909_v38  ;;  %v3932_v38 = vld [vmem:[#allocation136_spill] sm:$0xff] }
 0x3e9   :  { %1307 = vmatmul.mubr.f32.gmra.mxu0 %v3910_v22  ;;  %v3933_v22 = vld [vmem:[#allocation137_spill] sm:$0xff] }
 0x3ea   :  { %1311 = vmatprep.mubr.f32.mxu0 %v3911_v27  ;;  %v3934_v27 = vld [vmem:[#allocation138_spill] sm:$0xff] }
 0x3ed   :  { %1312 = vmatmul.mubr.f32.gmra.mxu0 %v3912_v51  ;;  %v3935_v51 = vld [vmem:[#allocation139_spill] sm:$0xff] }
 0x3ee   :  { %1316 = vmatprep.mubr.f32.mxu0 %v3913_v23  ;;  %v3936_v23 = vld [vmem:[#allocation140_spill] sm:$0xff] }
 0x3f1   :  { %1317 = vmatmul.mubr.f32.gmra.mxu0 %v3914_v14  ;;  %v3937_v14 = vld [vmem:[#allocation141_spill] sm:$0xff] }
 0x3f2   :  { %1321 = vmatprep.mubr.f32.mxu0 %v3915_v16  ;;  %v3938_v16 = vld [vmem:[#allocation142_spill] sm:$0xff] }
 0x3f5   :  { %1322 = vmatmul.mubr.f32.gmra.mxu0 %v3916_v3  ;;  %v3939_v3 = vld [vmem:[#allocation143_spill] sm:$0xff] }
 0x3f6   :  { %1326 = vmatprep.mubr.f32.mxu0 %v3917_v56  ;;  %v3940_v56 = vld [vmem:[#allocation144_spill] sm:$0xff] }
 0x3f9   :  { %1327 = vmatmul.mubr.f32.gmra.mxu0 %v3918_v40 }
 0x3fa   :  { %1331 = vmatprep.mubr.f32.mxu0 %v3919_v48 }
 0x3fd   :  { %1332 = vmatmul.mubr.f32.gmra.mxu0 %v3920_v46 }
 0x3fe   :  { %1336 = vmatprep.mubr.f32.mxu0 %v3921_v60 }
 0x401   :  { %1337 = vmatmul.mubr.f32.gmra.mxu0 %v3922_v21 }
 0x402   :  { %1341 = vmatprep.mubr.f32.mxu0 %v3923_v62 }
 0x405   :  { %1342 = vmatmul.mubr.f32.gmra.mxu0 %v3924_v37 }
 0x406   :  { %1346 = vmatprep.mubr.f32.mxu0 %v3925_v10 }
 0x409   :  { %1347 = vmatmul.mubr.f32.gmra.mxu0 %v3926_v19 }
 0x40a   :  { %1351 = vmatprep.mubr.f32.mxu0 %v3927_v4 }
 0x40d   :  { %1352 = vmatmul.mubr.f32.gmra.mxu0 %v3928_v29 }
 0x40e   :  { %1356 = vmatprep.mubr.f32.mxu0 %v3929_v39 }
 0x411   :  { %1357 = vmatmul.mubr.f32.gmra.mxu0 %v3930_v11 }
 0x412   :  { %1361 = vmatprep.mubr.f32.mxu0 %v3931_v52 }
 0x415   :  { %1362 = vmatmul.mubr.f32.gmra.mxu0 %v3932_v38 }
 0x416   :  { %1366 = vmatprep.mubr.f32.mxu0 %v3933_v22 }
 0x419   :  { %1367 = vmatmul.mubr.f32.gmra.mxu0 %v3934_v27 }
 0x41a   :  { %1371 = vmatprep.mubr.f32.mxu0 %v3935_v51 }
 0x41d   :  { %1372 = vmatmul.mubr.f32.gmra.mxu0 %v3936_v23 }
 0x41e   :  { %1376 = vmatprep.mubr.f32.mxu0 %v3937_v14 }
 0x421   :  { %1377 = vmatmul.mubr.f32.gmra.mxu0 %v3938_v16 }
 0x422   :  { %1381 = vmatprep.mubr.f32.mxu0 %v3939_v3 }
 0x425   :  { %1382 = vmatmul.mubr.f32.gmra.mxu0 %v3940_v56 }
 0x469   :  { %v1228_v40 = vpop.f32.mrf.mxu0 }
 0x46a   :  { %v1387_v48 = vmul.f32 %v1228_v40, %v3837_v20 }
 0x46b   :  { %v1230_v46 = vpop.f32.mrf.mxu0 }
 0x46c   :  { %v1419_v60 = vadd.f32 %v1387_v48, %v3839_v43 }
 0x46d   :  { %v1233_v21 = vpop.f32.mrf.mxu0 }
 0x46e   :  { %v1451_v62 = vmax.f32 %v1419_v60, 0.0  ;;  %v1388_v37 = vmul.f32 %v1233_v21, %v3834_v61 }
 0x46f   :  { %v1235_v10 = vpop.f32.mrf.mxu0 }
 0x470   :  { %v1483_v19 = vmin.f32 %v1451_v62, 1.0  ;;  %v1420_v4 = vadd.f32 %v1388_v37, %v3838_v31 }
 0x471   :  { %v1238_v29 = vpop.f32.mrf.mxu0 }
 0x472   :  { %1515 = vst [vmem:[#allocation7] sm:$0xff] %v1483_v19  ;;  %v1452_v39 = vmax.f32 %v1420_v4, 0.0  ;;  %v1389_v11 = vmul.f32 %v1238_v29, %v3832_v28 }
 0x473   :  { %v1240_v52 = vpop.f32.mrf.mxu0 }
 0x474   :  { %v1484_v38 = vmin.f32 %v1452_v39, 1.0  ;;  %v1421_v20 = vadd.f32 %v1389_v11, %v2548_v8 }
 0x475   :  { %v1243_v22 = vpop.f32.mrf.mxu0 }
 0x476   :  { %1516 = vst [vmem:[#allocation7 + $0x8] sm:$0xff] %v1484_v38  ;;  %v1453_v43 = vmax.f32 %v1421_v20, 0.0  ;;  %v1390_v27 = vmul.f32 %v1243_v22, %v3830_v1 }
 0x477   :  { %v1245_v51 = vpop.f32.mrf.mxu0 }
 0x478   :  { %v1485_v61 = vmin.f32 %v1453_v43, 1.0  ;;  %v1422_v23 = vadd.f32 %v1390_v27, %v3835_v24  ;;  %v3941_v51 = vld [vmem:[#allocation31_spill] sm:$0xff] }
 0x479   :  { %v1248_v14 = vpop.f32.mrf.mxu0 }
 0x47a   :  { %1517 = vst [vmem:[#allocation7 + $0x10] sm:$0xff] %v1485_v61  ;;  %v1454_v31 = vmax.f32 %v1422_v23, 0.0  ;;  %v1391_v16 = vmul.f32 %v1248_v14, %v3828_v57  ;;  %v3942_v14 = vld [vmem:[#allocation27_spill] sm:$0xff] }
 0x47b   :  { %v1250_v3 = vpop.f32.mrf.mxu0 }
 0x47c   :  { %v1486_v28 = vmin.f32 %v1454_v31, 1.0  ;;  %v1423_v56 = vadd.f32 %v1391_v16, %v2526_v12  ;;  %v3943_v3 = vld [vmem:[#allocation30_spill] sm:$0xff] }
 0x47d   :  { %v1253_v40 = vpop.f32.mrf.mxu0 }
 0x47e   :  { %1518 = vst [vmem:[#allocation7 + $0x18] sm:$0xff] %v1486_v28  ;;  %v1455_v8 = vmax.f32 %v1423_v56, 0.0  ;;  %v1392_v48 = vmul.f32 %v1253_v40, %v3826_v35  ;;  %v3944_v40 = vld [vmem:[#allocation19_spill] sm:$0xff] }
 0x47f   :  { %v1255_v46 = vpop.f32.mrf.mxu0 }
 0x480   :  { %v1487_v1 = vmin.f32 %v1455_v8, 1.0  ;;  %v1424_v60 = vadd.f32 %v1392_v48, %v2515_v55  ;;  %v3945_v46 = vld [vmem:[#allocation17_spill] sm:$0xff] }
 0x481   :  { %v1258_v21 = vpop.f32.mrf.mxu0 }
 0x482   :  { %1519 = vst [vmem:[#allocation7 + $0x20] sm:$0xff] %v1487_v1  ;;  %v1456_v24 = vmax.f32 %v1424_v60, 0.0  ;;  %v1393_v62 = vmul.f32 %v1258_v21, %v3824_v58 }
 0x483   :  { %v1260_v37 = vpop.f32.mrf.mxu0 }
 0x484   :  { %v1488_v57 = vmin.f32 %v1456_v24, 1.0  ;;  %v1425_v10 = vadd.f32 %v1393_v62, %v2505_v0  ;;  %v3946_v24 = vld [vmem:[#allocation12_spill] sm:$0xff] }
 0x485   :  { %v1263_v19 = vpop.f32.mrf.mxu0 }
 0x486   :  { %1520 = vst [vmem:[#allocation7 + $0x28] sm:$0xff] %v1488_v57  ;;  %v1457_v12 = vmax.f32 %v1425_v10, 0.0  ;;  %v1394_v4 = vmul.f32 %v1263_v19, %v2489_v45  ;;  %v3947_v10 = vld [vmem:[#allocation11_spill] sm:$0xff] }
 0x487   :  { %v1265_v29 = vpop.f32.mrf.mxu0 }
 0x488   :  { %v1489_v35 = vmin.f32 %v1457_v12, 1.0  ;;  %v1426_v39 = vadd.f32 %v1394_v4, %v2495_v2  ;;  %v3948_v29 = vld [vmem:[#allocation14_spill] sm:$0xff] }
 0x489   :  { %v1268_v11 = vpop.f32.mrf.mxu0 }
 0x48a   :  { %1521 = vst [vmem:[#allocation7 + $0x30] sm:$0xff] %v1489_v35  ;;  %v1458_v55 = vmax.f32 %v1426_v39, 0.0  ;;  %v1395_v52 = vmul.f32 %v1268_v11, %v3822_v18 }
 0x48b   :  { %v1270_v38 = vpop.f32.mrf.mxu0 }
 0x48c   :  { %v1490_v58 = vmin.f32 %v1458_v55, 1.0  ;;  %v1427_v20 = vadd.f32 %v1395_v52, %v2486_v49  ;;  %v3949_v55 = vld [vmem:[#allocation21_spill] sm:$0xff] }
 0x48d   :  { %v1273_v22 = vpop.f32.mrf.mxu0 }
 0x48e   :  { %1522 = vst [vmem:[#allocation7 + $0x38] sm:$0xff] %v1490_v58  ;;  %v1459_v0 = vmax.f32 %v1427_v20, 0.0  ;;  %v1396_v43 = vmul.f32 %v1273_v22, %v3820_v7  ;;  %v3950_v20 = vld [vmem:[#allocation13_spill] sm:$0xff] }
 0x48f   :  { %v1275_v27 = vpop.f32.mrf.mxu0 }
 0x490   :  { %v1491_v45 = vmin.f32 %v1459_v0, 1.0  ;;  %v1428_v61 = vadd.f32 %v1396_v43, %v3941_v51  ;;  %v3951_v27 = vld [vmem:[#allocation22_spill] sm:$0xff] }
 0x491   :  { %v1278_v23 = vpop.f32.mrf.mxu0 }
 0x492   :  { %1523 = vst [vmem:[#allocation7 + $0x40] sm:$0xff] %v1491_v45  ;;  %v1460_v2 = vmax.f32 %v1428_v61, 0.0  ;;  %v1397_v31 = vmul.f32 %v1278_v23, %v3942_v14  ;;  %v3952_v23 = vld [vmem:[#allocation18_spill] sm:$0xff] }
 0x493   :  { %v1280_v16 = vpop.f32.mrf.mxu0 }
 0x494   :  { %v1492_v18 = vmin.f32 %v1460_v2, 1.0  ;;  %v1429_v28 = vadd.f32 %v1397_v31, %v3943_v3  ;;  %v3953_v16 = vld [vmem:[#allocation20_spill] sm:$0xff] }
 0x495   :  { %v1283_v56 = vpop.f32.mrf.mxu0 }
 0x496   :  { %1524 = vst [vmem:[#allocation7 + $0x48] sm:$0xff] %v1492_v18  ;;  %v1461_v49 = vmax.f32 %v1429_v28, 0.0  ;;  %v1398_v8 = vmul.f32 %v1283_v56, %v3944_v40 }
 0x497   :  { %v1285_v48 = vpop.f32.mrf.mxu0 }
 0x498   :  { %v1493_v7 = vmin.f32 %v1461_v49, 1.0  ;;  %v1430_v1 = vadd.f32 %v1398_v8, %v3945_v46 }
 0x499   :  { %v1288_v60 = vpop.f32.mrf.mxu0 }
 0x49a   :  { %1525 = vst [vmem:[#allocation7 + $0x50] sm:$0xff] %v1493_v7  ;;  %v1462_v21 = vmax.f32 %v1430_v1, 0.0  ;;  %v1399_v62 = vmul.f32 %v1288_v60, %v3946_v24 }
 0x49b   :  { %v1290_v37 = vpop.f32.mrf.mxu0 }
 0x49c   :  { %v1494_v57 = vmin.f32 %v1462_v21, 1.0  ;;  %v1431_v19 = vadd.f32 %v1399_v62, %v3947_v10 }
 0x49d   :  { %v1293_v12 = vpop.f32.mrf.mxu0 }
 0x49e   :  { %1526 = vst [vmem:[#allocation7 + $0x58] sm:$0xff] %v1494_v57  ;;  %v1463_v4 = vmax.f32 %v1431_v19, 0.0  ;;  %v1400_v35 = vmul.f32 %v1293_v12, %v3948_v29 }
 0x49f   :  { %v1295_v39 = vpop.f32.mrf.mxu0 }
 0x4a0   :  { %v1495_v11 = vmin.f32 %v1463_v4, 1.0  ;;  %v1432_v52 = vadd.f32 %v1400_v35, %v3949_v55 }
 0x4a1   :  { %v1298_v38 = vpop.f32.mrf.mxu0 }
 0x4a2   :  { %1527 = vst [vmem:[#allocation7 + $0x60] sm:$0xff] %v1495_v11  ;;  %v1464_v58 = vmax.f32 %v1432_v52, 0.0  ;;  %v1401_v22 = vmul.f32 %v1298_v38, %v3950_v20 }
 0x4a3   :  { %v1300_v0 = vpop.f32.mrf.mxu0 }
 0x4a4   :  { %v1496_v43 = vmin.f32 %v1464_v58, 1.0  ;;  %v1433_v45 = vadd.f32 %v1401_v22, %v3951_v27 }
 0x4a5   :  { %v1303_v51 = vpop.f32.mrf.mxu0 }
 0x4a6   :  { %1528 = vst [vmem:[#allocation7 + $0x68] sm:$0xff] %v1496_v43  ;;  %v1465_v61 = vmax.f32 %v1433_v45, 0.0  ;;  %v1402_v2 = vmul.f32 %v1303_v51, %v3952_v23 }
 0x4a7   :  { %v1305_v14 = vpop.f32.mrf.mxu0 }
 0x4a8   :  { %v1497_v31 = vmin.f32 %v1465_v61, 1.0  ;;  %v1434_v18 = vadd.f32 %v1402_v2, %v3953_v16 }
 0x4a9   :  { %v1308_v3 = vpop.f32.mrf.mxu0 }
 0x4aa   :  { %1529 = vst [vmem:[#allocation7 + $0x70] sm:$0xff] %v1497_v31  ;;  %v1466_v28 = vmax.f32 %v1434_v18, 0.0  ;;  %v1403_v56 = vmul.f32 %v1308_v3, %v3866_v17 }
 0x4ab   :  { %v1310_v49 = vpop.f32.mrf.mxu0 }
 0x4ac   :  { %v1498_v40 = vmin.f32 %v1466_v28, 1.0  ;;  %v1435_v8 = vadd.f32 %v1403_v56, %v3871_v30 }
 0x4ad   :  { %v1313_v48 = vpop.f32.mrf.mxu0 }
 0x4ae   :  { %1530 = vst [vmem:[#allocation7 + $0x78] sm:$0xff] %v1498_v40  ;;  %v1467_v7 = vmax.f32 %v1435_v8, 0.0  ;;  %v1404_v46 = vmul.f32 %v1313_v48, %v3863_v36 }
 0x4af   :  { %v1315_v1 = vpop.f32.mrf.mxu0 }
 0x4b0   :  { %v1499_v60 = vmin.f32 %v1467_v7, 1.0  ;;  %v1436_v21 = vadd.f32 %v1404_v46, %v3869_v34  ;;  %v3954_v46 = vld [vmem:[#allocation53_spill] sm:$0xff] }
 0x4b1   :  { %v1318_v24 = vpop.f32.mrf.mxu0 }
 0x4b2   :  { %1531 = vst [vmem:[#allocation7 + $0x80] sm:$0xff] %v1499_v60  ;;  %v1468_v62 = vmax.f32 %v1436_v21, 0.0  ;;  %v1405_v37 = vmul.f32 %v1318_v24, %v3860_v9  ;;  %v3955_v21 = vld [vmem:[#allocation56_spill] sm:$0xff] }
 0x4b3   :  { %v1320_v57 = vpop.f32.mrf.mxu0 }
 0x4b4   :  { %v1500_v17 = vmin.f32 %v1468_v62, 1.0  ;;  %v1437_v10 = vadd.f32 %v1405_v37, %v3867_v13  ;;  %v3956_v37 = vld [vmem:[#allocation51_spill] sm:$0xff] }
 0x4b5   :  { %v1323_v19 = vpop.f32.mrf.mxu0 }
 0x4b6   :  { %1532 = vst [vmem:[#allocation7 + $0x88] sm:$0xff] %v1500_v17  ;;  %v1469_v30 = vmax.f32 %v1437_v10, 0.0  ;;  %v1406_v12 = vmul.f32 %v1323_v19, %v3857_v33  ;;  %v3957_v10 = vld [vmem:[#allocation54_spill] sm:$0xff] }
 0x4b7   :  { %v1325_v4 = vpop.f32.mrf.mxu0 }
 0x4b8   :  { %v1501_v36 = vmin.f32 %v1469_v30, 1.0  ;;  %v1438_v29 = vadd.f32 %v1406_v12, %v3864_v15  ;;  %v3958_v12 = vld [vmem:[#allocation49_spill] sm:$0xff] }
 0x4b9   :  { %v1328_v35 = vpop.f32.mrf.mxu0 }
 0x4ba   :  { %1533 = vst [vmem:[#allocation7 + $0x90] sm:$0xff] %v1501_v36  ;;  %v1470_v34 = vmax.f32 %v1438_v29, 0.0  ;;  %v1407_v39 = vmul.f32 %v1328_v35, %v3855_v63  ;;  %v3959_v35 = vld [vmem:[#allocation52_spill] sm:$0xff] }
 0x4bb   :  { %v1330_v11 = vpop.f32.mrf.mxu0 }
 0x4bc   :  { %v1502_v9 = vmin.f32 %v1470_v34, 1.0  ;;  %v1439_v55 = vadd.f32 %v1407_v39, %v3861_v5 }
 0x4bd   :  { %v1333_v52 = vpop.f32.mrf.mxu0 }
 0x4be   :  { %1534 = vst [vmem:[#allocation7 + $0x98] sm:$0xff] %v1502_v9  ;;  %v1471_v13 = vmax.f32 %v1439_v55, 0.0  ;;  %v1408_v38 = vmul.f32 %v1333_v52, %v3854_v41  ;;  %v3960_v9 = vld [vmem:[#allocation47_spill] sm:$0xff] }
 0x4bf   :  { %v1335_v58 = vpop.f32.mrf.mxu0 }
 0x4c0   :  { %v1503_v33 = vmin.f32 %v1471_v13, 1.0  ;;  %v1440_v20 = vadd.f32 %v1408_v38, %v3858_v42  ;;  %v3961_v38 = vld [vmem:[#allocation50_spill] sm:$0xff] }
 0x4c1   :  { %v1338_v22 = vpop.f32.mrf.mxu0 }
 0x4c2   :  { %1535 = vst [vmem:[#allocation7 + $0xa0] sm:$0xff] %v1503_v33  ;;  %v1472_v15 = vmax.f32 %v1440_v20, 0.0  ;;  %v1409_v0 = vmul.f32 %v1338_v22, %v3852_v47  ;;  %v3962_v22 = vld [vmem:[#allocation45_spill] sm:$0xff] }
 0x4c3   :  { %v1340_v43 = vpop.f32.mrf.mxu0 }
 0x4c4   :  { %v1504_v63 = vmin.f32 %v1472_v15, 1.0  ;;  %v1441_v27 = vadd.f32 %v1409_v0, %v2680_v25 }
 0x4c5   :  { %v1343_v45 = vpop.f32.mrf.mxu0 }
 0x4c6   :  { %1536 = vst [vmem:[#allocation7 + $0xa8] sm:$0xff] %v1504_v63  ;;  %v1473_v5 = vmax.f32 %v1441_v27, 0.0  ;;  %v1410_v51 = vmul.f32 %v1343_v45, %v3850_v26  ;;  %v3963_v63 = vld [vmem:[#allocation48_spill] sm:$0xff] }
 0x4c7   :  { %v1345_v61 = vpop.f32.mrf.mxu0 }
 0x4c8   :  { %v1505_v41 = vmin.f32 %v1473_v5, 1.0  ;;  %v1442_v23 = vadd.f32 %v1410_v51, %v2669_v59 }
 0x4c9   :  { %v1348_v2 = vpop.f32.mrf.mxu0 }
 0x4ca   :  { %1537 = vst [vmem:[#allocation7 + $0xb0] sm:$0xff] %v1505_v41  ;;  %v1474_v42 = vmax.f32 %v1442_v23, 0.0  ;;  %v1411_v14 = vmul.f32 %v1348_v2, %v2651_v6 }
 0x4cb   :  { %v1350_v31 = vpop.f32.mrf.mxu0 }
 0x4cc   :  { %v1506_v47 = vmin.f32 %v1474_v42, 1.0  ;;  %v1443_v16 = vadd.f32 %v1411_v14, %v2658_v32 }
 0x4cd   :  { %v1353_v18 = vpop.f32.mrf.mxu0 }
 0x4ce   :  { %1538 = vst [vmem:[#allocation7 + $0xb8] sm:$0xff] %v1506_v47  ;;  %v1475_v25 = vmax.f32 %v1443_v16, 0.0  ;;  %v1412_v3 = vmul.f32 %v1353_v18, %v3847_v44 }
 0x4cf   :  { %v1355_v28 = vpop.f32.mrf.mxu0 }
 0x4d0   :  { %v1507_v26 = vmin.f32 %v1475_v25, 1.0  ;;  %v1444_v56 = vadd.f32 %v1412_v3, %v2647_v54 }
 0x4d1   :  { %v1358_v49 = vpop.f32.mrf.mxu0 }
 0x4d2   :  { %1539 = vst [vmem:[#allocation7 + $0xc0] sm:$0xff] %v1507_v26  ;;  %v1476_v59 = vmax.f32 %v1444_v56, 0.0  ;;  %v1413_v40 = vmul.f32 %v1358_v49, %v2628_v53 }
 0x4d3   :  { %v1360_v8 = vpop.f32.mrf.mxu0 }
 0x4d4   :  { %v1508_v6 = vmin.f32 %v1476_v59, 1.0  ;;  %v1445_v48 = vadd.f32 %v1413_v40, %v3849_v50 }
 0x4d5   :  { %v1363_v7 = vpop.f32.mrf.mxu0 }
 0x4d6   :  { %1540 = vst [vmem:[#allocation7 + $0xc8] sm:$0xff] %v1508_v6  ;;  %v1477_v32 = vmax.f32 %v1445_v48, 0.0  ;;  %v1414_v1 = vmul.f32 %v1363_v7, %v3954_v46 }
 0x4d7   :  { %v1365_v60 = vpop.f32.mrf.mxu0 }
 0x4d8   :  { %v1509_v44 = vmin.f32 %v1477_v32, 1.0  ;;  %v1446_v24 = vadd.f32 %v1414_v1, %v3955_v21 }
 0x4d9   :  { %v1368_v62 = vpop.f32.mrf.mxu0 }
 0x4da   :  { %1541 = vst [vmem:[#allocation7 + $0xd0] sm:$0xff] %v1509_v44  ;;  %v1478_v54 = vmax.f32 %v1446_v24, 0.0  ;;  %v1415_v57 = vmul.f32 %v1368_v62, %v3956_v37 }
 0x4db   :  { %v1370_v17 = vpop.f32.mrf.mxu0 }
 0x4dc   :  { %v1510_v53 = vmin.f32 %v1478_v54, 1.0  ;;  %v1447_v19 = vadd.f32 %v1415_v57, %v3957_v10 }
 0x4dd   :  { %v1373_v30 = vpop.f32.mrf.mxu0 }
 0x4de   :  { %1542 = vst [vmem:[#allocation7 + $0xd8] sm:$0xff] %v1510_v53  ;;  %v1479_v50 = vmax.f32 %v1447_v19, 0.0  ;;  %v1416_v4 = vmul.f32 %v1373_v30, %v3958_v12 }
 0x4df   :  { %v1375_v36 = vpop.f32.mrf.mxu0 }
 0x4e0   :  { %v1511_v29 = vmin.f32 %v1479_v50, 1.0  ;;  %v1448_v34 = vadd.f32 %v1416_v4, %v3959_v35 }
 0x4e1   :  { %v1378_v39 = vpop.f32.mrf.mxu0 }
 0x4e2   :  { %1543 = vst [vmem:[#allocation7 + $0xe0] sm:$0xff] %v1511_v29  ;;  %v1480_v11 = vmax.f32 %v1448_v34, 0.0  ;;  %v1417_v55 = vmul.f32 %v1378_v39, %v3960_v9 }
 0x4e3   :  { %v1380_v52 = vpop.f32.mrf.mxu0 }
 0x4e4   :  { %v1512_v13 = vmin.f32 %v1480_v11, 1.0  ;;  %v1449_v58 = vadd.f32 %v1417_v55, %v3961_v38 }
 0x4e5   :  { %v1383_v33 = vpop.f32.mrf.mxu0 }
 0x4e6   :  { %1544 = vst [vmem:[#allocation7 + $0xe8] sm:$0xff] %v1512_v13  ;;  %v1481_v20 = vmax.f32 %v1449_v58, 0.0  ;;  %v1418_v15 = vmul.f32 %v1383_v33, %v3962_v22 }
 0x4e7   :  { %v1385_v0 = vpop.f32.mrf.mxu0 }
 0x4e8   :  { %v1513_v43 = vmin.f32 %v1481_v20, 1.0  ;;  %v1450_v27 = vadd.f32 %v1418_v15, %v3963_v63 }
 0x4ea   :  { %1545 = vst [vmem:[#allocation7 + $0xf0] sm:$0xff] %v1513_v43  ;;  %v1482_v45 = vmax.f32 %v1450_v27, 0.0 }
 0x4ec   :  { %v1514_v5 = vmin.f32 %v1482_v45, 1.0 }
 0x4ee   :  { %1546 = vst [vmem:[#allocation7 + $0xf8] sm:$0xff] %v1514_v5 }
 0x4ef   :  { %1816 = shalt.err (!%p1813_p0)
}
 0x4f0   :  { %1558 = dma.vmem_to_hbm [thread:$0]  %s1553_s1, 4096, %s3256_s2, [#allocation4], %s1835_s19, %s1835_s19, %s1836_s20  }
 0x4f1   :  { %1829 = dma.done.wait [#allocation4], 4096  }
 0x4f2   :  { %1830 = vsyncadd [#allocation4], 4294963200 }
 0x4f3   :  { %1562 = vsyncpa [#allocation3], 1 }
 0x4f4   :  { %1563 = vsyncpa [#allocation6], 1 }
 0x4f5   :  { %1564 = vsyncpa [#allocation4], 1 }

</bundles_post_ra>
